<compile_context>
chip_gen: v5e
topology: v5e:2x2
jax: 0.10.0
libtpu: 0.0.40
codegen_flags: <defaults>
</compile_context>

<pallas_src>
import numpy as np
import jax
import jax.numpy as jnp
from jax import lax
from jax.experimental import pallas as pl
from jax.experimental.pallas import tpu as pltpu

EPS = 1e-5  # nn.LayerNorm default eps


def _round_up(x, m):
    return ((x + m - 1) // m) * m


def _vmem_limit_bytes():
    """~75% of per-core VMEM: ~96 MiB on v5e/v6e (128 MiB), ~48 MiB on v7x (64 MiB)."""
    try:
        info = pltpu.get_tpu_info()
        cap = int(getattr(info, "vmem_capacity_bytes", 64 * 1024 * 1024))
    except Exception:
        cap = 64 * 1024 * 1024
    return min((cap * 3) // 4, 100 * 1024 * 1024)


def make_kernel(S, S_pad, E, nhead, TQ, kv_per_tile):
    hd = E // nhead
    scale = 1.0 / float(hd) ** 0.5
    bf16 = jnp.bfloat16

    def kernel(src_ref, pos_ref,
               wq_ref, bq_ref, wk_ref, bk_ref, wv_ref, bv_ref, wo_ref, bo_ref,
               w1_ref, b1_ref, w2_ref, b2_ref,
               g1_ref, be1_ref, g2_ref, be2_ref,
               out_ref, k_scr, v_scr):
        # TODO(synk): dropout layers are identity here (eval / inference semantics).
        qi = pl.program_id(1)

        # ---- K / V projections over the full (padded) sequence -----------------
        # Cached in bf16 VMEM scratch and reused by every query tile of this batch
        # element (q-tile grid axis is "arbitrary" => sequential; scratch persists).
        def project_kv():
            x_full = src_ref[...]                                   # (S_pad, E) f32
            qk_full = (x_full + pos_ref[...]).astype(bf16)          # key input
            k_scr[...] = (jnp.dot(qk_full, wk_ref[...],
                                  preferred_element_type=jnp.float32)
                          + bk_ref[...]).astype(bf16)
            v_scr[...] = (jnp.dot(x_full.astype(bf16), wv_ref[...],
                                  preferred_element_type=jnp.float32)
                          + bv_ref[...]).astype(bf16)

        if kv_per_tile:
            # B == 1 megacore mode: q-tile axis is "parallel", every tile projects
            # its own K/V (cheaper than idling a v7x TensorCore for 2 tiles).
            project_kv()
        else:
            pl.when(qi == 0)(project_kv)

        # ---- Q projection for this query tile only -----------------------------
        row0 = pl.multiple_of(qi * TQ, TQ)
        x_blk = src_ref[pl.ds(row0, TQ), :]                         # (TQ, E) f32
        qk_blk = (x_blk + pos_ref[pl.ds(row0, TQ), :]).astype(bf16)
        q_blk = ((jnp.dot(qk_blk, wq_ref[...],
                          preferred_element_type=jnp.float32)
                  + bq_ref[...]) * scale).astype(bf16)              # pre-scaled Q

        # additive key-padding mask (only materialized when S was padded)
        if S_pad != S:
            col = lax.broadcasted_iota(jnp.int32, (TQ, S_pad), 1)
            key_bias = jnp.where(col < S, 0.0, -1e30)
        else:
            key_bias = None

        # ---- multi-head attention, accumulated through the output projection ---
        # Each head's PV result (TQ, hd) multiplies its row-slice of W_o directly,
        # so no lane-masked scratch stores and no head concatenation are needed.
        # TODO(synk): for very large S add a KV grid axis with online softmax
        # (flash pattern) so residency is O(TQ*TK) instead of O(S*E).
        dn_qk = (((1,), (1,)), ((), ()))       # contract last axis of both operands
        attn = None
        for h in range(nhead):                 # nhead is small & static
            sl = slice(h * hd, (h + 1) * hd)
            s = lax.dot_general(q_blk[:, sl], k_scr[:, sl], dn_qk,
                                preferred_element_type=jnp.float32)   # (TQ, S_pad)
            if key_bias is not None:
                s = s + key_bias
            s = s - jnp.max(s, axis=-1, keepdims=True)
            e = jnp.exp(s)
            inv = pl.reciprocal(jnp.sum(e, axis=-1, keepdims=True), approx=True)
            p = (e * inv).astype(bf16)
            pv = jnp.dot(p, v_scr[:, sl],
                         preferred_element_type=jnp.float32).astype(bf16)  # (TQ, hd)
            contrib = jnp.dot(pv, wo_ref[sl, :],
                              preferred_element_type=jnp.float32)          # (TQ, E)
            attn = contrib if attn is None else attn + contrib
        attn = attn + bo_ref[...]

        # ---- residual + LayerNorm 1 (single-pass stats, clamped variance) ------
        r1 = x_blk + attn
        mu1 = jnp.mean(r1, axis=-1, keepdims=True)
        var1 = jnp.maximum(jnp.mean(r1 * r1, axis=-1, keepdims=True) - mu1 * mu1, 0.0)
        y = (r1 - mu1) * lax.rsqrt(var1 + EPS) * g1_ref[...] + be1_ref[...]

        # ---- feed-forward: linear1 -> ReLU -> linear2 ---------------------------
        h1 = (jnp.dot(y.astype(bf16), w1_ref[...],
                      preferred_element_type=jnp.float32) + b1_ref[...])
        h1 = jnp.maximum(h1, 0.0)
        ff = (jnp.dot(h1.astype(bf16), w2_ref[...],
                      preferred_element_type=jnp.float32) + b2_ref[...])

        # ---- residual + LayerNorm 2 ---------------------------------------------
        r2 = y + ff
        mu2 = jnp.mean(r2, axis=-1, keepdims=True)
        var2 = jnp.maximum(jnp.mean(r2 * r2, axis=-1, keepdims=True) - mu2 * mu2, 0.0)
        out_ref[...] = ((r2 - mu2) * lax.rsqrt(var2 + EPS)
                        * g2_ref[...] + be2_ref[...]).astype(out_ref.dtype)

    return kernel


def transformer_encoder_layer(src, pos, params, nhead, *, q_tile=128):
    B, S, E = src.shape
    FF = params["w1"].shape[1]
    assert E % nhead == 0

    # ---- query-tile selection (no "TQ = S" fallback: ragged S is padded) -------
    if S > q_tile:
        TQ = q_tile
    else:
        TQ = _round_up(max(S, 8), 8)
    # v7x has 2 TensorCores: with B == 1 and a single q-tile one core idles, so
    # split the sequence into two parallel tiles (K/V recomputed per tile then).
    split_for_megacore = (B == 1 and S <= q_tile and TQ >= 16)
    if split_for_megacore:
        TQ = _round_up((S + 1) // 2, 8)
    S_pad = _round_up(S, TQ)
    n_q_tiles = S_pad // TQ
    kv_per_tile = split_for_megacore and n_q_tiles > 1

    if S_pad != S:
        pad = [(0, 0), (0, S_pad - S), (0, 0)]
        src_p, pos_p = jnp.pad(src, pad), jnp.pad(pos, pad)
    else:
        src_p, pos_p = src, pos

    kernel = make_kernel(S, S_pad, E, nhead, TQ, kv_per_tile)
    bf16 = jnp.bfloat16

    # Weights as bf16 matmul operands (f32 accumulation); biases / LN params f32.
    wq, bq = params["wq"].astype(bf16), params["bq"]
    wk, bk = params["wk"].astype(bf16), params["bk"]
    wv, bv = params["wv"].astype(bf16), params["bv"]
    wo, bo = params["wo"].astype(bf16), params["bo"]
    w1, b1 = params["w1"].astype(bf16), params["b1"]
    w2, b2 = params["w2"].astype(bf16), params["b2"]

    args = (src_p, pos_p, wq, bq, wk, bk, wv, bv, wo, bo,
            w1, b1, w2, b2,
            params["g1"], params["be1"], params["g2"], params["be2"])

    # Advisory cost estimate for XLA scheduling around the custom call.
    flops = int(B * (8 * S_pad * E * E + 4 * S_pad * S_pad * E + 4 * S_pad * E * FF))
    transcendentals = int(B * (nhead * S_pad * S_pad + nhead * S_pad + 4 * S_pad))
    weight_bytes = 2 * (4 * E * E + 2 * E * FF) + 4 * (9 * E + FF)
    bytes_accessed = int(3 * B * S_pad * E * 4 + weight_bytes)

    dim_sem = ("parallel", "parallel") if kv_per_tile else ("parallel", "arbitrary")
    vmem_limit = _vmem_limit_bytes()

    def build(weight_buffer_count, vmem_limit_bytes):
        def const_spec(shape):
            # Constant block index: loaded once for the whole grid.  A single
            # pipeline buffer halves weight VMEM residency.
            if weight_buffer_count is None:
                return pl.BlockSpec(shape, lambda b, i: (0,) * len(shape))
            return pl.BlockSpec(shape, lambda b, i: (0,) * len(shape),
                                pipeline_mode=pl.Buffered(weight_buffer_count))

        in_specs = [
            pl.BlockSpec((pl.Squeezed(), S_pad, E), lambda b, i: (b, 0, 0)),  # src
            pl.BlockSpec((pl.Squeezed(), S_pad, E), lambda b, i: (b, 0, 0)),  # pos
            const_spec((E, E)), const_spec((1, E)),      # wq, bq
            const_spec((E, E)), const_spec((1, E)),      # wk, bk
            const_spec((E, E)), const_spec((1, E)),      # wv, bv
            const_spec((E, E)), const_spec((1, E)),      # wo, bo
            const_spec((E, FF)), const_spec((1, FF)),    # w1, b1
            const_spec((FF, E)), const_spec((1, E)),     # w2, b2
            const_spec((1, E)), const_spec((1, E)),      # ln1 gamma/beta
            const_spec((1, E)), const_spec((1, E)),      # ln2 gamma/beta
        ]
        out_spec = pl.BlockSpec((pl.Squeezed(), TQ, E), lambda b, i: (b, i, 0))

        # TODO(synk): for very large E/FF (v7x 64 MiB VMEM) keep w1/w2/wq.. in HBM
        # (memory_space=pl.ANY) and stream contraction tiles with pltpu.emit_pipeline.
        grid_spec = pltpu.PrefetchScalarGridSpec(
            num_scalar_prefetch=0,
            grid=(B, n_q_tiles),
            in_specs=in_specs,
            out_specs=out_spec,
            scratch_shapes=[pltpu.VMEM((S_pad, E), bf16),    # K cache
                            pltpu.VMEM((S_pad, E), bf16)],   # V cache
        )
        return pl.pallas_call(
            kernel,
            grid_spec=grid_spec,
            out_shape=jax.ShapeDtypeStruct((B, S_pad, E), jnp.float32),
            compiler_params=pltpu.CompilerParams(
                dimension_semantics=dim_sem,
                vmem_limit_bytes=vmem_limit_bytes),
            cost_estimate=pl.CostEstimate(flops=flops,
                                          transcendentals=transcendentals,
                                          bytes_accessed=bytes_accessed),
        )

    # Preferred config first; conservative fallback if pl.Buffered(1) (or the
    # larger VMEM limit) is rejected by this JAX/Mosaic version.
    attempts = (
        dict(weight_buffer_count=1, vmem_limit_bytes=vmem_limit),
        dict(weight_buffer_count=None,
             vmem_limit_bytes=min(vmem_limit, 48 * 1024 * 1024)),
    )
    out, last_err = None, None
    for cfg in attempts:
        try:
            out = jax.block_until_ready(build(**cfg)(*args))
            break
        except Exception as e:   # noqa: BLE001 - fall back to the safe config
            last_err = e
    if out is None:
        raise last_err

    return out[:, :S, :] if S_pad != S else out


def ref_forward(src, pos, params, nhead):
    """Pure-JAX f32 reference mirroring the PyTorch forward (dropout = identity)."""
    B, S, E = src.shape
    hd = E // nhead
    qk = src + pos
    q = qk @ params["wq"] + params["bq"]
    k = qk @ params["wk"] + params["bk"]
    v = src @ params["wv"] + params["bv"]

    def split(t):  # (B, S, E) -> (B, H, S, hd)
        return t.reshape(B, S, nhead, hd).transpose(0, 2, 1, 3)

    qh, kh, vh = split(q), split(k), split(v)
    scores = jnp.einsum("bhqd,bhkd->bhqk", qh, kh) / (hd ** 0.5)
    a = jax.nn.softmax(scores, axis=-1)
    o = jnp.einsum("bhqk,bhkd->bhqd", a, vh).transpose(0, 2, 1, 3).reshape(B, S, E)
    attn = o @ params["wo"] + params["bo"]

    def layernorm(t, g, b):
        mu = jnp.mean(t, axis=-1, keepdims=True)
        var = jnp.mean((t - mu) ** 2, axis=-1, keepdims=True)
        return (t - mu) * lax.rsqrt(var + EPS) * g + b

    y = layernorm(src + attn, params["g1"], params["be1"])
    ff = jnp.maximum(y @ params["w1"] + params["b1"], 0.0) @ params["w2"] + params["b2"]
    return layernorm(y + ff, params["g2"], params["be2"])


if __name__ == "__main__":
    # Small but lane-dense model dim (E multiple of 128 -> unmasked vector stores).
    E, NHEAD, FF = 128, 4, 256

    key = jax.random.PRNGKey(0)
    keys = jax.random.split(key, 20)
    std = 0.02

    params = {
        "wq": jax.random.normal(keys[0], (E, E), jnp.float32) * std,
        "bq": jax.random.normal(keys[1], (1, E), jnp.float32) * std,
        "wk": jax.random.normal(keys[2], (E, E), jnp.float32) * std,
        "bk": jax.random.normal(keys[3], (1, E), jnp.float32) * std,
        "wv": jax.random.normal(keys[4], (E, E), jnp.float32) * std,
        "bv": jax.random.normal(keys[5], (1, E), jnp.float32) * std,
        "wo": jax.random.normal(keys[6], (E, E), jnp.float32) * std,
        "bo": jax.random.normal(keys[7], (1, E), jnp.float32) * std,
        "w1": jax.random.normal(keys[8], (E, FF), jnp.float32) * std,
        "b1": jax.random.normal(keys[9], (1, FF), jnp.float32) * std,
        "w2": jax.random.normal(keys[10], (FF, E), jnp.float32) * std,
        "b2": jax.random.normal(keys[11], (1, E), jnp.float32) * std,
        "g1": jnp.ones((1, E), jnp.float32),      # LayerNorm default init
        "be1": jnp.zeros((1, E), jnp.float32),
        "g2": jnp.ones((1, E), jnp.float32),
        "be2": jnp.zeros((1, E), jnp.float32),
    }

    def run_case(B, S, ka, kb, **kw):
        src = jax.random.normal(keys[ka], (B, S, E), jnp.float32)
        pos = jax.random.normal(keys[kb], (B, S, E), jnp.float32)
        out = jax.block_until_ready(
            transformer_encoder_layer(src, pos, params, NHEAD, **kw))
        ref = ref_forward(src, pos, params, NHEAD)
        # bf16 matmul operands + approximate softmax reciprocal -> loose tolerance.
        np.testing.assert_allclose(np.asarray(out), np.asarray(ref),
                                   rtol=2e-2, atol=2e-2)

    # 1) primary small case: single query tile, K/V cache trivially warm.
    run_case(2, 16, 12, 13)
    # 2) multi-tile + ragged S: exercises K/V caching across q-tiles, sequence
    #    padding and the key-padding mask (S=40, TQ=16 -> S_pad=48, 3 tiles).
    run_case(2, 40, 14, 15, q_tile=16)
    # 3) B == 1 megacore split: two parallel q-tiles, per-tile K/V projection.
    run_case(1, 16, 16, 17)

    print("KERNEL_OK")
</pallas_src>

<mosaic_0001>
module attributes {stable_mosaic.version = 11 : i64} {
  func.func @kernel(%arg0: i32, %arg1: i32, %arg2: memref<1x16x128xf32, #tpu.memory_space<vmem>>, %arg3: memref<1x16x128xf32, #tpu.memory_space<vmem>>, %arg4: memref<128x128xbf16, #tpu.memory_space<vmem>>, %arg5: memref<1x128xf32, #tpu.memory_space<vmem>>, %arg6: memref<128x128xbf16, #tpu.memory_space<vmem>>, %arg7: memref<1x128xf32, #tpu.memory_space<vmem>>, %arg8: memref<128x128xbf16, #tpu.memory_space<vmem>>, %arg9: memref<1x128xf32, #tpu.memory_space<vmem>>, %arg10: memref<128x128xbf16, #tpu.memory_space<vmem>>, %arg11: memref<1x128xf32, #tpu.memory_space<vmem>>, %arg12: memref<128x256xbf16, #tpu.memory_space<vmem>>, %arg13: memref<1x256xf32, #tpu.memory_space<vmem>>, %arg14: memref<256x128xbf16, #tpu.memory_space<vmem>>, %arg15: memref<1x128xf32, #tpu.memory_space<vmem>>, %arg16: memref<1x128xf32, #tpu.memory_space<vmem>>, %arg17: memref<1x128xf32, #tpu.memory_space<vmem>>, %arg18: memref<1x128xf32, #tpu.memory_space<vmem>>, %arg19: memref<1x128xf32, #tpu.memory_space<vmem>>, %arg20: memref<1x16x128xf32, #tpu.memory_space<vmem>>, %arg21: memref<16x128xbf16, #tpu.memory_space<vmem>>, %arg22: memref<16x128xbf16, #tpu.memory_space<vmem>>) attributes {dimension_semantics = [#tpu.dimension_semantics<parallel>, #tpu.dimension_semantics<arbitrary>], iteration_bounds = array<i64: 2, 1>, scalar_prefetch = 0 : i64, scratch_operands = 2 : i64, tpu.core_type = #tpu.core_type<tc>, window_params = [{transform_indices = @transform_0, window_bounds = array<i64: 1, 16, 128>}, {transform_indices = @transform_1, window_bounds = array<i64: 1, 16, 128>}, {pipeline_mode = #tpu.pipeline_mode<synchronous>, transform_indices = @transform_2, window_bounds = array<i64: 128, 128>}, {pipeline_mode = #tpu.pipeline_mode<synchronous>, transform_indices = @transform_3, window_bounds = array<i64: 1, 128>}, {pipeline_mode = #tpu.pipeline_mode<synchronous>, transform_indices = @transform_4, window_bounds = array<i64: 128, 128>}, {pipeline_mode = #tpu.pipeline_mode<synchronous>, transform_indices = @transform_5, window_bounds = array<i64: 1, 128>}, {pipeline_mode = #tpu.pipeline_mode<synchronous>, transform_indices = @transform_6, window_bounds = array<i64: 128, 128>}, {pipeline_mode = #tpu.pipeline_mode<synchronous>, transform_indices = @transform_7, window_bounds = array<i64: 1, 128>}, {pipeline_mode = #tpu.pipeline_mode<synchronous>, transform_indices = @transform_8, window_bounds = array<i64: 128, 128>}, {pipeline_mode = #tpu.pipeline_mode<synchronous>, transform_indices = @transform_9, window_bounds = array<i64: 1, 128>}, {pipeline_mode = #tpu.pipeline_mode<synchronous>, transform_indices = @transform_10, window_bounds = array<i64: 128, 256>}, {pipeline_mode = #tpu.pipeline_mode<synchronous>, transform_indices = @transform_11, window_bounds = array<i64: 1, 256>}, {pipeline_mode = #tpu.pipeline_mode<synchronous>, transform_indices = @transform_12, window_bounds = array<i64: 256, 128>}, {pipeline_mode = #tpu.pipeline_mode<synchronous>, transform_indices = @transform_13, window_bounds = array<i64: 1, 128>}, {pipeline_mode = #tpu.pipeline_mode<synchronous>, transform_indices = @transform_14, window_bounds = array<i64: 1, 128>}, {pipeline_mode = #tpu.pipeline_mode<synchronous>, transform_indices = @transform_15, window_bounds = array<i64: 1, 128>}, {pipeline_mode = #tpu.pipeline_mode<synchronous>, transform_indices = @transform_16, window_bounds = array<i64: 1, 128>}, {pipeline_mode = #tpu.pipeline_mode<synchronous>, transform_indices = @transform_17, window_bounds = array<i64: 1, 128>}, {transform_indices = @transform_18, window_bounds = array<i64: 1, 16, 128>}]} {
    %c0_i32 = arith.constant 0 : i32
    %0 = arith.cmpi eq, %arg1, %c0_i32 : i32
    %1 = arith.extui %0 : i1 to i32
    %c0_i32_0 = arith.constant 0 : i32
    %2 = arith.cmpi ne, %1, %c0_i32_0 : i32
    scf.if %2 {
      %c0_86 = arith.constant 0 : index
      %c0_87 = arith.constant 0 : index
      %c0_88 = arith.constant 0 : index
      %174 = vector.load %arg2[%c0_86, %c0_87, %c0_88] : memref<1x16x128xf32, #tpu.memory_space<vmem>>, vector<1x16x128xf32>
      %175 = vector.shape_cast %174 : vector<1x16x128xf32> to vector<16x128xf32>
      %c0_89 = arith.constant 0 : index
      %c0_90 = arith.constant 0 : index
      %c0_91 = arith.constant 0 : index
      %176 = vector.load %arg3[%c0_89, %c0_90, %c0_91] : memref<1x16x128xf32, #tpu.memory_space<vmem>>, vector<1x16x128xf32>
      %177 = vector.shape_cast %176 : vector<1x16x128xf32> to vector<16x128xf32>
      %178 = arith.addf %175, %177 : vector<16x128xf32>
      %179 = arith.truncf %178 : vector<16x128xf32> to vector<16x128xbf16>
      %c0_92 = arith.constant 0 : index
      %c0_93 = arith.constant 0 : index
      %180 = vector.load %arg6[%c0_92, %c0_93] : memref<128x128xbf16, #tpu.memory_space<vmem>>, vector<128x128xbf16>
      %cst_94 = arith.constant dense<0.000000e+00> : vector<16x128xf32>
      %181 = tpu.matmul %179, %180, %cst_94 {dimension_numbers = #tpu.dot_dimension_numbers<[1], [0], [0], [1], [0, 0, 1, 1], [], []>} : vector<16x128xbf16>, vector<128x128xbf16>, vector<16x128xf32> -> vector<16x128xf32>
      %c0_95 = arith.constant 0 : index
      %c0_96 = arith.constant 0 : index
      %182 = vector.load %arg7[%c0_95, %c0_96] : memref<1x128xf32, #tpu.memory_space<vmem>>, vector<1x128xf32>
      %183 = vector.broadcast %182 : vector<1x128xf32> to vector<16x128xf32>
      %184 = arith.addf %181, %183 : vector<16x128xf32>
      %185 = arith.truncf %184 : vector<16x128xf32> to vector<16x128xbf16>
      %c0_97 = arith.constant 0 : index
      %c0_98 = arith.constant 0 : index
      %186 = vector.load %arg21[%c0_97, %c0_98] : memref<16x128xbf16, #tpu.memory_space<vmem>>, vector<16x128xbf16>
      tpu.vector_store %arg21[%c0_97, %c0_98], %185 {strides = array<i32>} : memref<16x128xbf16, #tpu.memory_space<vmem>>, vector<16x128xbf16>,
      %187 = arith.truncf %175 : vector<16x128xf32> to vector<16x128xbf16>
      %c0_99 = arith.constant 0 : index
      %c0_100 = arith.constant 0 : index
      %188 = vector.load %arg8[%c0_99, %c0_100] : memref<128x128xbf16, #tpu.memory_space<vmem>>, vector<128x128xbf16>
      %cst_101 = arith.constant dense<0.000000e+00> : vector<16x128xf32>
      %189 = tpu.matmul %187, %188, %cst_101 {dimension_numbers = #tpu.dot_dimension_numbers<[1], [0], [0], [1], [0, 0, 1, 1], [], []>} : vector<16x128xbf16>, vector<128x128xbf16>, vector<16x128xf32> -> vector<16x128xf32>
      %c0_102 = arith.constant 0 : index
      %c0_103 = arith.constant 0 : index
      %190 = vector.load %arg9[%c0_102, %c0_103] : memref<1x128xf32, #tpu.memory_space<vmem>>, vector<1x128xf32>
      %191 = vector.broadcast %190 : vector<1x128xf32> to vector<16x128xf32>
      %192 = arith.addf %189, %191 : vector<16x128xf32>
      %193 = arith.truncf %192 : vector<16x128xf32> to vector<16x128xbf16>
      %c0_104 = arith.constant 0 : index
      %c0_105 = arith.constant 0 : index
      %194 = vector.load %arg22[%c0_104, %c0_105] : memref<16x128xbf16, #tpu.memory_space<vmem>>, vector<16x128xbf16>
      tpu.vector_store %arg22[%c0_104, %c0_105], %193 {strides = array<i32>} : memref<16x128xbf16, #tpu.memory_space<vmem>>, vector<16x128xbf16>,
    } else {
    }
    %c16_i32 = arith.constant 16 : i32
    %3 = arith.muli %arg1, %c16_i32 : i32
    %4 = tpu.assume_multiple %3, 16 : i32
    %c0 = arith.constant 0 : index
    %5 = arith.index_cast %4 : i32 to index
    %c0_1 = arith.constant 0 : index
    %6 = vector.load %arg2[%c0, %5, %c0_1] : memref<1x16x128xf32, #tpu.memory_space<vmem>>, vector<1x16x128xf32>
    %7 = vector.shape_cast %6 : vector<1x16x128xf32> to vector<16x128xf32>
    %c0_2 = arith.constant 0 : index
    %8 = arith.index_cast %4 : i32 to index
    %c0_3 = arith.constant 0 : index
    %9 = vector.load %arg3[%c0_2, %8, %c0_3] : memref<1x16x128xf32, #tpu.memory_space<vmem>>, vector<1x16x128xf32>
    %10 = vector.shape_cast %9 : vector<1x16x128xf32> to vector<16x128xf32>
    %11 = arith.addf %7, %10 : vector<16x128xf32>
    %12 = arith.truncf %11 : vector<16x128xf32> to vector<16x128xbf16>
    %c0_4 = arith.constant 0 : index
    %c0_5 = arith.constant 0 : index
    %13 = vector.load %arg4[%c0_4, %c0_5] : memref<128x128xbf16, #tpu.memory_space<vmem>>, vector<128x128xbf16>
    %cst = arith.constant dense<0.000000e+00> : vector<16x128xf32>
    %14 = tpu.matmul %12, %13, %cst {dimension_numbers = #tpu.dot_dimension_numbers<[1], [0], [0], [1], [0, 0, 1, 1], [], []>} : vector<16x128xbf16>, vector<128x128xbf16>, vector<16x128xf32> -> vector<16x128xf32>
    %c0_6 = arith.constant 0 : index
    %c0_7 = arith.constant 0 : index
    %15 = vector.load %arg5[%c0_6, %c0_7] : memref<1x128xf32, #tpu.memory_space<vmem>>, vector<1x128xf32>
    %16 = vector.broadcast %15 : vector<1x128xf32> to vector<16x128xf32>
    %17 = arith.addf %14, %16 : vector<16x128xf32>
    %cst_8 = arith.constant 0.176776692 : f32
    %18 = vector.broadcast %cst_8 : f32 to vector<16x128xf32>
    %19 = arith.mulf %17, %18 : vector<16x128xf32>
    %20 = arith.truncf %19 : vector<16x128xf32> to vector<16x128xbf16>
    %21 = vector.extract_strided_slice %20 {offsets = [0, 0], sizes = [16, 32], strides = [1, 1]} : vector<16x128xbf16> to vector<16x32xbf16>
    %c0_9 = arith.constant 0 : index
    %c0_10 = arith.constant 0 : index
    %22 = vector.load %arg21[%c0_9, %c0_10] : memref<16x128xbf16, #tpu.memory_space<vmem>>, vector<16x32xbf16>
    %cst_11 = arith.constant dense<0.000000e+00> : vector<16x16xf32>
    %23 = tpu.matmul %21, %22, %cst_11 {dimension_numbers = #tpu.dot_dimension_numbers<[1], [1], [0], [0], [0, 0, 1, 0], [], []>} : vector<16x32xbf16>, vector<16x32xbf16>, vector<16x16xf32> -> vector<16x16xf32>
    %cst_12 = arith.constant dense<0xFF800000> : vector<16xf32>
    %24 = vector.multi_reduction <maximumf>, %23, %cst_12 [1] : vector<16x16xf32> to vector<16xf32>
    %25 = vector.shape_cast %24 : vector<16xf32> to vector<16x1xf32>
    %26 = vector.broadcast %25 : vector<16x1xf32> to vector<16x16xf32>
    %27 = arith.subf %23, %26 : vector<16x16xf32>
    %28 = math.exp %27 : vector<16x16xf32>
    %cst_13 = arith.constant dense<0.000000e+00> : vector<16xf32>
    %29 = vector.multi_reduction <add>, %28, %cst_13 [1] : vector<16x16xf32> to vector<16xf32>
    %30 = vector.shape_cast %29 : vector<16xf32> to vector<16x1xf32>
    %31 = tpu.reciprocal %30 {approx = true} : vector<16x1xf32> -> vector<16x1xf32>
    %32 = vector.broadcast %31 : vector<16x1xf32> to vector<16x16xf32>
    %33 = arith.mulf %28, %32 : vector<16x16xf32>
    %34 = arith.truncf %33 : vector<16x16xf32> to vector<16x16xbf16>
    %c0_14 = arith.constant 0 : index
    %c0_15 = arith.constant 0 : index
    %35 = vector.load %arg22[%c0_14, %c0_15] : memref<16x128xbf16, #tpu.memory_space<vmem>>, vector<16x32xbf16>
    %cst_16 = arith.constant dense<0.000000e+00> : vector<16x32xf32>
    %36 = tpu.matmul %34, %35, %cst_16 {dimension_numbers = #tpu.dot_dimension_numbers<[1], [0], [0], [1], [0, 0, 1, 1], [], []>} : vector<16x16xbf16>, vector<16x32xbf16>, vector<16x32xf32> -> vector<16x32xf32>
    %37 = arith.truncf %36 : vector<16x32xf32> to vector<16x32xbf16>
    %c0_17 = arith.constant 0 : index
    %c0_18 = arith.constant 0 : index
    %38 = vector.load %arg10[%c0_17, %c0_18] : memref<128x128xbf16, #tpu.memory_space<vmem>>, vector<32x128xbf16>
    %cst_19 = arith.constant dense<0.000000e+00> : vector<16x128xf32>
    %39 = tpu.matmul %37, %38, %cst_19 {dimension_numbers = #tpu.dot_dimension_numbers<[1], [0], [0], [1], [0, 0, 1, 1], [], []>} : vector<16x32xbf16>, vector<32x128xbf16>, vector<16x128xf32> -> vector<16x128xf32>
    %40 = vector.extract_strided_slice %20 {offsets = [0, 32], sizes = [16, 32], strides = [1, 1]} : vector<16x128xbf16> to vector<16x32xbf16>
    %c0_20 = arith.constant 0 : index
    %c32 = arith.constant 32 : index
    %41 = vector.load %arg21[%c0_20, %c32] : memref<16x128xbf16, #tpu.memory_space<vmem>>, vector<16x32xbf16>
    %cst_21 = arith.constant dense<0.000000e+00> : vector<16x16xf32>
    %42 = tpu.matmul %40, %41, %cst_21 {dimension_numbers = #tpu.dot_dimension_numbers<[1], [1], [0], [0], [0, 0, 1, 0], [], []>} : vector<16x32xbf16>, vector<16x32xbf16>, vector<16x16xf32> -> vector<16x16xf32>
    %cst_22 = arith.constant dense<0xFF800000> : vector<16xf32>
    %43 = vector.multi_reduction <maximumf>, %42, %cst_22 [1] : vector<16x16xf32> to vector<16xf32>
    %44 = vector.shape_cast %43 : vector<16xf32> to vector<16x1xf32>
    %45 = vector.broadcast %44 : vector<16x1xf32> to vector<16x16xf32>
    %46 = arith.subf %42, %45 : vector<16x16xf32>
    %47 = math.exp %46 : vector<16x16xf32>
    %cst_23 = arith.constant dense<0.000000e+00> : vector<16xf32>
    %48 = vector.multi_reduction <add>, %47, %cst_23 [1] : vector<16x16xf32> to vector<16xf32>
    %49 = vector.shape_cast %48 : vector<16xf32> to vector<16x1xf32>
    %50 = tpu.reciprocal %49 {approx = true} : vector<16x1xf32> -> vector<16x1xf32>
    %51 = vector.broadcast %50 : vector<16x1xf32> to vector<16x16xf32>
    %52 = arith.mulf %47, %51 : vector<16x16xf32>
    %53 = arith.truncf %52 : vector<16x16xf32> to vector<16x16xbf16>
    %c0_24 = arith.constant 0 : index
    %c32_25 = arith.constant 32 : index
    %54 = vector.load %arg22[%c0_24, %c32_25] : memref<16x128xbf16, #tpu.memory_space<vmem>>, vector<16x32xbf16>
    %cst_26 = arith.constant dense<0.000000e+00> : vector<16x32xf32>
    %55 = tpu.matmul %53, %54, %cst_26 {dimension_numbers = #tpu.dot_dimension_numbers<[1], [0], [0], [1], [0, 0, 1, 1], [], []>} : vector<16x16xbf16>, vector<16x32xbf16>, vector<16x32xf32> -> vector<16x32xf32>
    %56 = arith.truncf %55 : vector<16x32xf32> to vector<16x32xbf16>
    %c32_27 = arith.constant 32 : index
    %c0_28 = arith.constant 0 : index
    %57 = vector.load %arg10[%c32_27, %c0_28] : memref<128x128xbf16, #tpu.memory_space<vmem>>, vector<32x128xbf16>
    %cst_29 = arith.constant dense<0.000000e+00> : vector<16x128xf32>
    %58 = tpu.matmul %56, %57, %cst_29 {dimension_numbers = #tpu.dot_dimension_numbers<[1], [0], [0], [1], [0, 0, 1, 1], [], []>} : vector<16x32xbf16>, vector<32x128xbf16>, vector<16x128xf32> -> vector<16x128xf32>
    %59 = arith.addf %39, %58 : vector<16x128xf32>
    %60 = vector.extract_strided_slice %20 {offsets = [0, 64], sizes = [16, 32], strides = [1, 1]} : vector<16x128xbf16> to vector<16x32xbf16>
    %c0_30 = arith.constant 0 : index
    %c64 = arith.constant 64 : index
    %61 = vector.load %arg21[%c0_30, %c64] : memref<16x128xbf16, #tpu.memory_space<vmem>>, vector<16x32xbf16>
    %cst_31 = arith.constant dense<0.000000e+00> : vector<16x16xf32>
    %62 = tpu.matmul %60, %61, %cst_31 {dimension_numbers = #tpu.dot_dimension_numbers<[1], [1], [0], [0], [0, 0, 1, 0], [], []>} : vector<16x32xbf16>, vector<16x32xbf16>, vector<16x16xf32> -> vector<16x16xf32>
    %cst_32 = arith.constant dense<0xFF800000> : vector<16xf32>
    %63 = vector.multi_reduction <maximumf>, %62, %cst_32 [1] : vector<16x16xf32> to vector<16xf32>
    %64 = vector.shape_cast %63 : vector<16xf32> to vector<16x1xf32>
    %65 = vector.broadcast %64 : vector<16x1xf32> to vector<16x16xf32>
    %66 = arith.subf %62, %65 : vector<16x16xf32>
    %67 = math.exp %66 : vector<16x16xf32>
    %cst_33 = arith.constant dense<0.000000e+00> : vector<16xf32>
    %68 = vector.multi_reduction <add>, %67, %cst_33 [1] : vector<16x16xf32> to vector<16xf32>
    %69 = vector.shape_cast %68 : vector<16xf32> to vector<16x1xf32>
    %70 = tpu.reciprocal %69 {approx = true} : vector<16x1xf32> -> vector<16x1xf32>
    %71 = vector.broadcast %70 : vector<16x1xf32> to vector<16x16xf32>
    %72 = arith.mulf %67, %71 : vector<16x16xf32>
    %73 = arith.truncf %72 : vector<16x16xf32> to vector<16x16xbf16>
    %c0_34 = arith.constant 0 : index
    %c64_35 = arith.constant 64 : index
    %74 = vector.load %arg22[%c0_34, %c64_35] : memref<16x128xbf16, #tpu.memory_space<vmem>>, vector<16x32xbf16>
    %cst_36 = arith.constant dense<0.000000e+00> : vector<16x32xf32>
    %75 = tpu.matmul %73, %74, %cst_36 {dimension_numbers = #tpu.dot_dimension_numbers<[1], [0], [0], [1], [0, 0, 1, 1], [], []>} : vector<16x16xbf16>, vector<16x32xbf16>, vector<16x32xf32> -> vector<16x32xf32>
    %76 = arith.truncf %75 : vector<16x32xf32> to vector<16x32xbf16>
    %c64_37 = arith.constant 64 : index
    %c0_38 = arith.constant 0 : index
    %77 = vector.load %arg10[%c64_37, %c0_38] : memref<128x128xbf16, #tpu.memory_space<vmem>>, vector<32x128xbf16>
    %cst_39 = arith.constant dense<0.000000e+00> : vector<16x128xf32>
    %78 = tpu.matmul %76, %77, %cst_39 {dimension_numbers = #tpu.dot_dimension_numbers<[1], [0], [0], [1], [0, 0, 1, 1], [], []>} : vector<16x32xbf16>, vector<32x128xbf16>, vector<16x128xf32> -> vector<16x128xf32>
    %79 = arith.addf %59, %78 : vector<16x128xf32>
    %80 = vector.extract_strided_slice %20 {offsets = [0, 96], sizes = [16, 32], strides = [1, 1]} : vector<16x128xbf16> to vector<16x32xbf16>
    %c0_40 = arith.constant 0 : index
    %c96 = arith.constant 96 : index
    %81 = vector.load %arg21[%c0_40, %c96] : memref<16x128xbf16, #tpu.memory_space<vmem>>, vector<16x32xbf16>
    %cst_41 = arith.constant dense<0.000000e+00> : vector<16x16xf32>
    %82 = tpu.matmul %80, %81, %cst_41 {dimension_numbers = #tpu.dot_dimension_numbers<[1], [1], [0], [0], [0, 0, 1, 0], [], []>} : vector<16x32xbf16>, vector<16x32xbf16>, vector<16x16xf32> -> vector<16x16xf32>
    %cst_42 = arith.constant dense<0xFF800000> : vector<16xf32>
    %83 = vector.multi_reduction <maximumf>, %82, %cst_42 [1] : vector<16x16xf32> to vector<16xf32>
    %84 = vector.shape_cast %83 : vector<16xf32> to vector<16x1xf32>
    %85 = vector.broadcast %84 : vector<16x1xf32> to vector<16x16xf32>
    %86 = arith.subf %82, %85 : vector<16x16xf32>
    %87 = math.exp %86 : vector<16x16xf32>
    %cst_43 = arith.constant dense<0.000000e+00> : vector<16xf32>
    %88 = vector.multi_reduction <add>, %87, %cst_43 [1] : vector<16x16xf32> to vector<16xf32>
    %89 = vector.shape_cast %88 : vector<16xf32> to vector<16x1xf32>
    %90 = tpu.reciprocal %89 {approx = true} : vector<16x1xf32> -> vector<16x1xf32>
    %91 = vector.broadcast %90 : vector<16x1xf32> to vector<16x16xf32>
    %92 = arith.mulf %87, %91 : vector<16x16xf32>
    %93 = arith.truncf %92 : vector<16x16xf32> to vector<16x16xbf16>
    %c0_44 = arith.constant 0 : index
    %c96_45 = arith.constant 96 : index
    %94 = vector.load %arg22[%c0_44, %c96_45] : memref<16x128xbf16, #tpu.memory_space<vmem>>, vector<16x32xbf16>
    %cst_46 = arith.constant dense<0.000000e+00> : vector<16x32xf32>
    %95 = tpu.matmul %93, %94, %cst_46 {dimension_numbers = #tpu.dot_dimension_numbers<[1], [0], [0], [1], [0, 0, 1, 1], [], []>} : vector<16x16xbf16>, vector<16x32xbf16>, vector<16x32xf32> -> vector<16x32xf32>
    %96 = arith.truncf %95 : vector<16x32xf32> to vector<16x32xbf16>
    %c96_47 = arith.constant 96 : index
    %c0_48 = arith.constant 0 : index
    %97 = vector.load %arg10[%c96_47, %c0_48] : memref<128x128xbf16, #tpu.memory_space<vmem>>, vector<32x128xbf16>
    %cst_49 = arith.constant dense<0.000000e+00> : vector<16x128xf32>
    %98 = tpu.matmul %96, %97, %cst_49 {dimension_numbers = #tpu.dot_dimension_numbers<[1], [0], [0], [1], [0, 0, 1, 1], [], []>} : vector<16x32xbf16>, vector<32x128xbf16>, vector<16x128xf32> -> vector<16x128xf32>
    %99 = arith.addf %79, %98 : vector<16x128xf32>
    %c0_50 = arith.constant 0 : index
    %c0_51 = arith.constant 0 : index
    %100 = vector.load %arg11[%c0_50, %c0_51] : memref<1x128xf32, #tpu.memory_space<vmem>>, vector<1x128xf32>
    %101 = vector.broadcast %100 : vector<1x128xf32> to vector<16x128xf32>
    %102 = arith.addf %99, %101 : vector<16x128xf32>
    %103 = arith.addf %7, %102 : vector<16x128xf32>
    %cst_52 = arith.constant dense<0.000000e+00> : vector<16xf32>
    %104 = vector.multi_reduction <add>, %103, %cst_52 [1] : vector<16x128xf32> to vector<16xf32>
    %105 = vector.shape_cast %104 : vector<16xf32> to vector<16x1xf32>
    %cst_53 = arith.constant 1.280000e+02 : f32
    %106 = vector.broadcast %cst_53 : f32 to vector<16x1xf32>
    %107 = arith.divf %105, %106 : vector<16x1xf32>
    %108 = arith.mulf %103, %103 : vector<16x128xf32>
    %cst_54 = arith.constant dense<0.000000e+00> : vector<16xf32>
    %109 = vector.multi_reduction <add>, %108, %cst_54 [1] : vector<16x128xf32> to vector<16xf32>
    %110 = vector.shape_cast %109 : vector<16xf32> to vector<16x1xf32>
    %cst_55 = arith.constant 1.280000e+02 : f32
    %111 = vector.broadcast %cst_55 : f32 to vector<16x1xf32>
    %112 = arith.divf %110, %111 : vector<16x1xf32>
    %113 = arith.mulf %107, %107 : vector<16x1xf32>
    %114 = arith.subf %112, %113 : vector<16x1xf32>
    %cst_56 = arith.constant 0.000000e+00 : f32
    %115 = vector.broadcast %cst_56 : f32 to vector<16x1xf32>
    %116 = arith.maximumf %114, %115 : vector<16x1xf32>
    %117 = vector.broadcast %107 : vector<16x1xf32> to vector<16x128xf32>
    %118 = arith.subf %103, %117 : vector<16x128xf32>
    %cst_57 = arith.constant 9.99999974E-6 : f32
    %119 = vector.broadcast %cst_57 : f32 to vector<16x1xf32>
    %120 = arith.addf %116, %119 : vector<16x1xf32>
    %121 = math.rsqrt %120 : vector<16x1xf32>
    %122 = vector.broadcast %121 : vector<16x1xf32> to vector<16x128xf32>
    %123 = arith.mulf %118, %122 : vector<16x128xf32>
    %c0_58 = arith.constant 0 : index
    %c0_59 = arith.constant 0 : index
    %124 = vector.load %arg16[%c0_58, %c0_59] : memref<1x128xf32, #tpu.memory_space<vmem>>, vector<1x128xf32>
    %125 = vector.broadcast %124 : vector<1x128xf32> to vector<16x128xf32>
    %126 = arith.mulf %123, %125 : vector<16x128xf32>
    %c0_60 = arith.constant 0 : index
    %c0_61 = arith.constant 0 : index
    %127 = vector.load %arg17[%c0_60, %c0_61] : memref<1x128xf32, #tpu.memory_space<vmem>>, vector<1x128xf32>
    %128 = vector.broadcast %127 : vector<1x128xf32> to vector<16x128xf32>
    %129 = arith.addf %126, %128 : vector<16x128xf32>
    %130 = arith.truncf %129 : vector<16x128xf32> to vector<16x128xbf16>
    %c0_62 = arith.constant 0 : index
    %c0_63 = arith.constant 0 : index
    %131 = vector.load %arg12[%c0_62, %c0_63] : memref<128x256xbf16, #tpu.memory_space<vmem>>, vector<128x256xbf16>
    %cst_64 = arith.constant dense<0.000000e+00> : vector<16x256xf32>
    %132 = tpu.matmul %130, %131, %cst_64 {dimension_numbers = #tpu.dot_dimension_numbers<[1], [0], [0], [1], [0, 0, 1, 1], [], []>} : vector<16x128xbf16>, vector<128x256xbf16>, vector<16x256xf32> -> vector<16x256xf32>
    %c0_65 = arith.constant 0 : index
    %c0_66 = arith.constant 0 : index
    %133 = vector.load %arg13[%c0_65, %c0_66] : memref<1x256xf32, #tpu.memory_space<vmem>>, vector<1x256xf32>
    %134 = vector.broadcast %133 : vector<1x256xf32> to vector<16x256xf32>
    %135 = arith.addf %132, %134 : vector<16x256xf32>
    %cst_67 = arith.constant 0.000000e+00 : f32
    %136 = vector.broadcast %cst_67 : f32 to vector<16x256xf32>
    %137 = arith.maximumf %135, %136 : vector<16x256xf32>
    %138 = arith.truncf %137 : vector<16x256xf32> to vector<16x256xbf16>
    %c0_68 = arith.constant 0 : index
    %c0_69 = arith.constant 0 : index
    %139 = vector.load %arg14[%c0_68, %c0_69] : memref<256x128xbf16, #tpu.memory_space<vmem>>, vector<256x128xbf16>
    %cst_70 = arith.constant dense<0.000000e+00> : vector<16x128xf32>
    %140 = tpu.matmul %138, %139, %cst_70 {dimension_numbers = #tpu.dot_dimension_numbers<[1], [0], [0], [1], [0, 0, 1, 1], [], []>} : vector<16x256xbf16>, vector<256x128xbf16>, vector<16x128xf32> -> vector<16x128xf32>
    %c0_71 = arith.constant 0 : index
    %c0_72 = arith.constant 0 : index
    %141 = vector.load %arg15[%c0_71, %c0_72] : memref<1x128xf32, #tpu.memory_space<vmem>>, vector<1x128xf32>
    %142 = vector.broadcast %141 : vector<1x128xf32> to vector<16x128xf32>
    %143 = arith.addf %140, %142 : vector<16x128xf32>
    %144 = arith.addf %129, %143 : vector<16x128xf32>
    %cst_73 = arith.constant dense<0.000000e+00> : vector<16xf32>
    %145 = vector.multi_reduction <add>, %144, %cst_73 [1] : vector<16x128xf32> to vector<16xf32>
    %146 = vector.shape_cast %145 : vector<16xf32> to vector<16x1xf32>
    %cst_74 = arith.constant 1.280000e+02 : f32
    %147 = vector.broadcast %cst_74 : f32 to vector<16x1xf32>
    %148 = arith.divf %146, %147 : vector<16x1xf32>
    %149 = arith.mulf %144, %144 : vector<16x128xf32>
    %cst_75 = arith.constant dense<0.000000e+00> : vector<16xf32>
    %150 = vector.multi_reduction <add>, %149, %cst_75 [1] : vector<16x128xf32> to vector<16xf32>
    %151 = vector.shape_cast %150 : vector<16xf32> to vector<16x1xf32>
    %cst_76 = arith.constant 1.280000e+02 : f32
    %152 = vector.broadcast %cst_76 : f32 to vector<16x1xf32>
    %153 = arith.divf %151, %152 : vector<16x1xf32>
    %154 = arith.mulf %148, %148 : vector<16x1xf32>
    %155 = arith.subf %153, %154 : vector<16x1xf32>
    %cst_77 = arith.constant 0.000000e+00 : f32
    %156 = vector.broadcast %cst_77 : f32 to vector<16x1xf32>
    %157 = arith.maximumf %155, %156 : vector<16x1xf32>
    %158 = vector.broadcast %148 : vector<16x1xf32> to vector<16x128xf32>
    %159 = arith.subf %144, %158 : vector<16x128xf32>
    %cst_78 = arith.constant 9.99999974E-6 : f32
    %160 = vector.broadcast %cst_78 : f32 to vector<16x1xf32>
    %161 = arith.addf %157, %160 : vector<16x1xf32>
    %162 = math.rsqrt %161 : vector<16x1xf32>
    %163 = vector.broadcast %162 : vector<16x1xf32> to vector<16x128xf32>
    %164 = arith.mulf %159, %163 : vector<16x128xf32>
    %c0_79 = arith.constant 0 : index
    %c0_80 = arith.constant 0 : index
    %165 = vector.load %arg18[%c0_79, %c0_80] : memref<1x128xf32, #tpu.memory_space<vmem>>, vector<1x128xf32>
    %166 = vector.broadcast %165 : vector<1x128xf32> to vector<16x128xf32>
    %167 = arith.mulf %164, %166 : vector<16x128xf32>
    %c0_81 = arith.constant 0 : index
    %c0_82 = arith.constant 0 : index
    %168 = vector.load %arg19[%c0_81, %c0_82] : memref<1x128xf32, #tpu.memory_space<vmem>>, vector<1x128xf32>
    %169 = vector.broadcast %168 : vector<1x128xf32> to vector<16x128xf32>
    %170 = arith.addf %167, %169 : vector<16x128xf32>
    %c0_83 = arith.constant 0 : index
    %c0_84 = arith.constant 0 : index
    %c0_85 = arith.constant 0 : index
    %171 = vector.load %arg20[%c0_83, %c0_84, %c0_85] : memref<1x16x128xf32, #tpu.memory_space<vmem>>, vector<1x16x128xf32>
    %172 = vector.shape_cast %171 : vector<1x16x128xf32> to vector<16x128xf32>
    %173 = vector.shape_cast %170 : vector<16x128xf32> to vector<1x16x128xf32>
    tpu.vector_store %arg20[%c0_83, %c0_84, %c0_85], %173 {strides = array<i32>} : memref<1x16x128xf32, #tpu.memory_space<vmem>>, vector<1x16x128xf32>,
    return
  }
  func.func @transform_0(%arg0: i32, %arg1: i32) -> (i32, i32, i32) {
    %c0_i32 = arith.constant 0 : i32
    %c0_i32_0 = arith.constant 0 : i32
    %c0_i32_1 = arith.constant 0 : i32
    return %arg0, %c0_i32, %c0_i32_0 : i32, i32, i32
  }
  func.func @transform_1(%arg0: i32, %arg1: i32) -> (i32, i32, i32) {
    %c0_i32 = arith.constant 0 : i32
    %c0_i32_0 = arith.constant 0 : i32
    %c0_i32_1 = arith.constant 0 : i32
    return %arg0, %c0_i32, %c0_i32_0 : i32, i32, i32
  }
  func.func @transform_2(%arg0: i32, %arg1: i32) -> (i32, i32) {
    %c0_i32 = arith.constant 0 : i32
    %c0_i32_0 = arith.constant 0 : i32
    %c0_i32_1 = arith.constant 0 : i32
    return %c0_i32, %c0_i32_0 : i32, i32
  }
  func.func @transform_3(%arg0: i32, %arg1: i32) -> (i32, i32) {
    %c0_i32 = arith.constant 0 : i32
    %c0_i32_0 = arith.constant 0 : i32
    %c0_i32_1 = arith.constant 0 : i32
    return %c0_i32, %c0_i32_0 : i32, i32
  }
  func.func @transform_4(%arg0: i32, %arg1: i32) -> (i32, i32) {
    %c0_i32 = arith.constant 0 : i32
    %c0_i32_0 = arith.constant 0 : i32
    %c0_i32_1 = arith.constant 0 : i32
    return %c0_i32, %c0_i32_0 : i32, i32
  }
  func.func @transform_5(%arg0: i32, %arg1: i32) -> (i32, i32) {
    %c0_i32 = arith.constant 0 : i32
    %c0_i32_0 = arith.constant 0 : i32
    %c0_i32_1 = arith.constant 0 : i32
    return %c0_i32, %c0_i32_0 : i32, i32
  }
  func.func @transform_6(%arg0: i32, %arg1: i32) -> (i32, i32) {
    %c0_i32 = arith.constant 0 : i32
    %c0_i32_0 = arith.constant 0 : i32
    %c0_i32_1 = arith.constant 0 : i32
    return %c0_i32, %c0_i32_0 : i32, i32
  }
  func.func @transform_7(%arg0: i32, %arg1: i32) -> (i32, i32) {
    %c0_i32 = arith.constant 0 : i32
    %c0_i32_0 = arith.constant 0 : i32
    %c0_i32_1 = arith.constant 0 : i32
    return %c0_i32, %c0_i32_0 : i32, i32
  }
  func.func @transform_8(%arg0: i32, %arg1: i32) -> (i32, i32) {
    %c0_i32 = arith.constant 0 : i32
    %c0_i32_0 = arith.constant 0 : i32
    %c0_i32_1 = arith.constant 0 : i32
    return %c0_i32, %c0_i32_0 : i32, i32
  }
  func.func @transform_9(%arg0: i32, %arg1: i32) -> (i32, i32) {
    %c0_i32 = arith.constant 0 : i32
    %c0_i32_0 = arith.constant 0 : i32
    %c0_i32_1 = arith.constant 0 : i32
    return %c0_i32, %c0_i32_0 : i32, i32
  }
  func.func @transform_10(%arg0: i32, %arg1: i32) -> (i32, i32) {
    %c0_i32 = arith.constant 0 : i32
    %c0_i32_0 = arith.constant 0 : i32
    %c0_i32_1 = arith.constant 0 : i32
    return %c0_i32, %c0_i32_0 : i32, i32
  }
  func.func @transform_11(%arg0: i32, %arg1: i32) -> (i32, i32) {
    %c0_i32 = arith.constant 0 : i32
    %c0_i32_0 = arith.constant 0 : i32
    %c0_i32_1 = arith.constant 0 : i32
    return %c0_i32, %c0_i32_0 : i32, i32
  }
  func.func @transform_12(%arg0: i32, %arg1: i32) -> (i32, i32) {
    %c0_i32 = arith.constant 0 : i32
    %c0_i32_0 = arith.constant 0 : i32
    %c0_i32_1 = arith.constant 0 : i32
    return %c0_i32, %c0_i32_0 : i32, i32
  }
  func.func @transform_13(%arg0: i32, %arg1: i32) -> (i32, i32) {
    %c0_i32 = arith.constant 0 : i32
    %c0_i32_0 = arith.constant 0 : i32
    %c0_i32_1 = arith.constant 0 : i32
    return %c0_i32, %c0_i32_0 : i32, i32
  }
  func.func @transform_14(%arg0: i32, %arg1: i32) -> (i32, i32) {
    %c0_i32 = arith.constant 0 : i32
    %c0_i32_0 = arith.constant 0 : i32
    %c0_i32_1 = arith.constant 0 : i32
    return %c0_i32, %c0_i32_0 : i32, i32
  }
  func.func @transform_15(%arg0: i32, %arg1: i32) -> (i32, i32) {
    %c0_i32 = arith.constant 0 : i32
    %c0_i32_0 = arith.constant 0 : i32
    %c0_i32_1 = arith.constant 0 : i32
    return %c0_i32, %c0_i32_0 : i32, i32
  }
  func.func @transform_16(%arg0: i32, %arg1: i32) -> (i32, i32) {
    %c0_i32 = arith.constant 0 : i32
    %c0_i32_0 = arith.constant 0 : i32
    %c0_i32_1 = arith.constant 0 : i32
    return %c0_i32, %c0_i32_0 : i32, i32
  }
  func.func @transform_17(%arg0: i32, %arg1: i32) -> (i32, i32) {
    %c0_i32 = arith.constant 0 : i32
    %c0_i32_0 = arith.constant 0 : i32
    %c0_i32_1 = arith.constant 0 : i32
    return %c0_i32, %c0_i32_0 : i32, i32
  }
  func.func @transform_18(%arg0: i32, %arg1: i32) -> (i32, i32, i32) {
    %c0_i32 = arith.constant 0 : i32
    %c0_i32_0 = arith.constant 0 : i32
    return %arg0, %arg1, %c0_i32 : i32, i32, i32
  }
}

module attributes {stable_mosaic.version = 11 : i64} {
  func.func @kernel(%arg0: i32, %arg1: i32, %arg2: memref<1x16x128xf32, #tpu.memory_space<vmem>>, %arg3: memref<1x16x128xf32, #tpu.memory_space<vmem>>, %arg4: memref<128x128xbf16, #tpu.memory_space<vmem>>, %arg5: memref<1x128xf32, #tpu.memory_space<vmem>>, %arg6: memref<128x128xbf16, #tpu.memory_space<vmem>>, %arg7: memref<1x128xf32, #tpu.memory_space<vmem>>, %arg8: memref<128x128xbf16, #tpu.memory_space<vmem>>, %arg9: memref<1x128xf32, #tpu.memory_space<vmem>>, %arg10: memref<128x128xbf16, #tpu.memory_space<vmem>>, %arg11: memref<1x128xf32, #tpu.memory_space<vmem>>, %arg12: memref<128x256xbf16, #tpu.memory_space<vmem>>, %arg13: memref<1x256xf32, #tpu.memory_space<vmem>>, %arg14: memref<256x128xbf16, #tpu.memory_space<vmem>>, %arg15: memref<1x128xf32, #tpu.memory_space<vmem>>, %arg16: memref<1x128xf32, #tpu.memory_space<vmem>>, %arg17: memref<1x128xf32, #tpu.memory_space<vmem>>, %arg18: memref<1x128xf32, #tpu.memory_space<vmem>>, %arg19: memref<1x128xf32, #tpu.memory_space<vmem>>, %arg20: memref<1x16x128xf32, #tpu.memory_space<vmem>>, %arg21: memref<16x128xbf16, #tpu.memory_space<vmem>>, %arg22: memref<16x128xbf16, #tpu.memory_space<vmem>>) attributes {dimension_semantics = [#tpu.dimension_semantics<parallel>, #tpu.dimension_semantics<arbitrary>], iteration_bounds = array<i64: 2, 1>, scalar_prefetch = 0 : i64, scratch_operands = 2 : i64, tpu.core_type = #tpu.core_type<tc>, window_params = [{transform_indices = @transform_0, window_bounds = array<i64: 1, 16, 128>}, {transform_indices = @transform_1, window_bounds = array<i64: 1, 16, 128>}, {pipeline_mode = #tpu.pipeline_mode<synchronous>, transform_indices = @transform_2, window_bounds = array<i64: 128, 128>}, {pipeline_mode = #tpu.pipeline_mode<synchronous>, transform_indices = @transform_3, window_bounds = array<i64: 1, 128>}, {pipeline_mode = #tpu.pipeline_mode<synchronous>, transform_indices = @transform_4, window_bounds = array<i64: 128, 128>}, {pipeline_mode = #tpu.pipeline_mode<synchronous>, transform_indices = @transform_5, window_bounds = array<i64: 1, 128>}, {pipeline_mode = #tpu.pipeline_mode<synchronous>, transform_indices = @transform_6, window_bounds = array<i64: 128, 128>}, {pipeline_mode = #tpu.pipeline_mode<synchronous>, transform_indices = @transform_7, window_bounds = array<i64: 1, 128>}, {pipeline_mode = #tpu.pipeline_mode<synchronous>, transform_indices = @transform_8, window_bounds = array<i64: 128, 128>}, {pipeline_mode = #tpu.pipeline_mode<synchronous>, transform_indices = @transform_9, window_bounds = array<i64: 1, 128>}, {pipeline_mode = #tpu.pipeline_mode<synchronous>, transform_indices = @transform_10, window_bounds = array<i64: 128, 256>}, {pipeline_mode = #tpu.pipeline_mode<synchronous>, transform_indices = @transform_11, window_bounds = array<i64: 1, 256>}, {pipeline_mode = #tpu.pipeline_mode<synchronous>, transform_indices = @transform_12, window_bounds = array<i64: 256, 128>}, {pipeline_mode = #tpu.pipeline_mode<synchronous>, transform_indices = @transform_13, window_bounds = array<i64: 1, 128>}, {pipeline_mode = #tpu.pipeline_mode<synchronous>, transform_indices = @transform_14, window_bounds = array<i64: 1, 128>}, {pipeline_mode = #tpu.pipeline_mode<synchronous>, transform_indices = @transform_15, window_bounds = array<i64: 1, 128>}, {pipeline_mode = #tpu.pipeline_mode<synchronous>, transform_indices = @transform_16, window_bounds = array<i64: 1, 128>}, {pipeline_mode = #tpu.pipeline_mode<synchronous>, transform_indices = @transform_17, window_bounds = array<i64: 1, 128>}, {transform_indices = @transform_18, window_bounds = array<i64: 1, 16, 128>}]} {
    %c0_i32 = arith.constant 0 : i32
    %0 = arith.cmpi eq, %arg1, %c0_i32 : i32
    %1 = arith.extui %0 : i1 to i32
    %c0_i32_0 = arith.constant 0 : i32
    %2 = arith.cmpi ne, %1, %c0_i32_0 : i32
    scf.if %2 {
      %c0_86 = arith.constant 0 : index
      %c0_87 = arith.constant 0 : index
      %c0_88 = arith.constant 0 : index
      %174 = vector.load %arg2[%c0_86, %c0_87, %c0_88] : memref<1x16x128xf32, #tpu.memory_space<vmem>>, vector<1x16x128xf32>
      %175 = vector.shape_cast %174 : vector<1x16x128xf32> to vector<16x128xf32>
      %c0_89 = arith.constant 0 : index
      %c0_90 = arith.constant 0 : index
      %c0_91 = arith.constant 0 : index
      %176 = vector.load %arg3[%c0_89, %c0_90, %c0_91] : memref<1x16x128xf32, #tpu.memory_space<vmem>>, vector<1x16x128xf32>
      %177 = vector.shape_cast %176 : vector<1x16x128xf32> to vector<16x128xf32>
      %178 = arith.addf %175, %177 : vector<16x128xf32>
      %179 = arith.truncf %178 : vector<16x128xf32> to vector<16x128xbf16>
      %c0_92 = arith.constant 0 : index
      %c0_93 = arith.constant 0 : index
      %180 = vector.load %arg6[%c0_92, %c0_93] : memref<128x128xbf16, #tpu.memory_space<vmem>>, vector<128x128xbf16>
      %cst_94 = arith.constant dense<0.000000e+00> : vector<16x128xf32>
      %181 = tpu.matmul %179, %180, %cst_94 {dimension_numbers = #tpu.dot_dimension_numbers<[1], [0], [0], [1], [0, 0, 1, 1], [], []>} : vector<16x128xbf16>, vector<128x128xbf16>, vector<16x128xf32> -> vector<16x128xf32>
      %c0_95 = arith.constant 0 : index
      %c0_96 = arith.constant 0 : index
      %182 = vector.load %arg7[%c0_95, %c0_96] : memref<1x128xf32, #tpu.memory_space<vmem>>, vector<1x128xf32>
      %183 = vector.broadcast %182 : vector<1x128xf32> to vector<16x128xf32>
      %184 = arith.addf %181, %183 : vector<16x128xf32>
      %185 = arith.truncf %184 : vector<16x128xf32> to vector<16x128xbf16>
      %c0_97 = arith.constant 0 : index
      %c0_98 = arith.constant 0 : index
      %186 = vector.load %arg21[%c0_97, %c0_98] : memref<16x128xbf16, #tpu.memory_space<vmem>>, vector<16x128xbf16>
      tpu.vector_store %arg21[%c0_97, %c0_98], %185 {strides = array<i32>} : memref<16x128xbf16, #tpu.memory_space<vmem>>, vector<16x128xbf16>,
      %187 = arith.truncf %175 : vector<16x128xf32> to vector<16x128xbf16>
      %c0_99 = arith.constant 0 : index
      %c0_100 = arith.constant 0 : index
      %188 = vector.load %arg8[%c0_99, %c0_100] : memref<128x128xbf16, #tpu.memory_space<vmem>>, vector<128x128xbf16>
      %cst_101 = arith.constant dense<0.000000e+00> : vector<16x128xf32>
      %189 = tpu.matmul %187, %188, %cst_101 {dimension_numbers = #tpu.dot_dimension_numbers<[1], [0], [0], [1], [0, 0, 1, 1], [], []>} : vector<16x128xbf16>, vector<128x128xbf16>, vector<16x128xf32> -> vector<16x128xf32>
      %c0_102 = arith.constant 0 : index
      %c0_103 = arith.constant 0 : index
      %190 = vector.load %arg9[%c0_102, %c0_103] : memref<1x128xf32, #tpu.memory_space<vmem>>, vector<1x128xf32>
      %191 = vector.broadcast %190 : vector<1x128xf32> to vector<16x128xf32>
      %192 = arith.addf %189, %191 : vector<16x128xf32>
      %193 = arith.truncf %192 : vector<16x128xf32> to vector<16x128xbf16>
      %c0_104 = arith.constant 0 : index
      %c0_105 = arith.constant 0 : index
      %194 = vector.load %arg22[%c0_104, %c0_105] : memref<16x128xbf16, #tpu.memory_space<vmem>>, vector<16x128xbf16>
      tpu.vector_store %arg22[%c0_104, %c0_105], %193 {strides = array<i32>} : memref<16x128xbf16, #tpu.memory_space<vmem>>, vector<16x128xbf16>,
    } else {
    }
    %c16_i32 = arith.constant 16 : i32
    %3 = arith.muli %arg1, %c16_i32 : i32
    %4 = tpu.assume_multiple %3, 16 : i32
    %c0 = arith.constant 0 : index
    %5 = arith.index_cast %4 : i32 to index
    %c0_1 = arith.constant 0 : index
    %6 = vector.load %arg2[%c0, %5, %c0_1] : memref<1x16x128xf32, #tpu.memory_space<vmem>>, vector<1x16x128xf32>
    %7 = vector.shape_cast %6 : vector<1x16x128xf32> to vector<16x128xf32>
    %c0_2 = arith.constant 0 : index
    %8 = arith.index_cast %4 : i32 to index
    %c0_3 = arith.constant 0 : index
    %9 = vector.load %arg3[%c0_2, %8, %c0_3] : memref<1x16x128xf32, #tpu.memory_space<vmem>>, vector<1x16x128xf32>
    %10 = vector.shape_cast %9 : vector<1x16x128xf32> to vector<16x128xf32>
    %11 = arith.addf %7, %10 : vector<16x128xf32>
    %12 = arith.truncf %11 : vector<16x128xf32> to vector<16x128xbf16>
    %c0_4 = arith.constant 0 : index
    %c0_5 = arith.constant 0 : index
    %13 = vector.load %arg4[%c0_4, %c0_5] : memref<128x128xbf16, #tpu.memory_space<vmem>>, vector<128x128xbf16>
    %cst = arith.constant dense<0.000000e+00> : vector<16x128xf32>
    %14 = tpu.matmul %12, %13, %cst {dimension_numbers = #tpu.dot_dimension_numbers<[1], [0], [0], [1], [0, 0, 1, 1], [], []>} : vector<16x128xbf16>, vector<128x128xbf16>, vector<16x128xf32> -> vector<16x128xf32>
    %c0_6 = arith.constant 0 : index
    %c0_7 = arith.constant 0 : index
    %15 = vector.load %arg5[%c0_6, %c0_7] : memref<1x128xf32, #tpu.memory_space<vmem>>, vector<1x128xf32>
    %16 = vector.broadcast %15 : vector<1x128xf32> to vector<16x128xf32>
    %17 = arith.addf %14, %16 : vector<16x128xf32>
    %cst_8 = arith.constant 0.176776692 : f32
    %18 = vector.broadcast %cst_8 : f32 to vector<16x128xf32>
    %19 = arith.mulf %17, %18 : vector<16x128xf32>
    %20 = arith.truncf %19 : vector<16x128xf32> to vector<16x128xbf16>
    %21 = vector.extract_strided_slice %20 {offsets = [0, 0], sizes = [16, 32], strides = [1, 1]} : vector<16x128xbf16> to vector<16x32xbf16>
    %c0_9 = arith.constant 0 : index
    %c0_10 = arith.constant 0 : index
    %22 = vector.load %arg21[%c0_9, %c0_10] : memref<16x128xbf16, #tpu.memory_space<vmem>>, vector<16x32xbf16>
    %cst_11 = arith.constant dense<0.000000e+00> : vector<16x16xf32>
    %23 = tpu.matmul %21, %22, %cst_11 {dimension_numbers = #tpu.dot_dimension_numbers<[1], [1], [0], [0], [0, 0, 1, 0], [], []>} : vector<16x32xbf16>, vector<16x32xbf16>, vector<16x16xf32> -> vector<16x16xf32>
    %cst_12 = arith.constant dense<0xFF800000> : vector<16xf32>
    %24 = vector.multi_reduction <maximumf>, %23, %cst_12 [1] : vector<16x16xf32> to vector<16xf32>
    %25 = vector.shape_cast %24 : vector<16xf32> to vector<16x1xf32>
    %26 = vector.broadcast %25 : vector<16x1xf32> to vector<16x16xf32>
    %27 = arith.subf %23, %26 : vector<16x16xf32>
    %28 = math.exp %27 : vector<16x16xf32>
    %cst_13 = arith.constant dense<0.000000e+00> : vector<16xf32>
    %29 = vector.multi_reduction <add>, %28, %cst_13 [1] : vector<16x16xf32> to vector<16xf32>
    %30 = vector.shape_cast %29 : vector<16xf32> to vector<16x1xf32>
    %31 = tpu.reciprocal %30 {approx = true} : vector<16x1xf32> -> vector<16x1xf32>
    %32 = vector.broadcast %31 : vector<16x1xf32> to vector<16x16xf32>
    %33 = arith.mulf %28, %32 : vector<16x16xf32>
    %34 = arith.truncf %33 : vector<16x16xf32> to vector<16x16xbf16>
    %c0_14 = arith.constant 0 : index
    %c0_15 = arith.constant 0 : index
    %35 = vector.load %arg22[%c0_14, %c0_15] : memref<16x128xbf16, #tpu.memory_space<vmem>>, vector<16x32xbf16>
    %cst_16 = arith.constant dense<0.000000e+00> : vector<16x32xf32>
    %36 = tpu.matmul %34, %35, %cst_16 {dimension_numbers = #tpu.dot_dimension_numbers<[1], [0], [0], [1], [0, 0, 1, 1], [], []>} : vector<16x16xbf16>, vector<16x32xbf16>, vector<16x32xf32> -> vector<16x32xf32>
    %37 = arith.truncf %36 : vector<16x32xf32> to vector<16x32xbf16>
    %c0_17 = arith.constant 0 : index
    %c0_18 = arith.constant 0 : index
    %38 = vector.load %arg10[%c0_17, %c0_18] : memref<128x128xbf16, #tpu.memory_space<vmem>>, vector<32x128xbf16>
    %cst_19 = arith.constant dense<0.000000e+00> : vector<16x128xf32>
    %39 = tpu.matmul %37, %38, %cst_19 {dimension_numbers = #tpu.dot_dimension_numbers<[1], [0], [0], [1], [0, 0, 1, 1], [], []>} : vector<16x32xbf16>, vector<32x128xbf16>, vector<16x128xf32> -> vector<16x128xf32>
    %40 = vector.extract_strided_slice %20 {offsets = [0, 32], sizes = [16, 32], strides = [1, 1]} : vector<16x128xbf16> to vector<16x32xbf16>
    %c0_20 = arith.constant 0 : index
    %c32 = arith.constant 32 : index
    %41 = vector.load %arg21[%c0_20, %c32] : memref<16x128xbf16, #tpu.memory_space<vmem>>, vector<16x32xbf16>
    %cst_21 = arith.constant dense<0.000000e+00> : vector<16x16xf32>
    %42 = tpu.matmul %40, %41, %cst_21 {dimension_numbers = #tpu.dot_dimension_numbers<[1], [1], [0], [0], [0, 0, 1, 0], [], []>} : vector<16x32xbf16>, vector<16x32xbf16>, vector<16x16xf32> -> vector<16x16xf32>
    %cst_22 = arith.constant dense<0xFF800000> : vector<16xf32>
    %43 = vector.multi_reduction <maximumf>, %42, %cst_22 [1] : vector<16x16xf32> to vector<16xf32>
    %44 = vector.shape_cast %43 : vector<16xf32> to vector<16x1xf32>
    %45 = vector.broadcast %44 : vector<16x1xf32> to vector<16x16xf32>
    %46 = arith.subf %42, %45 : vector<16x16xf32>
    %47 = math.exp %46 : vector<16x16xf32>
    %cst_23 = arith.constant dense<0.000000e+00> : vector<16xf32>
    %48 = vector.multi_reduction <add>, %47, %cst_23 [1] : vector<16x16xf32> to vector<16xf32>
    %49 = vector.shape_cast %48 : vector<16xf32> to vector<16x1xf32>
    %50 = tpu.reciprocal %49 {approx = true} : vector<16x1xf32> -> vector<16x1xf32>
    %51 = vector.broadcast %50 : vector<16x1xf32> to vector<16x16xf32>
    %52 = arith.mulf %47, %51 : vector<16x16xf32>
    %53 = arith.truncf %52 : vector<16x16xf32> to vector<16x16xbf16>
    %c0_24 = arith.constant 0 : index
    %c32_25 = arith.constant 32 : index
    %54 = vector.load %arg22[%c0_24, %c32_25] : memref<16x128xbf16, #tpu.memory_space<vmem>>, vector<16x32xbf16>
    %cst_26 = arith.constant dense<0.000000e+00> : vector<16x32xf32>
    %55 = tpu.matmul %53, %54, %cst_26 {dimension_numbers = #tpu.dot_dimension_numbers<[1], [0], [0], [1], [0, 0, 1, 1], [], []>} : vector<16x16xbf16>, vector<16x32xbf16>, vector<16x32xf32> -> vector<16x32xf32>
    %56 = arith.truncf %55 : vector<16x32xf32> to vector<16x32xbf16>
    %c32_27 = arith.constant 32 : index
    %c0_28 = arith.constant 0 : index
    %57 = vector.load %arg10[%c32_27, %c0_28] : memref<128x128xbf16, #tpu.memory_space<vmem>>, vector<32x128xbf16>
    %cst_29 = arith.constant dense<0.000000e+00> : vector<16x128xf32>
    %58 = tpu.matmul %56, %57, %cst_29 {dimension_numbers = #tpu.dot_dimension_numbers<[1], [0], [0], [1], [0, 0, 1, 1], [], []>} : vector<16x32xbf16>, vector<32x128xbf16>, vector<16x128xf32> -> vector<16x128xf32>
    %59 = arith.addf %39, %58 : vector<16x128xf32>
    %60 = vector.extract_strided_slice %20 {offsets = [0, 64], sizes = [16, 32], strides = [1, 1]} : vector<16x128xbf16> to vector<16x32xbf16>
    %c0_30 = arith.constant 0 : index
    %c64 = arith.constant 64 : index
    %61 = vector.load %arg21[%c0_30, %c64] : memref<16x128xbf16, #tpu.memory_space<vmem>>, vector<16x32xbf16>
    %cst_31 = arith.constant dense<0.000000e+00> : vector<16x16xf32>
    %62 = tpu.matmul %60, %61, %cst_31 {dimension_numbers = #tpu.dot_dimension_numbers<[1], [1], [0], [0], [0, 0, 1, 0], [], []>} : vector<16x32xbf16>, vector<16x32xbf16>, vector<16x16xf32> -> vector<16x16xf32>
    %cst_32 = arith.constant dense<0xFF800000> : vector<16xf32>
    %63 = vector.multi_reduction <maximumf>, %62, %cst_32 [1] : vector<16x16xf32> to vector<16xf32>
    %64 = vector.shape_cast %63 : vector<16xf32> to vector<16x1xf32>
    %65 = vector.broadcast %64 : vector<16x1xf32> to vector<16x16xf32>
    %66 = arith.subf %62, %65 : vector<16x16xf32>
    %67 = math.exp %66 : vector<16x16xf32>
    %cst_33 = arith.constant dense<0.000000e+00> : vector<16xf32>
    %68 = vector.multi_reduction <add>, %67, %cst_33 [1] : vector<16x16xf32> to vector<16xf32>
    %69 = vector.shape_cast %68 : vector<16xf32> to vector<16x1xf32>
    %70 = tpu.reciprocal %69 {approx = true} : vector<16x1xf32> -> vector<16x1xf32>
    %71 = vector.broadcast %70 : vector<16x1xf32> to vector<16x16xf32>
    %72 = arith.mulf %67, %71 : vector<16x16xf32>
    %73 = arith.truncf %72 : vector<16x16xf32> to vector<16x16xbf16>
    %c0_34 = arith.constant 0 : index
    %c64_35 = arith.constant 64 : index
    %74 = vector.load %arg22[%c0_34, %c64_35] : memref<16x128xbf16, #tpu.memory_space<vmem>>, vector<16x32xbf16>
    %cst_36 = arith.constant dense<0.000000e+00> : vector<16x32xf32>
    %75 = tpu.matmul %73, %74, %cst_36 {dimension_numbers = #tpu.dot_dimension_numbers<[1], [0], [0], [1], [0, 0, 1, 1], [], []>} : vector<16x16xbf16>, vector<16x32xbf16>, vector<16x32xf32> -> vector<16x32xf32>
    %76 = arith.truncf %75 : vector<16x32xf32> to vector<16x32xbf16>
    %c64_37 = arith.constant 64 : index
    %c0_38 = arith.constant 0 : index
    %77 = vector.load %arg10[%c64_37, %c0_38] : memref<128x128xbf16, #tpu.memory_space<vmem>>, vector<32x128xbf16>
    %cst_39 = arith.constant dense<0.000000e+00> : vector<16x128xf32>
    %78 = tpu.matmul %76, %77, %cst_39 {dimension_numbers = #tpu.dot_dimension_numbers<[1], [0], [0], [1], [0, 0, 1, 1], [], []>} : vector<16x32xbf16>, vector<32x128xbf16>, vector<16x128xf32> -> vector<16x128xf32>
    %79 = arith.addf %59, %78 : vector<16x128xf32>
    %80 = vector.extract_strided_slice %20 {offsets = [0, 96], sizes = [16, 32], strides = [1, 1]} : vector<16x128xbf16> to vector<16x32xbf16>
    %c0_40 = arith.constant 0 : index
    %c96 = arith.constant 96 : index
    %81 = vector.load %arg21[%c0_40, %c96] : memref<16x128xbf16, #tpu.memory_space<vmem>>, vector<16x32xbf16>
    %cst_41 = arith.constant dense<0.000000e+00> : vector<16x16xf32>
    %82 = tpu.matmul %80, %81, %cst_41 {dimension_numbers = #tpu.dot_dimension_numbers<[1], [1], [0], [0], [0, 0, 1, 0], [], []>} : vector<16x32xbf16>, vector<16x32xbf16>, vector<16x16xf32> -> vector<16x16xf32>
    %cst_42 = arith.constant dense<0xFF800000> : vector<16xf32>
    %83 = vector.multi_reduction <maximumf>, %82, %cst_42 [1] : vector<16x16xf32> to vector<16xf32>
    %84 = vector.shape_cast %83 : vector<16xf32> to vector<16x1xf32>
    %85 = vector.broadcast %84 : vector<16x1xf32> to vector<16x16xf32>
    %86 = arith.subf %82, %85 : vector<16x16xf32>
    %87 = math.exp %86 : vector<16x16xf32>
    %cst_43 = arith.constant dense<0.000000e+00> : vector<16xf32>
    %88 = vector.multi_reduction <add>, %87, %cst_43 [1] : vector<16x16xf32> to vector<16xf32>
    %89 = vector.shape_cast %88 : vector<16xf32> to vector<16x1xf32>
    %90 = tpu.reciprocal %89 {approx = true} : vector<16x1xf32> -> vector<16x1xf32>
    %91 = vector.broadcast %90 : vector<16x1xf32> to vector<16x16xf32>
    %92 = arith.mulf %87, %91 : vector<16x16xf32>
    %93 = arith.truncf %92 : vector<16x16xf32> to vector<16x16xbf16>
    %c0_44 = arith.constant 0 : index
    %c96_45 = arith.constant 96 : index
    %94 = vector.load %arg22[%c0_44, %c96_45] : memref<16x128xbf16, #tpu.memory_space<vmem>>, vector<16x32xbf16>
    %cst_46 = arith.constant dense<0.000000e+00> : vector<16x32xf32>
    %95 = tpu.matmul %93, %94, %cst_46 {dimension_numbers = #tpu.dot_dimension_numbers<[1], [0], [0], [1], [0, 0, 1, 1], [], []>} : vector<16x16xbf16>, vector<16x32xbf16>, vector<16x32xf32> -> vector<16x32xf32>
    %96 = arith.truncf %95 : vector<16x32xf32> to vector<16x32xbf16>
    %c96_47 = arith.constant 96 : index
    %c0_48 = arith.constant 0 : index
    %97 = vector.load %arg10[%c96_47, %c0_48] : memref<128x128xbf16, #tpu.memory_space<vmem>>, vector<32x128xbf16>
    %cst_49 = arith.constant dense<0.000000e+00> : vector<16x128xf32>
    %98 = tpu.matmul %96, %97, %cst_49 {dimension_numbers = #tpu.dot_dimension_numbers<[1], [0], [0], [1], [0, 0, 1, 1], [], []>} : vector<16x32xbf16>, vector<32x128xbf16>, vector<16x128xf32> -> vector<16x128xf32>
    %99 = arith.addf %79, %98 : vector<16x128xf32>
    %c0_50 = arith.constant 0 : index
    %c0_51 = arith.constant 0 : index
    %100 = vector.load %arg11[%c0_50, %c0_51] : memref<1x128xf32, #tpu.memory_space<vmem>>, vector<1x128xf32>
    %101 = vector.broadcast %100 : vector<1x128xf32> to vector<16x128xf32>
    %102 = arith.addf %99, %101 : vector<16x128xf32>
    %103 = arith.addf %7, %102 : vector<16x128xf32>
    %cst_52 = arith.constant dense<0.000000e+00> : vector<16xf32>
    %104 = vector.multi_reduction <add>, %103, %cst_52 [1] : vector<16x128xf32> to vector<16xf32>
    %105 = vector.shape_cast %104 : vector<16xf32> to vector<16x1xf32>
    %cst_53 = arith.constant 1.280000e+02 : f32
    %106 = vector.broadcast %cst_53 : f32 to vector<16x1xf32>
    %107 = arith.divf %105, %106 : vector<16x1xf32>
    %108 = arith.mulf %103, %103 : vector<16x128xf32>
    %cst_54 = arith.constant dense<0.000000e+00> : vector<16xf32>
    %109 = vector.multi_reduction <add>, %108, %cst_54 [1] : vector<16x128xf32> to vector<16xf32>
    %110 = vector.shape_cast %109 : vector<16xf32> to vector<16x1xf32>
    %cst_55 = arith.constant 1.280000e+02 : f32
    %111 = vector.broadcast %cst_55 : f32 to vector<16x1xf32>
    %112 = arith.divf %110, %111 : vector<16x1xf32>
    %113 = arith.mulf %107, %107 : vector<16x1xf32>
    %114 = arith.subf %112, %113 : vector<16x1xf32>
    %cst_56 = arith.constant 0.000000e+00 : f32
    %115 = vector.broadcast %cst_56 : f32 to vector<16x1xf32>
    %116 = arith.maximumf %114, %115 : vector<16x1xf32>
    %117 = vector.broadcast %107 : vector<16x1xf32> to vector<16x128xf32>
    %118 = arith.subf %103, %117 : vector<16x128xf32>
    %cst_57 = arith.constant 9.99999974E-6 : f32
    %119 = vector.broadcast %cst_57 : f32 to vector<16x1xf32>
    %120 = arith.addf %116, %119 : vector<16x1xf32>
    %121 = math.rsqrt %120 : vector<16x1xf32>
    %122 = vector.broadcast %121 : vector<16x1xf32> to vector<16x128xf32>
    %123 = arith.mulf %118, %122 : vector<16x128xf32>
    %c0_58 = arith.constant 0 : index
    %c0_59 = arith.constant 0 : index
    %124 = vector.load %arg16[%c0_58, %c0_59] : memref<1x128xf32, #tpu.memory_space<vmem>>, vector<1x128xf32>
    %125 = vector.broadcast %124 : vector<1x128xf32> to vector<16x128xf32>
    %126 = arith.mulf %123, %125 : vector<16x128xf32>
    %c0_60 = arith.constant 0 : index
    %c0_61 = arith.constant 0 : index
    %127 = vector.load %arg17[%c0_60, %c0_61] : memref<1x128xf32, #tpu.memory_space<vmem>>, vector<1x128xf32>
    %128 = vector.broadcast %127 : vector<1x128xf32> to vector<16x128xf32>
    %129 = arith.addf %126, %128 : vector<16x128xf32>
    %130 = arith.truncf %129 : vector<16x128xf32> to vector<16x128xbf16>
    %c0_62 = arith.constant 0 : index
    %c0_63 = arith.constant 0 : index
    %131 = vector.load %arg12[%c0_62, %c0_63] : memref<128x256xbf16, #tpu.memory_space<vmem>>, vector<128x256xbf16>
    %cst_64 = arith.constant dense<0.000000e+00> : vector<16x256xf32>
    %132 = tpu.matmul %130, %131, %cst_64 {dimension_numbers = #tpu.dot_dimension_numbers<[1], [0], [0], [1], [0, 0, 1, 1], [], []>} : vector<16x128xbf16>, vector<128x256xbf16>, vector<16x256xf32> -> vector<16x256xf32>
    %c0_65 = arith.constant 0 : index
    %c0_66 = arith.constant 0 : index
    %133 = vector.load %arg13[%c0_65, %c0_66] : memref<1x256xf32, #tpu.memory_space<vmem>>, vector<1x256xf32>
    %134 = vector.broadcast %133 : vector<1x256xf32> to vector<16x256xf32>
    %135 = arith.addf %132, %134 : vector<16x256xf32>
    %cst_67 = arith.constant 0.000000e+00 : f32
    %136 = vector.broadcast %cst_67 : f32 to vector<16x256xf32>
    %137 = arith.maximumf %135, %136 : vector<16x256xf32>
    %138 = arith.truncf %137 : vector<16x256xf32> to vector<16x256xbf16>
    %c0_68 = arith.constant 0 : index
    %c0_69 = arith.constant 0 : index
    %139 = vector.load %arg14[%c0_68, %c0_69] : memref<256x128xbf16, #tpu.memory_space<vmem>>, vector<256x128xbf16>
    %cst_70 = arith.constant dense<0.000000e+00> : vector<16x128xf32>
    %140 = tpu.matmul %138, %139, %cst_70 {dimension_numbers = #tpu.dot_dimension_numbers<[1], [0], [0], [1], [0, 0, 1, 1], [], []>} : vector<16x256xbf16>, vector<256x128xbf16>, vector<16x128xf32> -> vector<16x128xf32>
    %c0_71 = arith.constant 0 : index
    %c0_72 = arith.constant 0 : index
    %141 = vector.load %arg15[%c0_71, %c0_72] : memref<1x128xf32, #tpu.memory_space<vmem>>, vector<1x128xf32>
    %142 = vector.broadcast %141 : vector<1x128xf32> to vector<16x128xf32>
    %143 = arith.addf %140, %142 : vector<16x128xf32>
    %144 = arith.addf %129, %143 : vector<16x128xf32>
    %cst_73 = arith.constant dense<0.000000e+00> : vector<16xf32>
    %145 = vector.multi_reduction <add>, %144, %cst_73 [1] : vector<16x128xf32> to vector<16xf32>
    %146 = vector.shape_cast %145 : vector<16xf32> to vector<16x1xf32>
    %cst_74 = arith.constant 1.280000e+02 : f32
    %147 = vector.broadcast %cst_74 : f32 to vector<16x1xf32>
    %148 = arith.divf %146, %147 : vector<16x1xf32>
    %149 = arith.mulf %144, %144 : vector<16x128xf32>
    %cst_75 = arith.constant dense<0.000000e+00> : vector<16xf32>
    %150 = vector.multi_reduction <add>, %149, %cst_75 [1] : vector<16x128xf32> to vector<16xf32>
    %151 = vector.shape_cast %150 : vector<16xf32> to vector<16x1xf32>
    %cst_76 = arith.constant 1.280000e+02 : f32
    %152 = vector.broadcast %cst_76 : f32 to vector<16x1xf32>
    %153 = arith.divf %151, %152 : vector<16x1xf32>
    %154 = arith.mulf %148, %148 : vector<16x1xf32>
    %155 = arith.subf %153, %154 : vector<16x1xf32>
    %cst_77 = arith.constant 0.000000e+00 : f32
    %156 = vector.broadcast %cst_77 : f32 to vector<16x1xf32>
    %157 = arith.maximumf %155, %156 : vector<16x1xf32>
    %158 = vector.broadcast %148 : vector<16x1xf32> to vector<16x128xf32>
    %159 = arith.subf %144, %158 : vector<16x128xf32>
    %cst_78 = arith.constant 9.99999974E-6 : f32
    %160 = vector.broadcast %cst_78 : f32 to vector<16x1xf32>
    %161 = arith.addf %157, %160 : vector<16x1xf32>
    %162 = math.rsqrt %161 : vector<16x1xf32>
    %163 = vector.broadcast %162 : vector<16x1xf32> to vector<16x128xf32>
    %164 = arith.mulf %159, %163 : vector<16x128xf32>
    %c0_79 = arith.constant 0 : index
    %c0_80 = arith.constant 0 : index
    %165 = vector.load %arg18[%c0_79, %c0_80] : memref<1x128xf32, #tpu.memory_space<vmem>>, vector<1x128xf32>
    %166 = vector.broadcast %165 : vector<1x128xf32> to vector<16x128xf32>
    %167 = arith.mulf %164, %166 : vector<16x128xf32>
    %c0_81 = arith.constant 0 : index
    %c0_82 = arith.constant 0 : index
    %168 = vector.load %arg19[%c0_81, %c0_82] : memref<1x128xf32, #tpu.memory_space<vmem>>, vector<1x128xf32>
    %169 = vector.broadcast %168 : vector<1x128xf32> to vector<16x128xf32>
    %170 = arith.addf %167, %169 : vector<16x128xf32>
    %c0_83 = arith.constant 0 : index
    %c0_84 = arith.constant 0 : index
    %c0_85 = arith.constant 0 : index
    %171 = vector.load %arg20[%c0_83, %c0_84, %c0_85] : memref<1x16x128xf32, #tpu.memory_space<vmem>>, vector<1x16x128xf32>
    %172 = vector.shape_cast %171 : vector<1x16x128xf32> to vector<16x128xf32>
    %173 = vector.shape_cast %170 : vector<16x128xf32> to vector<1x16x128xf32>
    tpu.vector_store %arg20[%c0_83, %c0_84, %c0_85], %173 {strides = array<i32>} : memref<1x16x128xf32, #tpu.memory_space<vmem>>, vector<1x16x128xf32>,
    return
  }
  func.func @transform_0(%arg0: i32, %arg1: i32) -> (i32, i32, i32) {
    %c0_i32 = arith.constant 0 : i32
    %c0_i32_0 = arith.constant 0 : i32
    %c0_i32_1 = arith.constant 0 : i32
    return %arg0, %c0_i32, %c0_i32_0 : i32, i32, i32
  }
  func.func @transform_1(%arg0: i32, %arg1: i32) -> (i32, i32, i32) {
    %c0_i32 = arith.constant 0 : i32
    %c0_i32_0 = arith.constant 0 : i32
    %c0_i32_1 = arith.constant 0 : i32
    return %arg0, %c0_i32, %c0_i32_0 : i32, i32, i32
  }
  func.func @transform_2(%arg0: i32, %arg1: i32) -> (i32, i32) {
    %c0_i32 = arith.constant 0 : i32
    %c0_i32_0 = arith.constant 0 : i32
    %c0_i32_1 = arith.constant 0 : i32
    return %c0_i32, %c0_i32_0 : i32, i32
  }
  func.func @transform_3(%arg0: i32, %arg1: i32) -> (i32, i32) {
    %c0_i32 = arith.constant 0 : i32
    %c0_i32_0 = arith.constant 0 : i32
    %c0_i32_1 = arith.constant 0 : i32
    return %c0_i32, %c0_i32_0 : i32, i32
  }
  func.func @transform_4(%arg0: i32, %arg1: i32) -> (i32, i32) {
    %c0_i32 = arith.constant 0 : i32
    %c0_i32_0 = arith.constant 0 : i32
    %c0_i32_1 = arith.constant 0 : i32
    return %c0_i32, %c0_i32_0 : i32, i32
  }
  func.func @transform_5(%arg0: i32, %arg1: i32) -> (i32, i32) {
    %c0_i32 = arith.constant 0 : i32
    %c0_i32_0 = arith.constant 0 : i32
    %c0_i32_1 = arith.constant 0 : i32
    return %c0_i32, %c0_i32_0 : i32, i32
  }
  func.func @transform_6(%arg0: i32, %arg1: i32) -> (i32, i32) {
    %c0_i32 = arith.constant 0 : i32
    %c0_i32_0 = arith.constant 0 : i32
    %c0_i32_1 = arith.constant 0 : i32
    return %c0_i32, %c0_i32_0 : i32, i32
  }
  func.func @transform_7(%arg0: i32, %arg1: i32) -> (i32, i32) {
    %c0_i32 = arith.constant 0 : i32
    %c0_i32_0 = arith.constant 0 : i32
    %c0_i32_1 = arith.constant 0 : i32
    return %c0_i32, %c0_i32_0 : i32, i32
  }
  func.func @transform_8(%arg0: i32, %arg1: i32) -> (i32, i32) {
    %c0_i32 = arith.constant 0 : i32
    %c0_i32_0 = arith.constant 0 : i32
    %c0_i32_1 = arith.constant 0 : i32
    return %c0_i32, %c0_i32_0 : i32, i32
  }
  func.func @transform_9(%arg0: i32, %arg1: i32) -> (i32, i32) {
    %c0_i32 = arith.constant 0 : i32
    %c0_i32_0 = arith.constant 0 : i32
    %c0_i32_1 = arith.constant 0 : i32
    return %c0_i32, %c0_i32_0 : i32, i32
  }
  func.func @transform_10(%arg0: i32, %arg1: i32) -> (i32, i32) {
    %c0_i32 = arith.constant 0 : i32
    %c0_i32_0 = arith.constant 0 : i32
    %c0_i32_1 = arith.constant 0 : i32
    return %c0_i32, %c0_i32_0 : i32, i32
  }
  func.func @transform_11(%arg0: i32, %arg1: i32) -> (i32, i32) {
    %c0_i32 = arith.constant 0 : i32
    %c0_i32_0 = arith.constant 0 : i32
    %c0_i32_1 = arith.constant 0 : i32
    return %c0_i32, %c0_i32_0 : i32, i32
  }
  func.func @transform_12(%arg0: i32, %arg1: i32) -> (i32, i32) {
    %c0_i32 = arith.constant 0 : i32
    %c0_i32_0 = arith.constant 0 : i32
    %c0_i32_1 = arith.constant 0 : i32
    return %c0_i32, %c0_i32_0 : i32, i32
  }
  func.func @transform_13(%arg0: i32, %arg1: i32) -> (i32, i32) {
    %c0_i32 = arith.constant 0 : i32
    %c0_i32_0 = arith.constant 0 : i32
    %c0_i32_1 = arith.constant 0 : i32
    return %c0_i32, %c0_i32_0 : i32, i32
  }
  func.func @transform_14(%arg0: i32, %arg1: i32) -> (i32, i32) {
    %c0_i32 = arith.constant 0 : i32
    %c0_i32_0 = arith.constant 0 : i32
    %c0_i32_1 = arith.constant 0 : i32
    return %c0_i32, %c0_i32_0 : i32, i32
  }
  func.func @transform_15(%arg0: i32, %arg1: i32) -> (i32, i32) {
    %c0_i32 = arith.constant 0 : i32
    %c0_i32_0 = arith.constant 0 : i32
    %c0_i32_1 = arith.constant 0 : i32
    return %c0_i32, %c0_i32_0 : i32, i32
  }
  func.func @transform_16(%arg0: i32, %arg1: i32) -> (i32, i32) {
    %c0_i32 = arith.constant 0 : i32
    %c0_i32_0 = arith.constant 0 : i32
    %c0_i32_1 = arith.constant 0 : i32
    return %c0_i32, %c0_i32_0 : i32, i32
  }
  func.func @transform_17(%arg0: i32, %arg1: i32) -> (i32, i32) {
    %c0_i32 = arith.constant 0 : i32
    %c0_i32_0 = arith.constant 0 : i32
    %c0_i32_1 = arith.constant 0 : i32
    return %c0_i32, %c0_i32_0 : i32, i32
  }
  func.func @transform_18(%arg0: i32, %arg1: i32) -> (i32, i32, i32) {
    %c0_i32 = arith.constant 0 : i32
    %c0_i32_0 = arith.constant 0 : i32
    return %arg0, %arg1, %c0_i32 : i32, i32, i32
  }
}

</mosaic_0001>

<bundles_post_ra>
// kernel: tpu_custom_call.1
= control target key start
LH: loop header
LB: loop body
LE: loop exit
PB: predicated region body
PF: predicated region fallthrough
CT: control target
= control target key end

     0   :  { %s3460_s0 = inlined_call_operand.hbm [shape: f32[2,16,128], index: 0, kind: input, shape index: {}]   ;;  %s3461_s1 = inlined_call_operand.hbm [shape: f32[2,16,128], index: 1, kind: input, shape index: {}]   ;;  %s3462_s2 = inlined_call_operand.hbm [shape: bf16[128,128], index: 2, kind: input, shape index: {}]   ;;  %s3463_s3 = inlined_call_operand.vmem [shape: f32[1,128], index: 3, kind: input, shape index: {}]   ;;  %s3464_s4 = inlined_call_operand.hbm [shape: bf16[128,128], index: 4, kind: input, shape index: {}]   ;;  %s3465_s5 = inlined_call_operand.vmem [shape: f32[1,128], index: 5, kind: input, shape index: {}]   ;;  %s3466_s6 = inlined_call_operand.hbm [shape: bf16[128,128], index: 6, kind: input, shape index: {}]   ;;  %s3467_s7 = inlined_call_operand.vmem [shape: f32[1,128], index: 7, kind: input, shape index: {}]   ;;  %s3468_s8 = inlined_call_operand.hbm [shape: bf16[128,128], index: 8, kind: input, shape index: {}]   ;;  %s3469_s9 = inlined_call_operand.vmem [shape: f32[1,128], index: 9, kind: input, shape index: {}]   ;;  %s3470_s10 = inlined_call_operand.hbm [shape: bf16[128,256], index: 10, kind: input, shape index: {}]   ;;  %s3471_s11 = inlined_call_operand.vmem [shape: f32[1,256], index: 11, kind: input, shape index: {}]   ;;  %s3472_s12 = inlined_call_operand.hbm [shape: bf16[256,128], index: 12, kind: input, shape index: {}]   ;;  %s3473_s13 = inlined_call_operand.vmem [shape: f32[1,128], index: 13, kind: input, shape index: {}]   ;;  %s3474_s14 = inlined_call_operand.vmem [shape: f32[1,128], index: 14, kind: input, shape index: {}]   ;;  %s3475_s15 = inlined_call_operand.vmem [shape: f32[1,128], index: 15, kind: input, shape index: {}]   ;;  %s3476_s16 = inlined_call_operand.vmem [shape: f32[1,128], index: 16, kind: input, shape index: {}]   ;;  %s3477_s17 = inlined_call_operand.vmem [shape: f32[1,128], index: 17, kind: input, shape index: {}]   ;;  %s3478_s18 = inlined_call_operand.hbm [shape: f32[2,16,128], index: 18, kind: output, shape index: {}]  }
   0x1   :  { %3491 = sst [smem:[#allocation34_spill]] %s3460_s0 }
   0x2   :  { %3492 = sst [smem:[#allocation35_spill]] %s3461_s1 }
   0x3   :  { %3493 = sst [smem:[#allocation36_spill]] %s3462_s2 }
   0x4   :  { %3494 = sst [smem:[#allocation37_spill]] %s3464_s4 }
   0x5   :  { %3495 = sst [smem:[#allocation38_spill]] %s3466_s6 }
   0x6   :  { %3496 = sst [smem:[#allocation39_spill]] %s3468_s8 }
   0x7   :  { %3497 = sst [smem:[#allocation40_spill]] %s3470_s10 }
   0x8   :  { %3498 = sst [smem:[#allocation41_spill]] %s3471_s11 }
   0x9   :  { %3499 = sst [smem:[#allocation42_spill]] %s3472_s12 }
   0xa   :  { %3500 = sst [smem:[#allocation43_spill]] %s3473_s13 }
   0xb   :  { %3501 = sst [smem:[#allocation44_spill]] %s3475_s15 }
   0xc   :  { %3502 = sst [smem:[#allocation45_spill]] %s3476_s16 }
   0xd   :  { %3503 = sst [smem:[#allocation46_spill]] %s3477_s17 }
   0xe   :  { %3504 = sst [smem:[#allocation47_spill]] %s3478_s18 }
   0xf   :  { %23 = vsyncpa [#allocation5], 0 }
  0x10   :  { %25 = vsyncpa [#allocation5 + $0x1], 0 }
  0x11   :  { %26 = vsyncpa [#allocation8], 0 }
  0x12   :  { %28 = vsyncpa [#allocation8 + $0x1], 0 }
  0x13   :  { %29 = vsyncpa [#allocation11], 0 }
  0x14   :  { %30 = vsyncpa [#allocation14], 0 }
  0x15   :  { %31 = vsyncpa [#allocation17], 0 }
  0x16   :  { %32 = vsyncpa [#allocation6], 0 }
  0x17   :  { %34 = vsyncpa [#allocation6 + $0x1], 0  ;;  %s3104_s27 = smov 0   ;;  %s3106_s28 = smov 0  }
  0x18   :  { %s3108_s29 = smov 0   ;;  %s3110_s30 = smov 0  }
  0x19   :  { %s3112_s0 = smov 0   ;;  %s3114_s19 = smov 0  }
  0x1a LB: > { %3505 = sst [smem:[#allocation26_spill]] %s2971_s27  ;;  %s3135_s1 = sadd.s32 4294967295, %s2991_s19   ;;  %s2991_s19 = sphi %s3114_s19, %s40_s19   ;;  %s2987_s0 = sphi %s3112_s0, %s3543_s0   ;;  %s2983_s30 = sphi %s3110_s30, %s3542_s30   ;;  %s2979_s29 = sphi %s3108_s29, %s3541_s29   ;;  %s2975_s28 = sphi %s3106_s28, %s3545_s28   ;;  %s2971_s27 = sphi %s3104_s27, %s3544_s27  }
  0x1b   : > { %3506 = sst [smem:[#allocation27_spill]] %s2979_s29  ;;  %p2076_p0 = scmp.ge.s32.totalorder %s2991_s19, 1 }
  0x1c   : > { %3507 = sst [smem:[#allocation28_spill]] %s2983_s30  ;;  %p73_p1 = scmp.eq.s32.totalorder %s3135_s1, 0 }
  0x1d   : > { %3508 = sst [smem:[#allocation29_spill]] %s2987_s0  ;;  %p473_p2 = scmp.lt.s32.totalorder %s2991_s19, 3 }
  0x1e   : > { %s3509_s22 = sld [smem:[#allocation36_spill]]  ;;  %s2993_s24 = smov [#allocation9]  }
  0x1f   : > { %p3143_p3 = pnand %p2076_p0, %p473_p2  ;;  %s486_s25 = sshll.u32 %s2993_s24, 4  ;;  %s487_s25 = int_to_ptr.vmem [resolvable:$true] %s486_s25 }
  0x20   : > { %p2083_p6 = scmp.ge.s32.totalorder %s2991_s19, 2  ;;  %s3512_s4 = sld [smem:[#allocation37_spill]] }
  0x21   : > { %p2490_p4 = pneg %p3143_p3  ;;  %s2994_s18 = smov 64  }
  0x22   : > { %s2995_s17 = smov 4   ;;  %s2996_s24 = smov [#allocation10]  }
  0x23   : > { %p3151_p5 = pnand %p2490_p4, %p73_p1  ;;  %s503_s16 = sshll.u32 %s2996_s24, 4  ;;  %s504_s16 = int_to_ptr.vmem [resolvable:$true] %s503_s16 }
  0x24   : > { %s484_s2 = sshll.u32 %s3509_s22, 4  ;;  %s3513_s8 = sld [smem:[#allocation39_spill]]  ;;  %s485_s2 = int_to_ptr.hbm [resolvable:$true] %s484_s2 }
  0x25   : > { %2493 = dma.hbm_to_vmem [thread:$0]  (!%p3151_p5), %s485_s2, 1024, %s487_s25, [#allocation8], %s2994_s18, %s2994_s18, %s2995_s17  }
  0x26   : > { %s501_s22 = sshll.u32 %s3512_s4, 4  ;;  %s3514_s6 = sld [smem:[#allocation38_spill]]  ;;  %s502_s22 = int_to_ptr.hbm [resolvable:$true] %s501_s22 }
  0x27   : > { %2496 = dma.hbm_to_vmem [thread:$0]  (!%p3151_p5), %s502_s22, 1024, %s504_s16, [#allocation11], %s2994_s18, %s2994_s18, %s2995_s17  }
  0x28   : > { %s2997_s15 = smov [#allocation13]   ;;  %s2998_s13 = smov [#allocation12]  }
  0x29   : > { %s537_s2 = sshll.u32 %s2997_s15, 4  ;;  %s520_s30 = sshll.u32 %s2998_s13, 4  ;;  %s538_s2 = int_to_ptr.vmem [resolvable:$true] %s537_s2  ;;  %s521_s30 = int_to_ptr.vmem [resolvable:$true] %s520_s30 }
  0x2a   : > { %s535_s11 = sshll.u32 %s3513_s8, 4  ;;  %s3515_s10 = sld [smem:[#allocation40_spill]]  ;;  %s536_s11 = int_to_ptr.hbm [resolvable:$true] %s535_s11 }
  0x2b   : > { %2502 = dma.hbm_to_vmem [thread:$0]  (!%p3151_p5), %s536_s11, 1024, %s538_s2, [#allocation14], %s2994_s18, %s2994_s18, %s2995_s17  }
  0x2c   : > { %s518_s4 = sshll.u32 %s3514_s6, 4  ;;  %s2999_s15 = smov [#allocation15]   ;;  %s519_s4 = int_to_ptr.hbm [resolvable:$true] %s518_s4 }
  0x2d   : > { %2499 = dma.hbm_to_vmem [thread:$0]  (!%p3151_p5), %s519_s4, 1024, %s521_s30, [#allocation11], %s2994_s18, %s2994_s18, %s2995_s17  }
  0x2e   : > { %s554_s11 = sshll.u32 %s2999_s15, 4  ;;  %s3516_s12 = sld [smem:[#allocation42_spill]]  ;;  %s555_s11 = int_to_ptr.vmem [resolvable:$true] %s554_s11 }
  0x2f   : > { %s3480_s2 = smov 128   ;;  %s3482_s13 = smov 8  }
  0x30   : > { %s552_s16 = sshll.u32 %s3515_s10, 4  ;;  %s3002_s4 = smov [#allocation16]   ;;  %s553_s16 = int_to_ptr.hbm [resolvable:$true] %s552_s16 }
  0x31   : > { %2505 = dma.hbm_to_vmem [thread:$0]  (!%p3151_p5), %s553_s16, 2048, %s555_s11, [#allocation14], %s3480_s2, %s3480_s2, %s3482_s13  }
  0x32   : > { %s571_s30 = sshll.u32 %s3002_s4, 4  ;;  %s2075_s25 = sadd.s32 4294967294, %s2991_s19   ;;  %s572_s30 = int_to_ptr.vmem [resolvable:$true] %s571_s30 }
  0x33   : > { %s52_s24 = sadd.s32 1, %s2987_s0  ;;  %s59_s15 = sadd.s32 1, %s2979_s29 }
  0x34   : > { %s569_s21 = sshll.u32 %s3516_s12, 4  ;;  %p54_p7 = scmp.ge.s32.totalorder %s52_s24, 2  ;;  %s570_s21 = int_to_ptr.hbm [resolvable:$true] %s569_s21 }
  0x35   : > { %2508 = dma.hbm_to_vmem [thread:$0]  (!%p3151_p5), %s570_s21, 2048, %s572_s30, [#allocation17], %s2994_s18, %s2994_s18, %s2995_s17  }
  0x36   : > { %p66_p8 = scmp.ne.s32.totalorder %s2979_s29, %s2975_s28  ;;  %p67_p9 = scmp.eq.s32.totalorder %s2991_s19, 0 }
  0x37   : > { %s3547_s24 = smov (%p54_p7, %s52_s24), 0  ;;  %p72_p11 = scmp.ne.s32.totalorder %s2975_s28, %s2971_s27 }
  0x38   : > { %3517 = sst [smem:[#allocation30_spill]] %s3547_s24  ;;  %p3209_p10 = por %p67_p9, %p66_p8 }
  0x39   : > { %s56_s26 = ssub.s32 %s2987_s0, %s3547_s24  ;;  %p460_p12 = scmp.eq.s32.totalorder %s3135_s1, 1 }
  0x3a   : > { %p57_p13 = scmp.eq.s32.totalorder %s56_s26, 0  ;;  %p3220_p0 = por %p73_p1, %p72_p11 }
  0x3b   : > { %p3224_p2 = por %p460_p12, %p66_p8  ;;  %p466_p4 = scmp.eq.s32.totalorder %s2075_s25, 1 }
  0x3c   : > { %s3229_s11 = scalar_select %p57_p13, %s2979_s29, %s59_s15  }
  0x3d   : > { %s3520_s18 = scalar_select %p3224_p2, 1, 0 }
  0x3e   : > { %3522 = sst [smem:[#allocation32_spill]] %s3229_s11  ;;  %p3231_p5 = por %p466_p4, %p72_p11 }
  0x3f   : > { %3521 = sst [smem:[#allocation31_spill]] %s3520_s18  ;;  %p2526_p7 = scmp.lt.s32.totalorder %s2991_s19, 2 }
  0x40   : > { %s3523_s22 = scalar_select %p3231_p5, 1, 0 }
  0x41   : > { %s600_s20 = sand.u32 1, %s2979_s29   ;;  %s2381_s21 = sshll.u32 %s2987_s0, 4 }
  0x42   : > { %3524 = sst [smem:[#allocation33_spill]] %s3523_s22  ;;  %s2084_s4 = sshll.u32 %s600_s20, 4 }
  0x43   : > { %s3525_s2 = sld [smem:[#allocation34_spill]]  ;;  %s604_s8 = scalar_lea.vmem [#allocation4], %s2084_s4 }
  0x44   : > { %s612_s10 = sshll.u32 %s604_s8, 4  ;;  %p2510_p8 = pnand %p2526_p7, %p3209_p10  ;;  %s613_s10 = int_to_ptr.vmem [resolvable:$true] %s612_s10 }
  0x45   : > { %s3526_s12 = sld [smem:[#allocation35_spill]]  ;;  %s626_s11 = scalar_lea.vmem [#allocation7], %s2084_s4 }
  0x46   : > { %s634_s29 = sshll.u32 %s626_s11, 4  ;;  %s601_s22 = scalar_lea.sflag [#allocation5], %s600_s20  ;;  %s635_s29 = int_to_ptr.vmem [resolvable:$true] %s634_s29 }
  0x47   : > { %s3527_s27 = smov 8   ;;  %s3528_s18 = smov 128  }
  0x49   : > { %s609_s13 = scalar_lea.hbm %s3525_s2, %s2381_s21  ;;  %s622_s2 = sand.u32 1, %s2991_s19  }
  0x4a   : > { %s610_s6 = sshll.u32 %s609_s13, 4  ;;  %s623_s8 = scalar_lea.sflag [#allocation8], %s622_s2  ;;  %s611_s6 = int_to_ptr.hbm [resolvable:$true] %s610_s6 }
  0x4b   : > { %s631_s24 = scalar_lea.hbm %s3526_s12, %s2381_s21  ;;  %646 = sbr.rel (%p3143_p3) target bundleno = 2126 (0x84e), region = 92 }
  0x4c   : > { %s632_s0 = sshll.u32 %s631_s24, 4  ;;  %s3256_s12 = sand.u32 (!%p3143_p3), 1, %s2975_s28   ;;  %s633_s0 = int_to_ptr.hbm [resolvable:$true] %s632_s0 }
  0x4d   : > { %2512 = dma.hbm_to_vmem [thread:$0]  (!%p2510_p8), %s611_s6, 256, %s613_s10, %s601_s22, %s3528_s18, %s3528_s18, %s3527_s27  }
  0x4e   : > { %2515 = dma.hbm_to_vmem [thread:$0]  (!%p2510_p8), %s633_s0, 256, %s635_s29, %s623_s8, %s3528_s18, %s3528_s18, %s3527_s27  }
  0x4f   : > { %s3259_s13 = sshll.u32 (!%p3143_p3), %s3256_s12, 4  ;;  %s649_s6 = scalar_lea.sflag (!%p3143_p3), [#allocation5], %s3256_s12 }
  0x50   : > { %s652_s10 = scalar_lea.vmem [#allocation4], %s3259_s13 }
  0x51   : > { %2942 = dma.done.wait (%p3220_p0), %s649_s6, 256  }
  0x52   : > { %2944 = vsyncadd (%p3220_p0), %s649_s6, 4294967040  ;;  %s658_s27 = sand.u32 1, %s3135_s1   ;;  %s662_s0 = scalar_lea.vmem [#allocation7], %s3259_s13 }
  0x53   : > { %s659_s29 = scalar_lea.sflag [#allocation8], %s658_s27 }
  0x54   : > { %2946 = dma.done.wait (%p3220_p0), %s659_s29, 256  }
  0x55   : > { %2948 = vsyncadd (%p3220_p0), %s659_s29, 4294967040 }
  0x56   : > { %2950 = dma.done.wait (%p73_p1), [#allocation8], 1024  }
  0x57   : > { %2952 = vsyncadd (%p73_p1), [#allocation8], 4294966272 }
  0x58   : > { %2954 = dma.done.wait (%p73_p1), [#allocation11], 2048  }
  0x59   : > { %2956 = vsyncadd (%p73_p1), [#allocation11], 4294965248 }
  0x5a   : > { %2958 = dma.done.wait (%p73_p1), [#allocation14], 3072  }
  0x5b   : > { %2960 = vsyncadd (%p73_p1), [#allocation14], 4294964224 }
  0x5c   : > { %2962 = dma.done.wait (%p73_p1), [#allocation17], 2048  }
  0x5d   : > { %2964 = vsyncadd (%p73_p1), [#allocation17], 4294965248  ;;  %v2390_v0 = vld [vmem:[#allocation10 + $0x38] sm:$0xff]  ;;  %v2389_v2 = vld [vmem:[#allocation10 + $0x30] sm:$0xff]  ;;  %vm1045_vm0 = vcmask 261120   ;;  %s3003_s11 = smov 96  }
  0x5e   : > { %v2406_v1 = vld [vmem:[#allocation9 + $0x38] sm:$0xff]  ;;  %832 = vmatpush.bf16.msra.mxu0 %v2390_v0  ;;  %v2405_v3 = vld [vmem:[#allocation9 + $0x30] sm:$0xff]  ;;  %v2388_v4 = vld [vmem:[#allocation10 + $0x28] sm:$0xff]  ;;  %s3004_s22 = smov 32   ;;  %s3005_s20 = smov 64   ;;  %vm1066_vm1 = vcmask 130048  }
  0x5f   : > { %1015 = vmatpush.bf16.msra.mxu2 %v2406_v1  ;;  %v2404_v5 = vld [vmem:[#allocation9 + $0x28] sm:$0xff]  ;;  %v2398_v6 = vld [vmem:[#allocation12 + $0x38] sm:$0xff]  ;;  %v2397_v7 = vld [vmem:[#allocation12 + $0x30] sm:$0xff]  ;;  %s3529_s2 = sld [smem:[#allocation44_spill]]  ;;  %s1889_s6 = scalar_lea.sflag [#allocation6], %s3256_s12 }
  0x60   : > { %919 = vmatpush.bf16.msra.mxu1 %v2398_v6  ;;  %v2387_v8 = vld [vmem:[#allocation10 + $0x20] sm:$0xff]  ;;  %v2396_v10 = vld [vmem:[#allocation12 + $0x28] sm:$0xff]  ;;  %v2386_v11 = vld [vmem:[#allocation10 + $0x18] sm:$0xff]  ;;  %s3532_s1 = sld [smem:[#allocation28_spill]] }
  0x61   : > { %v2403_v9 = vld [vmem:[#allocation9 + $0x20] sm:$0xff]  ;;  %v2402_v12 = vld [vmem:[#allocation9 + $0x18] sm:$0xff]  ;;  %v2385_v14 = vld [vmem:[#allocation10 + $0x10] sm:$0xff]  ;;  %s3533_s16 = sld [smem:[#allocation45_spill]] }
  0x62   : > { %833 = vmatpush.bf16.msra.mxu0 %v2389_v2  ;;  %v2395_v13 = vld [vmem:[#allocation12 + $0x20] sm:$0xff]  ;;  %v2401_v15 = vld [vmem:[#allocation9 + $0x10] sm:$0xff]  ;;  %v2394_v16 = vld [vmem:[#allocation12 + $0x18] sm:$0xff]  ;;  %s3535_s30 = sld [smem:[#allocation47_spill]] }
  0x63   : > { %1016 = vmatpush.bf16.msra.mxu2 %v2405_v3  ;;  %v2384_v17 = vld [vmem:[#allocation10 + $0x8] sm:$0xff]  ;;  %v3291_v19 = vld [vmem:[%s652_s10] sm:$0xff] }
  0x64   : > { %920 = vmatpush.bf16.msra.mxu1 %v2397_v7  ;;  %v2400_v18 = vld [vmem:[#allocation9 + $0x8] sm:$0xff]  ;;  %v759_v21 = vld [vmem:[%s662_s0] sm:$0xff] }
  0x65   : > { %v3295_v20 = vld [vmem:[%s652_s10 + $0x8] sm:$0xff]  ;;  %v2393_v23 = vld [vmem:[#allocation12 + $0x10] sm:$0xff]  ;;  %v761_v24 = vadd.f32 %v759_v21, %v3291_v19  ;;  %v2383_v26 = vld [vmem:[#allocation10] sm:$0xff]  ;;  %s3530_s10 = sld [smem:[#allocation41_spill]] }
  0x66   : > { %834 = vmatpush.bf16.msra.mxu0 %v2388_v4  ;;  %v760_v22 = vld [vmem:[%s662_s0 + $0x8] sm:$0xff]  ;;  %v2399_v27 = vld [vmem:[#allocation9] sm:$0xff]  ;;  %v850_v31 = vpack.c.bf16 %v3295_v20, %v3291_v19  ;;  %v2598_v33 = vld [vmem:[%s3465_s5] ss:$0 sm:$0xff]  ;;  %s3531_s0 = sld [smem:[#allocation43_spill]] }
  0x67   : > { %1017 = vmatpush.bf16.msra.mxu2 %v2404_v5  ;;  %v762_v25 = vadd.f32 %v760_v22, %v3295_v20  ;;  %v2392_v28 = vld [vmem:[#allocation12 + $0x8] sm:$0xff]  ;;  %v2391_v30 = vld [vmem:[#allocation12] sm:$0xff]  ;;  %v2599_v38 = vld [vmem:[%s3463_s3] ss:$0 sm:$0xff] }
  0x68   : > { %921 = vmatpush.bf16.msra.mxu1 %v2396_v10  ;;  %v2600_v45 = vld [vmem:[%s3467_s7] ss:$0 sm:$0xff]  ;;  %v2410_v1 = vld [vmem:[#allocation13 + $0x8] sm:$0xff]  ;;  %v2409_v2 = vld [vmem:[#allocation13] sm:$0xff]  ;;  %s3536_s26 = smov %s3535_s30 }
  0x69   : > { %v763_v29 = vpack.c.bf16 %v762_v25, %v761_v24 }
  0x6a   : > { %835 = vmatpush.bf16.msra.mxu0 %v2387_v8 }
  0x6b   : > { %1018 = vmatpush.bf16.msra.mxu2 %v2403_v9 }
  0x6c   : > { %922 = vmatpush.bf16.msra.mxu1 %v2395_v13 }
  0x6e   : > { %836 = vmatpush.bf16.msra.mxu0 %v2386_v11 }
  0x6f   : > { %1019 = vmatpush.bf16.msra.mxu2 %v2402_v12 }
  0x70   : > { %923 = vmatpush.bf16.msra.mxu1 %v2394_v16 }
  0x72   : > { %837 = vmatpush.bf16.msra.mxu0 %v2385_v14 }
  0x73   : > { %1020 = vmatpush.bf16.msra.mxu2 %v2401_v15 }
  0x74   : > { %924 = vmatpush.bf16.msra.mxu1 %v2393_v23 }
  0x76   : > { %838 = vmatpush.bf16.msra.mxu0 %v2384_v17 }
  0x77   : > { %1021 = vmatpush.bf16.msra.mxu2 %v2400_v18 }
  0x78   : > { %925 = vmatpush.bf16.msra.mxu1 %v2392_v28 }
  0x7a   : > { %839 = vmatpush.bf16.msra.mxu0 %v2383_v26 }
  0x7b   : > { %1022 = vmatpush.bf16.msra.mxu2 %v2399_v27 }
  0x7c   : > { %926 = vmatpush.bf16.msra.mxu1 %v2391_v30 }
  0x7d   : > { %840 = vmatmul.bf16.vlgmr.msra.gmra.mxu0 %v763_v29 }
  0x7e   : > { %1023 = vmatmul.bf16.vlgmr.msra.gmra.mxu2 %v763_v29 }
  0x7f   : > { %927 = vmatmul.bf16.vlgmr.msra.gmra.mxu1 %v850_v31  ;;  %1242 = vmatpush.bf16.msrb.mxu2 %v2410_v1 }
  0x83   : > { %1243 = vmatpush.bf16.msrb.mxu2 %v2409_v2 }
  0xfa   : > { %v841_v32 = vpop.f32.mrf.mxu0 }
  0xfb   : > { %v842_v36 = vadd.f32 %v2598_v33, %v841_v32 }
  0xfc   : > { %v928_v42 = vpop.f32.mrf.mxu1 }
  0xfd   : > { %v929_v49 = vadd.f32 %v2600_v45, %v928_v42 }
 0x101   : > { %v1024_v34 = vpop.f32.mrf.mxu2 }
 0x102   : > { %v843_v35 = vpop.f32.mrf.mxu0  ;;  %v1025_v40 = vadd.f32 %v2599_v38, %v1024_v34 }
 0x103   : > { %v844_v37 = vadd.f32 %v2598_v33, %v843_v35 }
 0x104   : > { %v1029_v46 = vmul.f32 0.17677669, %v1025_v40  ;;  %v930_v52 = vpop.f32.mrf.mxu1 }
 0x105   : > { %v2453_v39 = vpack.c.bf16 %v844_v37, %v842_v36  ;;  %v931_v53 = vadd.f32 %v2600_v45, %v930_v52 }
 0x106   : > { %v1031_v50 = vpack.c.bf16 %v1029_v46, %v1029_v46 }
 0x107   : > { %2454 = vst [vmem:[#allocation2] sm:$0xff] %v2453_v39   ;;  %v2458_v55 = vpack.c.bf16 %v931_v53, %v929_v49 }
 0x108   : > { %v1037_v56 = vunpack.c.l.b16 %v1031_v50 }
 0x109   : > { %v1026_v41 = vpop.f32.mrf.mxu2  ;;  %2459 = vst [vmem:[#allocation3] sm:$0xff] %v2458_v55  }
 0x10a   : > { %v1027_v43 = vadd.f32 %v2599_v38, %v1026_v41 }
 0x10c   : > { %v1030_v44 = vmul.f32 0.17677669, %v1027_v43 }
 0x10e   : > { %v1032_v47 = vpack.c.bf16 %v1030_v44, %v1030_v44  ;;  %v2407_v48 = vld [vmem:[#allocation2] sm:$0xff] }
 0x10f   : > { %1122 = vrot.lane.b32.xlu2 %v2407_v48, %s3003_s11  ;;  %v1050_v51 = vsel %vm1045_vm0, %v2407_v48, 0 }
 0x110   : > { %1059 = vmatpush.bf16.xpose.msra.mxu3 %v1050_v51  ;;  %v1038_v54 = vunpack.c.l.b16 %v1032_v47  ;;  %v3320_v58 = vld [vmem:[#allocation3] sm:$0xff] }
 0x112   : > { %v1039_v57 = vpack.c.b16 %v1038_v54, %v1037_v56 }
 0x117   : > { %1120 = vrot.lane.b32.xlu2 %v1039_v57, %s3003_s11  ;;  %2200 = vmatmul.msk.bf16.vlgmr.msra.gmra.mxu3 %vm1045_vm0, %v1039_v57 }
 0x118   : > { %1108 = vmatpush.bf16.msrb.mxu3 %v3320_v58 }
 0x11f   : > { %1353 = vrot.lane.b32.xlu2 %v1039_v57, %s3004_s22 }
 0x127   : > { %1250 = vrot.lane.b32.xlu2 %v1039_v57, %s3005_s20 }
 0x169   : > { %v1123_v59 = vpop.permute.xlu2 %1122 }
 0x16a   : > { %v1128_v60 = vsel %vm1045_vm0, %v1123_v59, 0 }
 0x16b   : > { %1137 = vmatpush.bf16.xpose.msra.mxu3 %v1128_v60 }
 0x171   : > { %v1121_v24 = vpop.permute.xlu2 %1120 }
 0x179   : > { %v1354_v27 = vpop.permute.xlu2 %1353 }
 0x181   : > { %v1251_v28 = vpop.permute.xlu2 %1250 }
 0x19a   : > { %v1061_v61 = vpop.f32.mrf.mxu3 }
 0x19b   : > { %v1067_v62 = vsel %vm1066_vm1, %v1061_v61, -inf }
 0x19c   : > { %1068 = vmax.xlane.f32.xlu0 %v1067_v62 }
 0x1a2   : > { %v1063_v63 = vpop.f32.mrf.mxu3 }
 0x1a3   : > { %v1070_v0 = vsel %vm1066_vm1, %v1063_v63, -inf }
 0x1a4   : > { %1071 = vmax.xlane.f32.xlu0 %v1070_v0 }
 0x1b8   : > { %1355 = vrot.lane.b32.xlu0 %v2407_v48, %s3004_s22 }
 0x20f   : > { %v1069_v3 = vpop.xlane.xlu0 %1068 }
 0x210   : > { %v1073_v4 = vsub.f32 %v1061_v61, %v1069_v3 }
 0x212   : > { %v1075_v5 = vmul.f32 1.442695, %v1073_v4 }
 0x214   : > { %2607 = vpow2.f32 %v1075_v5 }
 0x217   : > { %v1072_v6 = vpop.xlane.xlu0 %1071 }
 0x218   : > { %v1074_v7 = vsub.f32 %v1063_v63, %v1072_v6 }
 0x21a   : > { %v2608_v8 = vpop.eup %2607  ;;  %v1077_v9 = vmul.f32 1.442695, %v1074_v7 }
 0x21b   : > { %v1079_v10 = vsel %vm1066_vm1, %v2608_v8, 0.0 }
 0x21c   : > { %2609 = vpow2.f32 %v1077_v9  ;;  %1080 = vadd.xlane.f32.xlu1 %v1079_v10 }
 0x222   : > { %v2610_v11 = vpop.eup %2609 }
 0x223   : > { %v1082_v12 = vsel %vm1066_vm1, %v2610_v11, 0.0 }
 0x224   : > { %1083 = vadd.xlane.f32.xlu1 %v1082_v12 }
 0x22a   : > { %v1356_v13 = vpop.permute.xlu0 %1355 }
 0x22b   : > { %v1361_v14 = vsel %vm1045_vm0, %v1356_v13, 0 }
 0x22c   : > { %1370 = vmatpush.bf16.xpose.msra.mxu2 %v1361_v14 }
 0x23d   : > { %1252 = vrot.lane.b32.xlu1 %v2407_v48, %s3005_s20 }
 0x28f   : > { %v1081_v15 = vpop.xlane.xlu1 %1080 }
 0x290   : > { %2611 = vrcp.f32 %v1081_v15 }
 0x296   : > { %v2612_v17 = vpop.eup %2611 }
 0x297   : > { %v1084_v16 = vpop.xlane.xlu1 %1083  ;;  %v1087_v21 = vmul.f32 %v2612_v17, %v2608_v8 }
 0x298   : > { %2613 = vrcp.f32 %v1084_v16 }
 0x29e   : > { %v2614_v18 = vpop.eup %2613 }
 0x29f   : > { %v1088_v22 = vmul.f32 %v2614_v18, %v2610_v11 }
 0x2a1   : > { %v1089_v23 = vpack.c.bf16 %v1088_v22, %v1087_v21 }
 0x2a3   : > { %2205 = vmatmul.msk.bf16.vlgmr.msrb.gmra.mxu3 %vm1066_vm1, %v1089_v23  ;;  %v2412_v23 = vld [vmem:[#allocation13 + $0x18] sm:$0xff] }
 0x2a4   : > { %1213 = vmatpush.bf16.msrb.mxu1 %v2412_v23 }
 0x2af   : > { %v1253_v25 = vpop.permute.xlu1 %1252 }
 0x2b0   : > { %v1258_v26 = vsel %vm1045_vm0, %v1253_v25, 0 }
 0x2b1   : > { %1267 = vmatpush.bf16.xpose.msrb.mxu3 %v1258_v26 }
 0x2b3   : > { %2206 = vmatmul.msk.bf16.vlgmr.msra.gmra.mxu3 %vm1045_vm0, %v1121_v24  ;;  %v2411_v24 = vld [vmem:[#allocation13 + $0x10] sm:$0xff] }
 0x2b4   : > { %1214 = vmatpush.bf16.msrb.mxu1 %v2411_v24 }
 0x2c3   : > { %2226 = vmatmul.msk.bf16.vlgmr.msrb.gmra.mxu3 %vm1045_vm0, %v1251_v28 }
 0x326   : > { %v1110_v29 = vpop.f32.mrf.mxu3 }
 0x32e   : > { %v1112_v30 = vpop.f32.mrf.mxu3 }
 0x32f   : > { %v1115_v31 = vpack.c.bf16 %v1112_v30, %v1110_v29 }
 0x331   : > { %2225 = vmatmul.msk.bf16.vlgmr.msrb.gmra.mxu2 %vm1045_vm0, %v1115_v31 }
 0x336   : > { %v1139_v32 = vpop.f32.mrf.mxu3 }
 0x337   : > { %v1144_v33 = vsel %vm1066_vm1, %v1139_v32, -inf }
 0x338   : > { %1145 = vmax.xlane.f32.xlu2 %v1144_v33 }
 0x33e   : > { %v1141_v34 = vpop.f32.mrf.mxu3 }
 0x33f   : > { %v1147_v35 = vsel %vm1066_vm1, %v1141_v34, -inf }
 0x340   : > { %1148 = vmax.xlane.f32.xlu0 %v1147_v35 }
 0x341   : > { %2237 = vmatmul.msk.bf16.vlgmr.msra.gmra.mxu2 %vm1045_vm0, %v1354_v27 }
 0x346   : > { %v1269_v36 = vpop.f32.mrf.mxu3 }
 0x347   : > { %v1274_v37 = vsel %vm1066_vm1, %v1269_v36, -inf }
 0x348   : > { %1275 = vmax.xlane.f32.xlu0 %v1274_v37 }
 0x34e   : > { %v1271_v59 = vpop.f32.mrf.mxu3 }
 0x34f   : > { %v1277_v60 = vsel %vm1066_vm1, %v1271_v59, -inf }
 0x3ab   : > { %v1146_v42 = vpop.xlane.xlu2 %1145 }
 0x3ac   : > { %v1150_v43 = vsub.f32 %v1139_v32, %v1146_v42 }
 0x3ae   : > { %v1152_v47 = vmul.f32 1.442695, %v1150_v43 }
 0x3b3   : > { %v1149_v38 = vpop.xlane.xlu0 %1148 }
 0x3b4   : > { %v1151_v39 = vsub.f32 %v1141_v34, %v1149_v38  ;;  %v3340_v40 = vpop.f32.mrf.mxu2 }
 0x3b6   : > { %v1154_v41 = vmul.f32 1.442695, %v1151_v39 }
 0x3b8   : > { %2615 = vpow2.f32 %v1154_v41 }
 0x3b9   : > { %2617 = vpow2.f32 %v1152_v47  ;;  %v2414_v47 = vld [vmem:[#allocation13 + $0x28] sm:$0xff] }
 0x3ba   : > { %1343 = vmatpush.bf16.msra.mxu1 %v2414_v47 }
 0x3bb   : > { %v1276_v48 = vpop.xlane.xlu0 %1275 }
 0x3bc   : > { %v3342_v44 = vpop.f32.mrf.mxu2  ;;  %v1280_v49 = vsub.f32 %v1269_v36, %v1276_v48  ;;  %v2413_v48 = vld [vmem:[#allocation13 + $0x20] sm:$0xff] }
 0x3be   : > { %v2616_v45 = vpop.eup %2615  ;;  %v1282_v52 = vmul.f32 1.442695, %v1280_v49  ;;  %1344 = vmatpush.bf16.msra.mxu1 %v2413_v48  ;;  %v2266_v48 = vld [vmem:[#allocation15 + $0x20] sm:$0xf] }
 0x3bf   : > { %v1159_v46 = vsel %vm1066_vm1, %v2616_v45, 0.0  ;;  %v2618_v53 = vpop.eup %2617 }
 0x3c0   : > { %1160 = vadd.xlane.f32.xlu0 %v1159_v46  ;;  %2619 = vpow2.f32 %v1282_v52  ;;  %v1156_v55 = vsel %vm1066_vm1, %v2618_v53, 0.0  ;;  %v2415_v46 = vld [vmem:[#allocation13 + $0x30] sm:$0xff] }
 0x3c4   : > { %v1372_v50 = vpop.f32.mrf.mxu2 }
 0x3c5   : > { %v1377_v51 = vsel %vm1066_vm1, %v1372_v50, -inf }
 0x3c6   : > { %1378 = vmax.xlane.f32.xlu1 %v1377_v51  ;;  %v3348_v57 = vpop.eup %2619 }
 0x3c7   : > { %v1286_v61 = vsel %vm1066_vm1, %v3348_v57, 0.0 }
 0x3cc   : > { %v1374_v54 = vpop.f32.mrf.mxu2 }
 0x3cd   : > { %v1380_v56 = vsel %vm1066_vm1, %v1374_v54, -inf }
 0x3ce   : > { %1157 = vadd.xlane.f32.xlu1 %v1156_v55  ;;  %1381 = vmax.xlane.f32.xlu2 %v1380_v56 }
 0x3d6   : > { %1278 = vmax.xlane.f32.xlu2 %v1277_v60  ;;  %1287 = vadd.xlane.f32.xlu1 %v1286_v61 }
 0x3ee   : > { %1167 = vrot.lane.b32.xlu2 %v3320_v58, %s3003_s11  ;;  %s3534_s11 = sld [smem:[#allocation46_spill]] }
 0x433   : > { %v1161_v4 = vpop.xlane.xlu0 %1160 }
 0x439   : > { %v1379_v62 = vpop.xlane.xlu1 %1378 }
 0x43a   : > { %v1383_v63 = vsub.f32 %v1372_v50, %v1379_v62  ;;  %v2601_v62 = vld [vmem:[%s3469_s9] ss:$0 sm:$0xff] }
 0x43c   : > { %v1385_v0 = vmul.f32 1.442695, %v1383_v63 }
 0x43e   : > { %2621 = vpow2.f32 %v1385_v0 }
 0x441   : > { %v1382_v1 = vpop.xlane.xlu2 %1381  ;;  %v1158_v2 = vpop.xlane.xlu1 %1157 }
 0x442   : > { %2623 = vrcp.f32 %v1158_v2  ;;  %v1384_v9 = vsub.f32 %v1374_v54, %v1382_v1 }
 0x443   : > { %2625 = vrcp.f32 %v1161_v4 }
 0x444   : > { %v2622_v3 = vpop.eup %2621  ;;  %v1387_v13 = vmul.f32 1.442695, %v1384_v9 }
 0x445   : > { %v1389_v5 = vsel %vm1066_vm1, %v2622_v3, 0.0 }
 0x446   : > { %1390 = vadd.xlane.f32.xlu1 %v1389_v5 }
 0x448   : > { %v2624_v8 = vpop.eup %2623 }
 0x449   : > { %v1279_v6 = vpop.xlane.xlu2 %1278  ;;  %v2626_v11 = vpop.eup %2625  ;;  %v1164_v12 = vmul.f32 %v2624_v8, %v2618_v53 }
 0x44a   : > { %v1281_v7 = vsub.f32 %v1271_v59, %v1279_v6  ;;  %v1165_v14 = vmul.f32 %v2626_v11, %v2616_v45  ;;  %v1288_v25 = vpop.xlane.xlu1 %1287  ;;  %v2416_v45 = vld [vmem:[#allocation13 + $0x38] sm:$0xff] }
 0x44b   : > { %v2432_v11 = vld [vmem:[#allocation15 + $0x74] sm:$0xf0] }
 0x44c   : > { %v1284_v10 = vmul.f32 1.442695, %v1281_v7  ;;  %v1166_v16 = vpack.c.bf16 %v1165_v14, %v1164_v12  ;;  %v2431_v12 = vld [vmem:[#allocation15 + $0x74] sm:$0xf]  ;;  %v2308_v14 = vld [vmem:[#allocation15 + $0x78] sm:$0xf0] }
 0x44e   : > { %2627 = vpow2.f32 %v1284_v10  ;;  %v2306_v10 = vld [vmem:[#allocation15 + $0x70] sm:$0xf] }
 0x44f   : > { %2629 = vpow2.f32 %v1387_v13  ;;  %v2307_v13 = vor.u32 %v2432_v11, %v2306_v10 }
 0x451   : > { %v1168_v15 = vpop.permute.xlu2 %1167 }
 0x452   : > { %1180 = vmatpush.bf16.msrb.mxu0 %v1168_v15 }
 0x454   : > { %v2628_v17 = vpop.eup %2627 }
 0x455   : > { %2207 = vmatmul.msk.bf16.vlgmr.msrb.gmra.mxu0 %vm1066_vm1, %v1166_v16  ;;  %v1289_v18 = vsel %vm1066_vm1, %v2628_v17, 0.0  ;;  %v2630_v21 = vpop.eup %2629  ;;  %v2311_v16 = vor.u32 %v2431_v12, %v2308_v14 }
 0x456   : > { %1290 = vadd.xlane.f32.xlu0 %v1289_v18  ;;  %v1392_v22 = vsel %vm1066_vm1, %v2630_v21, 0.0  ;;  %v2429_v18 = vld [vmem:[#allocation15 + $0x64] sm:$0xf] }
 0x457   : > { %1646 = vmatpush.bf16.msrb.mxu2 %v2311_v16  ;;  %v2448_v16 = vld [vmem:[#allocation16 + $0x78] sm:$0xff] }
 0x45e   : > { %1393 = vadd.xlane.f32.xlu0 %v1392_v22  ;;  %v2300_v22 = vld [vmem:[#allocation15 + $0x68] sm:$0xf0] }
 0x45f   : > { %1400 = vrot.lane.b32.xlu1 %v3320_v58, %s3004_s22  ;;  %v2303_v24 = vor.u32 %v2429_v18, %v2300_v22  ;;  %v2447_v18 = vld [vmem:[#allocation16 + $0x70] sm:$0xff]  ;;  %s2449_s22 = sshll.u32 %s3532_s1, 4 }
 0x460   : > { %s1902_s25 = scalar_lea.hbm %s3535_s30, %s2449_s22 }
 0x461   : > { %1647 = vmatpush.bf16.msrb.mxu2 %v2303_v24  ;;  %s1905_s8 = sshll.u32 %s1902_s25, 4  ;;  %s1906_s8 = int_to_ptr.hbm [resolvable:$true] %s1905_s8 }
 0x472   : > { %1297 = vrot.lane.b32.xlu0 %v3320_v58, %s3005_s20  ;;  %s750_s20 = scalar_lea.vmem [#allocation18], %s3259_s13 }
 0x4b9   : > { %v1391_v26 = vpop.xlane.xlu1 %1390 }
 0x4ba   : > { %2631 = vrcp.f32 %v1391_v26  ;;  %v2428_v26 = vld [vmem:[#allocation15 + $0x54] sm:$0xf0] }
 0x4c0   : > { %v2632_v31 = vpop.eup %2631 }
 0x4c1   : > { %v1397_v33 = vmul.f32 %v2632_v31, %v2622_v3 }
 0x4c9   : > { %v1291_v27 = vpop.xlane.xlu0 %1290 }
 0x4d1   : > { %v1401_v28 = vpop.permute.xlu1 %1400  ;;  %v1394_v29 = vpop.xlane.xlu0 %1393 }
 0x4d2   : > { %2633 = vrcp.f32 %v1394_v29  ;;  %v1182_v30 = vpop.f32.mrf.mxu0  ;;  %1413 = vmatpush.bf16.msra.mxu3 %v1401_v28  ;;  %v2292_v29 = vld [vmem:[#allocation15 + $0x58] sm:$0xf0] }
 0x4d3   : > { %2635 = vrcp.f32 %v1291_v27  ;;  %v2427_v27 = vld [vmem:[#allocation15 + $0x54] sm:$0xf] }
 0x4d4   : > { %2637 = vrcp.f32 %v1288_v25  ;;  %v2290_v25 = vld [vmem:[#allocation15 + $0x50] sm:$0xf]  ;;  %v2295_v31 = vor.u32 %v2427_v27, %v2292_v29  ;;  %v2437_v29 = vld [vmem:[#allocation16 + $0x20] sm:$0xff] }
 0x4d5   : > { %v2291_v28 = vor.u32 %v2428_v26, %v2290_v25  ;;  %v2438_v25 = vld [vmem:[#allocation16 + $0x28] sm:$0xff] }
 0x4d6   : > { %1648 = vmatpush.bf16.msrb.mxu2 %v2295_v31  ;;  %v2446_v26 = vld [vmem:[#allocation16 + $0x68] sm:$0xff] }
 0x4d8   : > { %v2634_v32 = vpop.eup %2633 }
 0x4d9   : > { %v1398_v34 = vmul.f32 %v2634_v32, %v2630_v21  ;;  %v2636_v37 = vpop.eup %2635  ;;  %v2282_v32 = vld [vmem:[#allocation15 + $0x40] sm:$0xf] }
 0x4da   : > { %v1184_v35 = vpop.f32.mrf.mxu0  ;;  %v2638_v38 = vpop.eup %2637  ;;  %v1295_v39 = vmul.f32 %v2636_v37, %v2628_v17  ;;  %v2430_v17 = vld [vmem:[#allocation15 + $0x64] sm:$0xf0] }
 0x4db   : > { %v1399_v58 = vpack.c.bf16 %v1398_v34, %v1397_v33  ;;  %v1187_v36 = vpack.c.bf16 %v1184_v35, %v1182_v30  ;;  %v1294_v41 = vmul.f32 %v2638_v38, %v3348_v57  ;;  %v2426_v33 = vld [vmem:[#allocation15 + $0x44] sm:$0xf0]  ;;  %v2425_v34 = vld [vmem:[#allocation15 + $0x44] sm:$0xf]  ;;  %v2274_v38 = vld [vmem:[#allocation15 + $0x30] sm:$0xf] }
 0x4dc   : > { %v2283_v35 = vor.u32 %v2426_v33, %v2282_v32 }
 0x4dd   : > { %2216 = vmatmul.msk.bf16.vlgmr.msrb.gmra.mxu1 %vm1045_vm0, %v1187_v36  ;;  %2238 = vmatmul.msk.bf16.vlgmr.msra.gmra.mxu3 %vm1066_vm1, %v1399_v58  ;;  %v1296_v43 = vpack.c.bf16 %v1295_v39, %v1294_v41  ;;  %v2284_v58 = vld [vmem:[#allocation15 + $0x48] sm:$0xf0]  ;;  %v2424_v39 = vld [vmem:[#allocation15 + $0x34] sm:$0xf0]  ;;  %v2423_v41 = vld [vmem:[#allocation15 + $0x34] sm:$0xf] }
 0x4de   : > { %1632 = vmatpush.bf16.msrb.mxu1 %v2307_v13  ;;  %v2287_v37 = vor.u32 %v2425_v34, %v2284_v58 }
 0x4e0   : > { %1649 = vmatpush.bf16.msrb.mxu2 %v2287_v37 }
 0x4e4   : > { %v1298_v42 = vpop.permute.xlu0 %1297 }
 0x4e5   : > { %1310 = vmatpush.bf16.msra.mxu0 %v1298_v42  ;;  %v2275_v42 = vor.u32 %v2424_v39, %v2274_v38  ;;  %v2602_v38 = vld [vmem:[%s3474_s14] ss:$0 sm:$0xff] }
 0x4e8   : > { %2227 = vmatmul.msk.bf16.vlgmr.msra.gmra.mxu0 %vm1066_vm1, %v1296_v43  ;;  %v2276_v43 = vld [vmem:[#allocation15 + $0x38] sm:$0xf0] }
 0x4e9   : > { %1446 = vmatpush.bf16.msrb.mxu0 %v2416_v45 }
 0x4ed   : > { %1447 = vmatpush.bf16.msrb.mxu0 %v2415_v46  ;;  %v2279_v46 = vor.u32 %v2423_v41, %v2276_v43 }
 0x4ef   : > { %1650 = vmatpush.bf16.msrb.mxu2 %v2279_v46 }
 0x4f1   : > { %1812 = vmatpush.bf16.msra.mxu0 %v2448_v16 }
 0x4f5   : > { %1813 = vmatpush.bf16.msra.mxu0 %v2447_v18 }
 0x4f9   : > { %1814 = vmatpush.bf16.msra.mxu0 %v2446_v26 }
 0x55a   : > { %v1216_v55 = vpop.f32.mrf.mxu1 }
 0x55b   : > { %v1246_v57 = vadd.f32 %v3340_v40, %v1216_v55 }
 0x560   : > { %v1415_v49 = vpop.f32.mrf.mxu3 }
 0x562   : > { %v1218_v56 = vpop.f32.mrf.mxu1 }
 0x563   : > { %v1248_v1 = vadd.f32 %v3342_v44, %v1218_v56  ;;  %v3006_v44 = vmov 128.0  }
 0x564   : > { %2639 = vrcp.f32 %v3006_v44 }
 0x565   : > { %v1312_v50 = vpop.f32.mrf.mxu0 }
 0x568   : > { %v1417_v51 = vpop.f32.mrf.mxu3 }
 0x569   : > { %v1420_v52 = vpack.c.bf16 %v1417_v51, %v1415_v49  ;;  %v2422_v49 = vld [vmem:[#allocation15 + $0x24] sm:$0xf0] }
 0x56a   : > { %v2640_v9 = vpop.eup %2639 }
 0x56b   : > { %2247 = vmatmul.msk.bf16.vlgmr.msrb.gmra.mxu0 %vm1045_vm0, %v1420_v52  ;;  %v1469_v15 = vmul.f32 128.0, %v2640_v9  ;;  %vm1473_vm2 = vweird.f32 %v2640_v9  ;;  %v2267_v52 = vor.u32 %v2422_v49, %v2266_v48 }
 0x56d   : > { %v1314_v53 = vpop.f32.mrf.mxu0  ;;  %v1470_v23 = vsub.f32 1.0, %v1469_v15  ;;  %v2440_v15 = vld [vmem:[#allocation16 + $0x38] sm:$0xff] }
 0x56e   : > { %v1317_v54 = vpack.c.bf16 %v1314_v53, %v1312_v50  ;;  %v2421_v50 = vld [vmem:[#allocation15 + $0x24] sm:$0xf]  ;;  %v2268_v53 = vld [vmem:[#allocation15 + $0x28] sm:$0xf0]  ;;  %1798 = vmatpush.bf16.msrb.mxu3 %v2440_v15 }
 0x56f   : > { %v1471_v30 = vmul.f32 %v2640_v9, %v1470_v23  ;;  %v2271_v55 = vor.u32 %v2421_v50, %v2268_v53  ;;  %v2435_v53 = vld [vmem:[#allocation16 + $0x10] sm:$0xff] }
 0x570   : > { %2236 = vmatmul.msk.bf16.vlgmr.msra.gmra.mxu1 %vm1045_vm0, %v1317_v54 }
 0x571   : > { %v1472_v36 = vadd.f32 %v2640_v9, %v1471_v30  ;;  %1651 = vmatpush.bf16.msrb.mxu2 %v2271_v55  ;;  %v2443_v55 = vld [vmem:[#allocation16 + $0x50] sm:$0xff] }
 0x573   : > { %v3386_v45 = vsel %vm1473_vm2, %v2640_v9, %v1472_v36 }
 0x5e8   : > { %v1449_v59 = vpop.f32.mrf.mxu0 }
 0x5ed   : > { %v1346_v60 = vpop.f32.mrf.mxu1 }
 0x5ee   : > { %v1351_v61 = vadd.f32 %v1346_v60, %v1246_v57  ;;  %v2420_v60 = vld [vmem:[#allocation15 + $0x14] sm:$0xf0] }
 0x5f0   : > { %v1454_v63 = vadd.f32 %v1449_v59, %v1351_v61  ;;  %v1451_v5 = vpop.f32.mrf.mxu0  ;;  %v2258_v59 = vld [vmem:[#allocation15 + $0x10] sm:$0xf]  ;;  %v2419_v61 = vld [vmem:[#allocation15 + $0x14] sm:$0xf] }
 0x5f2   : > { %v1460_v0 = vadd.f32 %v2601_v62, %v1454_v63  ;;  %v2259_v63 = vor.u32 %v2420_v60, %v2258_v59  ;;  %v2441_v59 = vld [vmem:[#allocation16 + $0x40] sm:$0xff]  ;;  %v1546_v60 = vld [vmem:[%s3530_s10] sm:$0x3]  ;;  %s2903_s10 = sshra.s32 %s1906_s8, 4  ;;  %s2904_s10 = int_to_ptr.hbm [resolvable:$true] %s2903_s10 }
 0x5f3   : > { %s2905_s13 = scalar_lea.hbm %s2904_s10, 16  ;;  %p2910_p10 = scmp.lt.s32.totalorder %s2904_s10, %s3536_s26 }
 0x5f4   : > { %v3375_v2 = vadd.f32 %v1460_v0, %v3291_v19  ;;  %v2260_v0 = vld [vmem:[#allocation15 + $0x18] sm:$0xf0]  ;;  %p2906_p1 = scmp.ne.s32.totalorder %s2904_s10, %s2905_s13 }
 0x5f5   : > { %v1348_v3 = vpop.f32.mrf.mxu1 }
 0x5f6   : > { %v1352_v4 = vadd.f32 %v1348_v3, %v1248_v1  ;;  %1464 = vadd.xlane.f32.xlu2 %v3375_v2  ;;  %v1477_v40 = vmul.f32 %v3375_v2, %v3375_v2  ;;  %v2263_v1 = vor.u32 %v2419_v61, %v2260_v0  ;;  %v2250_v3 = vld [vmem:[#allocation15] sm:$0xf]  ;;  %p2907_p3 = pnand %p2906_p1, %p3224_p2 }
 0x5f8   : > { %v1455_v6 = vadd.f32 %v1451_v5, %v1352_v4  ;;  %1479 = vadd.xlane.f32.xlu1 %v1477_v40  ;;  %v2418_v4 = vld [vmem:[#allocation15 + $0x4] sm:$0xf0]  ;;  %v2417_v40 = vld [vmem:[#allocation15 + $0x4] sm:$0xf]  ;;  %1652 = vmatpush.bf16.msrb.mxu2 %v2263_v1  ;;  %p2908_p9 = pneg %p2907_p3 }
 0x5fa   : > { %v1461_v7 = vadd.f32 %v2601_v62, %v1455_v6  ;;  %v2251_v6 = vor.u32 %v2418_v4, %v2250_v3  ;;  %v1549_v3 = vperm.slane %v1546_v60, 1 }
 0x5fc   : > { %v3381_v8 = vadd.f32 %v1461_v7, %v3295_v20  ;;  %v2298_v20 = vld [vmem:[#allocation15 + $0x60] sm:$0xf]  ;;  %v2252_v7 = vld [vmem:[#allocation15 + $0x8] sm:$0xf0] }
 0x5fd   : > { %v2299_v21 = vor.u32 %v2430_v17, %v2298_v20  ;;  %v2255_v44 = vor.u32 %v2417_v40, %v2252_v7  ;;  %v2439_v17 = vld [vmem:[#allocation16 + $0x30] sm:$0xff] }
 0x5fe   : > { %1466 = vadd.xlane.f32.xlu0 %v3381_v8  ;;  %v1478_v19 = vmul.f32 %v3381_v8, %v3381_v8  ;;  %1799 = vmatpush.bf16.msrb.mxu3 %v2439_v17 }
 0x5ff   : > { %1633 = vmatpush.bf16.msrb.mxu1 %v2299_v21  ;;  %1653 = vmatpush.bf16.msrb.mxu2 %v2255_v44 }
 0x600   : > { %1481 = vadd.xlane.f32.xlu2 %v1478_v19 }
 0x602   : > { %1800 = vmatpush.bf16.msrb.mxu3 %v2438_v25 }
 0x603   : > { %1634 = vmatpush.bf16.msrb.mxu1 %v2291_v28 }
 0x606   : > { %1801 = vmatpush.bf16.msrb.mxu3 %v2437_v29 }
 0x607   : > { %1635 = vmatpush.bf16.msrb.mxu1 %v2283_v35 }
 0x60b   : > { %1636 = vmatpush.bf16.msrb.mxu1 %v2275_v42 }
 0x60f   : > { %1637 = vmatpush.bf16.msrb.mxu1 %v2267_v52  ;;  %v2445_v52 = vld [vmem:[#allocation16 + $0x60] sm:$0xff] }
 0x610   : > { %1815 = vmatpush.bf16.msra.mxu0 %v2445_v52 }
 0x613   : > { %1638 = vmatpush.bf16.msrb.mxu1 %v2259_v63 }
 0x617   : > { %1639 = vmatpush.bf16.msrb.mxu1 %v2251_v6 }
 0x669   : > { %v1465_v47 = vpop.xlane.xlu2 %1464 }
 0x66a   : > { %v3389_v51 = vmul.f32 %v3386_v45, %v1465_v47  ;;  %v2603_v47 = vld [vmem:[%s3529_s2] ss:$0 sm:$0xff]  ;;  %s1903_s2 = sshll.u32 %s750_s20, 4  ;;  %s1904_s2 = int_to_ptr.vmem [resolvable:$true] %s1903_s2 }
 0x66b   : > { %v1480_v54 = vpop.xlane.xlu1 %1479 }
 0x66c   : > { %v1485_v56 = vmul.f32 %v3389_v51, %v3389_v51  ;;  %v1483_v57 = vmul.f32 %v1480_v54, %v3386_v45  ;;  %v1491_v58 = vsub.f32 %v3375_v2, %v3389_v51  ;;  %v2436_v51 = vld [vmem:[#allocation16 + $0x18] sm:$0xff]  ;;  %v2434_v54 = vld [vmem:[#allocation16 + $0x8] sm:$0xff] }
 0x66d   : > { %1802 = vmatpush.bf16.msrb.mxu3 %v2436_v51 }
 0x66e   : > { %v1487_v62 = vsub.f32 %v1483_v57, %v1485_v56  ;;  %v2433_v56 = vld [vmem:[#allocation16] sm:$0xff]  ;;  %v2442_v57 = vld [vmem:[#allocation16 + $0x48] sm:$0xff] }
 0x670   : > { %v1489_v5 = vmax.f32 %v1487_v62, 0.0  ;;  %v1548_v62 = vperm.slane %v1546_v60, 0 }
 0x671   : > { %v1467_v19 = vpop.xlane.xlu0 %1466  ;;  %1803 = vmatpush.bf16.msrb.mxu3 %v2435_v53  ;;  %v2606_v53 = vld [vmem:[%s3534_s11] ss:$0 sm:$0xff] }
 0x672   : > { %v1493_v9 = vadd.f32 1e-05, %v1489_v5  ;;  %v1476_v10 = vmul.f32 %v3386_v45, %v1467_v19 }
 0x673   : > { %v1482_v11 = vpop.xlane.xlu2 %1481 }
 0x674   : > { %2641 = vrsqrt.f32 %v1493_v9  ;;  %v1486_v12 = vmul.f32 %v1476_v10, %v1476_v10  ;;  %v1484_v13 = vmul.f32 %v1482_v11, %v3386_v45  ;;  %vm1501_vm4 = vweird.f32 %v1493_v9 }
 0x675   : > { %v1492_v41 = vsub.f32 %v3381_v8, %v1476_v10  ;;  %v2444_v8 = vld [vmem:[#allocation16 + $0x58] sm:$0xff]  ;;  %1804 = vmatpush.bf16.msrb.mxu3 %v2434_v54 }
 0x676   : > { %v1488_v14 = vsub.f32 %v1484_v13, %v1486_v12  ;;  %1816 = vmatpush.bf16.msra.mxu0 %v2444_v8  ;;  %v2604_v12 = vld [vmem:[%s3531_s0] ss:$0 sm:$0xff]  ;;  %s2909_s0 = scalar_lea.hbm %s3536_s26, 32 }
 0x677   : > { %p2911_p11 = scmp.lt.s32.totalorder %s2909_s0, %s2905_s13 }
 0x678   : > { %v1490_v20 = vmax.f32 %v1488_v14, 0.0 }
 0x679   : > { %1805 = vmatpush.bf16.msrb.mxu3 %v2433_v56  ;;  %p2912_p12 = por %p2911_p11, %p2910_p10 }
 0x67a   : > { %v2642_v21 = vpop.eup %2641  ;;  %v1494_v23 = vadd.f32 1e-05, %v1490_v20  ;;  %1817 = vmatpush.bf16.msra.mxu0 %v2443_v55 }
 0x67b   : > { %v1496_v22 = vmul.f32 %v2642_v21, %v1493_v9  ;;  %vm1502_vm3 = vweird.f32 %v2642_v21  ;;  %p2913_p13 = pnand %p2912_p12, %p2908_p9 }
 0x67c   : > { %2643 = vrsqrt.f32 %v1494_v23  ;;  %vm1503_vm5 = vmor %vm1501_vm4, %vm1502_vm3  ;;  %vm1511_vm7 = vweird.f32 %v1494_v23 }
 0x67d   : > { %v1497_v24 = vmul.f32 %v2642_v21, %v1496_v22 }
 0x67e   : > { %1818 = vmatpush.bf16.msra.mxu0 %v2442_v57 }
 0x67f   : > { %v1498_v27 = vmul.f32 0.5, %v1497_v24 }
 0x681   : > { %v1499_v28 = vsub.f32 1.5, %v1498_v27 }
 0x682   : > { %v2644_v30 = vpop.eup %2643  ;;  %1819 = vmatpush.bf16.msra.mxu0 %v2441_v59 }
 0x683   : > { %v1500_v31 = vmul.f32 %v2642_v21, %v1499_v28  ;;  %v1506_v32 = vmul.f32 %v2644_v30, %v1494_v23  ;;  %vm1512_vm6 = vweird.f32 %v2644_v30 }
 0x684   : > { %vm1513_vm8 = vmor %vm1511_vm7, %vm1512_vm6 }
 0x685   : > { %v1507_v33 = vmul.f32 %v2644_v30, %v1506_v32  ;;  %v1504_v34 = vsel %vm1503_vm5, %v2642_v21, %v1500_v31 }
 0x686   : > { %v1515_v37 = vmul.f32 %v1504_v34, %v1491_v58 }
 0x687   : > { %v1508_v35 = vmul.f32 0.5, %v1507_v33 }
 0x688   : > { %v1521_v46 = vmul.f32 %v2602_v38, %v1515_v37 }
 0x689   : > { %v1509_v36 = vsub.f32 1.5, %v1508_v35 }
 0x68a   : > { %v1527_v48 = vadd.f32 %v2603_v47, %v1521_v46 }
 0x68b   : > { %v1510_v39 = vmul.f32 %v2644_v30, %v1509_v36 }
 0x68d   : > { %v1514_v42 = vsel %vm1513_vm8, %v2644_v30, %v1510_v39 }
 0x68e   : > { %v1516_v43 = vmul.f32 %v1514_v42, %v1492_v41 }
 0x690   : > { %v1522_v2 = vmul.f32 %v2602_v38, %v1516_v43 }
 0x692   : > { %v1528_v49 = vadd.f32 %v2603_v47, %v1522_v2 }
 0x694   : > { %v1529_v50 = vpack.c.bf16 %v1528_v49, %v1527_v48 }
 0x696   : > { %1640 = vmatmul.bf16.vlgmr.msrb.gmra.mxu1 %v1529_v50  ;;  %1654 = vmatmul.bf16.vlgmr.msrb.gmra.mxu2 %v1529_v50 }
 0x713   : > { %v1641_v61 = vpop.f32.mrf.mxu1 }
 0x714   : > { %v1642_v0 = vadd.f32 %v1641_v61, %v1548_v62 }
 0x716   : > { %v1660_v40 = vmax.f32 %v1642_v0, 0.0 }
 0x719   : > { %v1655_v63 = vpop.f32.mrf.mxu2 }
 0x71a   : > { %v1656_v6 = vadd.f32 %v1655_v63, %v1549_v3 }
 0x71b   : > { %v1643_v1 = vpop.f32.mrf.mxu1 }
 0x71c   : > { %v1644_v4 = vadd.f32 %v1643_v1, %v1548_v62  ;;  %v1661_v9 = vmax.f32 %v1656_v6, 0.0 }
 0x71e   : > { %v1662_v5 = vmax.f32 %v1644_v4, 0.0 }
 0x720   : > { %v1664_v7 = vpack.c.bf16 %v1662_v5, %v1660_v40 }
 0x721   : > { %v1657_v19 = vpop.f32.mrf.mxu2 }
 0x722   : > { %v1658_v44 = vadd.f32 %v1657_v19, %v1549_v3  ;;  %1806 = vmatmul.bf16.vlgmr.msrb.gmra.mxu3 %v1664_v7 }
 0x724   : > { %v1663_v10 = vmax.f32 %v1658_v44, 0.0 }
 0x726   : > { %v1665_v11 = vpack.c.bf16 %v1663_v10, %v1661_v9 }
 0x728   : > { %1820 = vmatmul.bf16.vlgmr.msra.gmra.mxu0 %v1665_v11 }
 0x7a5   : > { %v1807_v13 = vpop.f32.mrf.mxu3  ;;  %v1821_v14 = vpop.f32.mrf.mxu0 }
 0x7a6   : > { %v1808_v15 = vadd.f32 %v2604_v12, %v1807_v13 }
 0x7a8   : > { %v1822_v16 = vadd.f32 %v1821_v14, %v1808_v15 }
 0x7aa   : > { %v1826_v20 = vadd.f32 %v1822_v16, %v1527_v48 }
 0x7ac   : > { %1828 = vadd.xlane.f32.xlu2 %v1826_v20  ;;  %v1834_v17 = vmul.f32 %v1826_v20, %v1826_v20 }
 0x7ad   : > { %v1809_v18 = vpop.f32.mrf.mxu3  ;;  %v1823_v22 = vpop.f32.mrf.mxu0 }
 0x7ae   : > { %v1810_v21 = vadd.f32 %v2604_v12, %v1809_v18  ;;  %1836 = vadd.xlane.f32.xlu0 %v1834_v17 }
 0x7b0   : > { %v1824_v23 = vadd.f32 %v1823_v22, %v1810_v21 }
 0x7b2   : > { %v1827_v24 = vadd.f32 %v1824_v23, %v1528_v49 }
 0x7b4   : > { %1830 = vadd.xlane.f32.xlu2 %v1827_v24  ;;  %v1835_v25 = vmul.f32 %v1827_v24, %v1827_v24 }
 0x7b6   : > { %1838 = vadd.xlane.f32.xlu1 %v1835_v25 }
 0x81f   : > { %v1829_v26 = vpop.xlane.xlu2 %1828 }
 0x820   : > { %v1832_v27 = vmul.f32 %v1829_v26, %v3386_v45 }
 0x821   : > { %v1837_v28 = vpop.xlane.xlu0 %1836 }
 0x822   : > { %v1842_v29 = vmul.f32 %v1832_v27, %v1832_v27  ;;  %v1840_v30 = vmul.f32 %v1837_v28, %v3386_v45  ;;  %v1848_v50 = vsub.f32 %v1826_v20, %v1832_v27 }
 0x824   : > { %v1844_v31 = vsub.f32 %v1840_v30, %v1842_v29 }
 0x826   : > { %v1846_v32 = vmax.f32 %v1844_v31, 0.0 }
 0x827   : > { %v1831_v33 = vpop.xlane.xlu2 %1830 }
 0x828   : > { %v1850_v34 = vadd.f32 1e-05, %v1846_v32  ;;  %v1833_v35 = vmul.f32 %v1831_v33, %v3386_v45 }
 0x829   : > { %v1839_v58 = vpop.xlane.xlu1 %1838 }
 0x82a   : > { %2645 = vrsqrt.f32 %v1850_v34  ;;  %v1843_v36 = vmul.f32 %v1833_v35, %v1833_v35  ;;  %v1841_v37 = vmul.f32 %v1839_v58, %v3386_v45  ;;  %vm1858_vm10 = vweird.f32 %v1850_v34  ;;  %v2605_v45 = vld [vmem:[%s3533_s16] ss:$0 sm:$0xff] }
 0x82b   : > { %v1849_v61 = vsub.f32 %v1827_v24, %v1833_v35 }
 0x82c   : > { %v1845_v38 = vsub.f32 %v1841_v37, %v1843_v36 }
 0x82e   : > { %v1847_v39 = vmax.f32 %v1845_v38, 0.0 }
 0x830   : > { %v2646_v41 = vpop.eup %2645  ;;  %v1851_v43 = vadd.f32 1e-05, %v1847_v39 }
 0x831   : > { %v1853_v42 = vmul.f32 %v2646_v41, %v1850_v34  ;;  %vm1859_vm9 = vweird.f32 %v2646_v41 }
 0x832   : > { %2647 = vrsqrt.f32 %v1851_v43  ;;  %vm1860_vm11 = vmor %vm1858_vm10, %vm1859_vm9  ;;  %vm1868_vm13 = vweird.f32 %v1851_v43 }
 0x833   : > { %v1854_v46 = vmul.f32 %v2646_v41, %v1853_v42 }
 0x835   : > { %v1855_v47 = vmul.f32 0.5, %v1854_v46 }
 0x837   : > { %v1856_v2 = vsub.f32 1.5, %v1855_v47 }
 0x838   : > { %v2648_v48 = vpop.eup %2647 }
 0x839   : > { %v1857_v49 = vmul.f32 %v2646_v41, %v1856_v2  ;;  %v1863_v51 = vmul.f32 %v2648_v48, %v1851_v43  ;;  %vm1869_vm12 = vweird.f32 %v2648_v48 }
 0x83a   : > { %vm1870_vm14 = vmor %vm1868_vm13, %vm1869_vm12 }
 0x83b   : > { %v1861_v52 = vsel %vm1860_vm11, %v2646_v41, %v1857_v49  ;;  %v1864_v54 = vmul.f32 %v2648_v48, %v1863_v51 }
 0x83c   : > { %v1872_v8 = vmul.f32 %v1861_v52, %v1848_v50 }
 0x83d   : > { %v1865_v56 = vmul.f32 0.5, %v1864_v54 }
 0x83e   : > { %v1878_v55 = vmul.f32 %v2605_v45, %v1872_v8 }
 0x83f   : > { %v1866_v59 = vsub.f32 1.5, %v1865_v56 }
 0x840   : > { %v1884_v57 = vadd.f32 %v2606_v53, %v1878_v55 }
 0x841   : > { %v1867_v60 = vmul.f32 %v2648_v48, %v1866_v59 }
 0x842   : > { %1886 = vst [vmem:[%s750_s20] sm:$0xff] %v1884_v57 }
 0x843   : > { %v1871_v62 = vsel %vm1870_vm14, %v2648_v48, %v1867_v60 }
 0x844   : > { %v1873_v63 = vmul.f32 %v1871_v62, %v1849_v61 }
 0x846   : > { %v1879_v0 = vmul.f32 %v2605_v45, %v1873_v63 }
 0x848   : > { %v1885_v1 = vadd.f32 %v2606_v53, %v1879_v0 }
 0x84a   : > { %1887 = vst [vmem:[%s750_s20 + $0x8] sm:$0xff] %v1885_v1 }
 0x84b   : > { %2916 = shalt.err (!%p2913_p13)
}
 0x84c   : > { %s3007_s12 = smov 128   ;;  %s3008_s24 = smov 8  }
 0x84d   : > { %2488 = dma.vmem_to_hbm [thread:$0]  (%p3224_p2), %s1904_s2, 256, %s1906_s8, %s1889_s6, %s3007_s12, %s3007_s12, %s3008_s24  }
 0x84e PF: > { %s3538_s16 = sld [smem:[#allocation26_spill]]  ;;  %p2517_p0 = pnand %p2083_p6, %p3231_p5 }
 0x850   : > { %p2518_p4 = pneg %p2517_p0 }
 0x854   : > { %s1920_s18 = sand.u32 1, %s3538_s16  }
 0x855   : > { %s1921_s11 = scalar_lea.sflag [#allocation6], %s1920_s18 }
 0x856   : > { %2966 = dma.done.wait (%p2518_p4), %s1921_s11, 256  }
 0x857   : > { %2968 = vsyncadd (%p2518_p4), %s1921_s11, 4294967040  ;;  %s40_s19 = sadd.s32 1, %s2991_s19   ;;  %s3540_s22 = sld [smem:[#allocation27_spill]] }
 0x858   : > { %p37_p7 = scmp.ge.s32.totalorder %s40_s19, 4   ;;  %s3541_s29 = sld [smem:[#allocation32_spill]] }
 0x859   : > { %s3542_s30 = sld [smem:[#allocation29_spill]]  ;;  %s3544_s27 = smov %s2975_s28 }
 0x85a   : > { %s3543_s0 = sld [smem:[#allocation30_spill]]  ;;  %39 = sbr.rel (!%p37_p7) target bundleno = 26 (0x1a), region = 180 }
 0x85d   : > { %s3545_s28 = smov %s3540_s22 }
 0x85f   :  { %1927 = vsyncpa [#allocation5], 1 }
 0x860   :  { %1929 = vsyncpa [#allocation5 + $0x1], 1 }
 0x861   :  { %1930 = vsyncpa [#allocation8], 1 }
 0x862   :  { %1932 = vsyncpa [#allocation8 + $0x1], 1 }
 0x863   :  { %1933 = vsyncpa [#allocation11], 1 }
 0x864   :  { %1934 = vsyncpa [#allocation14], 1 }
 0x865   :  { %1935 = vsyncpa [#allocation17], 1 }
 0x866   :  { %1936 = vsyncpa [#allocation6], 1 }
 0x867   :  { %1938 = vsyncpa [#allocation6 + $0x1], 1 }

// kernel: tpu_custom_call.1
= control target key start
LH: loop header
LB: loop body
LE: loop exit
PB: predicated region body
PF: predicated region fallthrough
CT: control target
= control target key end

     0   :  { %s3460_s0 = inlined_call_operand.hbm [shape: f32[2,16,128], index: 0, kind: input, shape index: {}]   ;;  %s3461_s1 = inlined_call_operand.hbm [shape: f32[2,16,128], index: 1, kind: input, shape index: {}]   ;;  %s3462_s2 = inlined_call_operand.hbm [shape: bf16[128,128], index: 2, kind: input, shape index: {}]   ;;  %s3463_s3 = inlined_call_operand.vmem [shape: f32[1,128], index: 3, kind: input, shape index: {}]   ;;  %s3464_s4 = inlined_call_operand.hbm [shape: bf16[128,128], index: 4, kind: input, shape index: {}]   ;;  %s3465_s5 = inlined_call_operand.vmem [shape: f32[1,128], index: 5, kind: input, shape index: {}]   ;;  %s3466_s6 = inlined_call_operand.hbm [shape: bf16[128,128], index: 6, kind: input, shape index: {}]   ;;  %s3467_s7 = inlined_call_operand.vmem [shape: f32[1,128], index: 7, kind: input, shape index: {}]   ;;  %s3468_s8 = inlined_call_operand.hbm [shape: bf16[128,128], index: 8, kind: input, shape index: {}]   ;;  %s3469_s9 = inlined_call_operand.vmem [shape: f32[1,128], index: 9, kind: input, shape index: {}]   ;;  %s3470_s10 = inlined_call_operand.hbm [shape: bf16[128,256], index: 10, kind: input, shape index: {}]   ;;  %s3471_s11 = inlined_call_operand.vmem [shape: f32[1,256], index: 11, kind: input, shape index: {}]   ;;  %s3472_s12 = inlined_call_operand.hbm [shape: bf16[256,128], index: 12, kind: input, shape index: {}]   ;;  %s3473_s13 = inlined_call_operand.vmem [shape: f32[1,128], index: 13, kind: input, shape index: {}]   ;;  %s3474_s14 = inlined_call_operand.vmem [shape: f32[1,128], index: 14, kind: input, shape index: {}]   ;;  %s3475_s15 = inlined_call_operand.vmem [shape: f32[1,128], index: 15, kind: input, shape index: {}]   ;;  %s3476_s16 = inlined_call_operand.vmem [shape: f32[1,128], index: 16, kind: input, shape index: {}]   ;;  %s3477_s17 = inlined_call_operand.vmem [shape: f32[1,128], index: 17, kind: input, shape index: {}]   ;;  %s3478_s18 = inlined_call_operand.hbm [shape: f32[2,16,128], index: 18, kind: output, shape index: {}]  }
   0x1   :  { %3491 = sst [smem:[#allocation34_spill]] %s3460_s0 }
   0x2   :  { %3492 = sst [smem:[#allocation35_spill]] %s3461_s1 }
   0x3   :  { %3493 = sst [smem:[#allocation36_spill]] %s3462_s2 }
   0x4   :  { %3494 = sst [smem:[#allocation37_spill]] %s3464_s4 }
   0x5   :  { %3495 = sst [smem:[#allocation38_spill]] %s3466_s6 }
   0x6   :  { %3496 = sst [smem:[#allocation39_spill]] %s3468_s8 }
   0x7   :  { %3497 = sst [smem:[#allocation40_spill]] %s3470_s10 }
   0x8   :  { %3498 = sst [smem:[#allocation41_spill]] %s3471_s11 }
   0x9   :  { %3499 = sst [smem:[#allocation42_spill]] %s3472_s12 }
   0xa   :  { %3500 = sst [smem:[#allocation43_spill]] %s3473_s13 }
   0xb   :  { %3501 = sst [smem:[#allocation44_spill]] %s3475_s15 }
   0xc   :  { %3502 = sst [smem:[#allocation45_spill]] %s3476_s16 }
   0xd   :  { %3503 = sst [smem:[#allocation46_spill]] %s3477_s17 }
   0xe   :  { %3504 = sst [smem:[#allocation47_spill]] %s3478_s18 }
   0xf   :  { %23 = vsyncpa [#allocation5], 0 }
  0x10   :  { %25 = vsyncpa [#allocation5 + $0x1], 0 }
  0x11   :  { %26 = vsyncpa [#allocation8], 0 }
  0x12   :  { %28 = vsyncpa [#allocation8 + $0x1], 0 }
  0x13   :  { %29 = vsyncpa [#allocation11], 0 }
  0x14   :  { %30 = vsyncpa [#allocation14], 0 }
  0x15   :  { %31 = vsyncpa [#allocation17], 0 }
  0x16   :  { %32 = vsyncpa [#allocation6], 0 }
  0x17   :  { %34 = vsyncpa [#allocation6 + $0x1], 0  ;;  %s3104_s27 = smov 0   ;;  %s3106_s28 = smov 0  }
  0x18   :  { %s3108_s29 = smov 0   ;;  %s3110_s30 = smov 0  }
  0x19   :  { %s3112_s0 = smov 0   ;;  %s3114_s19 = smov 0  }
  0x1a LB: > { %3505 = sst [smem:[#allocation26_spill]] %s2971_s27  ;;  %s3135_s1 = sadd.s32 4294967295, %s2991_s19   ;;  %s2991_s19 = sphi %s3114_s19, %s40_s19   ;;  %s2987_s0 = sphi %s3112_s0, %s3543_s0   ;;  %s2983_s30 = sphi %s3110_s30, %s3542_s30   ;;  %s2979_s29 = sphi %s3108_s29, %s3541_s29   ;;  %s2975_s28 = sphi %s3106_s28, %s3545_s28   ;;  %s2971_s27 = sphi %s3104_s27, %s3544_s27  }
  0x1b   : > { %3506 = sst [smem:[#allocation27_spill]] %s2979_s29  ;;  %p2076_p0 = scmp.ge.s32.totalorder %s2991_s19, 1 }
  0x1c   : > { %3507 = sst [smem:[#allocation28_spill]] %s2983_s30  ;;  %p73_p1 = scmp.eq.s32.totalorder %s3135_s1, 0 }
  0x1d   : > { %3508 = sst [smem:[#allocation29_spill]] %s2987_s0  ;;  %p473_p2 = scmp.lt.s32.totalorder %s2991_s19, 3 }
  0x1e   : > { %s3509_s22 = sld [smem:[#allocation36_spill]]  ;;  %s2993_s24 = smov [#allocation9]  }
  0x1f   : > { %p3143_p3 = pnand %p2076_p0, %p473_p2  ;;  %s486_s25 = sshll.u32 %s2993_s24, 4  ;;  %s487_s25 = int_to_ptr.vmem [resolvable:$true] %s486_s25 }
  0x20   : > { %p2083_p6 = scmp.ge.s32.totalorder %s2991_s19, 2  ;;  %s3512_s4 = sld [smem:[#allocation37_spill]] }
  0x21   : > { %p2490_p4 = pneg %p3143_p3  ;;  %s2994_s18 = smov 64  }
  0x22   : > { %s2995_s17 = smov 4   ;;  %s2996_s24 = smov [#allocation10]  }
  0x23   : > { %p3151_p5 = pnand %p2490_p4, %p73_p1  ;;  %s503_s16 = sshll.u32 %s2996_s24, 4  ;;  %s504_s16 = int_to_ptr.vmem [resolvable:$true] %s503_s16 }
  0x24   : > { %s484_s2 = sshll.u32 %s3509_s22, 4  ;;  %s3513_s8 = sld [smem:[#allocation39_spill]]  ;;  %s485_s2 = int_to_ptr.hbm [resolvable:$true] %s484_s2 }
  0x25   : > { %2493 = dma.hbm_to_vmem [thread:$0]  (!%p3151_p5), %s485_s2, 1024, %s487_s25, [#allocation8], %s2994_s18, %s2994_s18, %s2995_s17  }
  0x26   : > { %s501_s22 = sshll.u32 %s3512_s4, 4  ;;  %s3514_s6 = sld [smem:[#allocation38_spill]]  ;;  %s502_s22 = int_to_ptr.hbm [resolvable:$true] %s501_s22 }
  0x27   : > { %2496 = dma.hbm_to_vmem [thread:$0]  (!%p3151_p5), %s502_s22, 1024, %s504_s16, [#allocation11], %s2994_s18, %s2994_s18, %s2995_s17  }
  0x28   : > { %s2997_s15 = smov [#allocation13]   ;;  %s2998_s13 = smov [#allocation12]  }
  0x29   : > { %s537_s2 = sshll.u32 %s2997_s15, 4  ;;  %s520_s30 = sshll.u32 %s2998_s13, 4  ;;  %s538_s2 = int_to_ptr.vmem [resolvable:$true] %s537_s2  ;;  %s521_s30 = int_to_ptr.vmem [resolvable:$true] %s520_s30 }
  0x2a   : > { %s535_s11 = sshll.u32 %s3513_s8, 4  ;;  %s3515_s10 = sld [smem:[#allocation40_spill]]  ;;  %s536_s11 = int_to_ptr.hbm [resolvable:$true] %s535_s11 }
  0x2b   : > { %2502 = dma.hbm_to_vmem [thread:$0]  (!%p3151_p5), %s536_s11, 1024, %s538_s2, [#allocation14], %s2994_s18, %s2994_s18, %s2995_s17  }
  0x2c   : > { %s518_s4 = sshll.u32 %s3514_s6, 4  ;;  %s2999_s15 = smov [#allocation15]   ;;  %s519_s4 = int_to_ptr.hbm [resolvable:$true] %s518_s4 }
  0x2d   : > { %2499 = dma.hbm_to_vmem [thread:$0]  (!%p3151_p5), %s519_s4, 1024, %s521_s30, [#allocation11], %s2994_s18, %s2994_s18, %s2995_s17  }
  0x2e   : > { %s554_s11 = sshll.u32 %s2999_s15, 4  ;;  %s3516_s12 = sld [smem:[#allocation42_spill]]  ;;  %s555_s11 = int_to_ptr.vmem [resolvable:$true] %s554_s11 }
  0x2f   : > { %s3480_s2 = smov 128   ;;  %s3482_s13 = smov 8  }
  0x30   : > { %s552_s16 = sshll.u32 %s3515_s10, 4  ;;  %s3002_s4 = smov [#allocation16]   ;;  %s553_s16 = int_to_ptr.hbm [resolvable:$true] %s552_s16 }
  0x31   : > { %2505 = dma.hbm_to_vmem [thread:$0]  (!%p3151_p5), %s553_s16, 2048, %s555_s11, [#allocation14], %s3480_s2, %s3480_s2, %s3482_s13  }
  0x32   : > { %s571_s30 = sshll.u32 %s3002_s4, 4  ;;  %s2075_s25 = sadd.s32 4294967294, %s2991_s19   ;;  %s572_s30 = int_to_ptr.vmem [resolvable:$true] %s571_s30 }
  0x33   : > { %s52_s24 = sadd.s32 1, %s2987_s0  ;;  %s59_s15 = sadd.s32 1, %s2979_s29 }
  0x34   : > { %s569_s21 = sshll.u32 %s3516_s12, 4  ;;  %p54_p7 = scmp.ge.s32.totalorder %s52_s24, 2  ;;  %s570_s21 = int_to_ptr.hbm [resolvable:$true] %s569_s21 }
  0x35   : > { %2508 = dma.hbm_to_vmem [thread:$0]  (!%p3151_p5), %s570_s21, 2048, %s572_s30, [#allocation17], %s2994_s18, %s2994_s18, %s2995_s17  }
  0x36   : > { %p66_p8 = scmp.ne.s32.totalorder %s2979_s29, %s2975_s28  ;;  %p67_p9 = scmp.eq.s32.totalorder %s2991_s19, 0 }
  0x37   : > { %s3547_s24 = smov (%p54_p7, %s52_s24), 0  ;;  %p72_p11 = scmp.ne.s32.totalorder %s2975_s28, %s2971_s27 }
  0x38   : > { %3517 = sst [smem:[#allocation30_spill]] %s3547_s24  ;;  %p3209_p10 = por %p67_p9, %p66_p8 }
  0x39   : > { %s56_s26 = ssub.s32 %s2987_s0, %s3547_s24  ;;  %p460_p12 = scmp.eq.s32.totalorder %s3135_s1, 1 }
  0x3a   : > { %p57_p13 = scmp.eq.s32.totalorder %s56_s26, 0  ;;  %p3220_p0 = por %p73_p1, %p72_p11 }
  0x3b   : > { %p3224_p2 = por %p460_p12, %p66_p8  ;;  %p466_p4 = scmp.eq.s32.totalorder %s2075_s25, 1 }
  0x3c   : > { %s3229_s11 = scalar_select %p57_p13, %s2979_s29, %s59_s15  }
  0x3d   : > { %s3520_s18 = scalar_select %p3224_p2, 1, 0 }
  0x3e   : > { %3522 = sst [smem:[#allocation32_spill]] %s3229_s11  ;;  %p3231_p5 = por %p466_p4, %p72_p11 }
  0x3f   : > { %3521 = sst [smem:[#allocation31_spill]] %s3520_s18  ;;  %p2526_p7 = scmp.lt.s32.totalorder %s2991_s19, 2 }
  0x40   : > { %s3523_s22 = scalar_select %p3231_p5, 1, 0 }
  0x41   : > { %s600_s20 = sand.u32 1, %s2979_s29   ;;  %s2381_s21 = sshll.u32 %s2987_s0, 4 }
  0x42   : > { %3524 = sst [smem:[#allocation33_spill]] %s3523_s22  ;;  %s2084_s4 = sshll.u32 %s600_s20, 4 }
  0x43   : > { %s3525_s2 = sld [smem:[#allocation34_spill]]  ;;  %s604_s8 = scalar_lea.vmem [#allocation4], %s2084_s4 }
  0x44   : > { %s612_s10 = sshll.u32 %s604_s8, 4  ;;  %p2510_p8 = pnand %p2526_p7, %p3209_p10  ;;  %s613_s10 = int_to_ptr.vmem [resolvable:$true] %s612_s10 }
  0x45   : > { %s3526_s12 = sld [smem:[#allocation35_spill]]  ;;  %s626_s11 = scalar_lea.vmem [#allocation7], %s2084_s4 }
  0x46   : > { %s634_s29 = sshll.u32 %s626_s11, 4  ;;  %s601_s22 = scalar_lea.sflag [#allocation5], %s600_s20  ;;  %s635_s29 = int_to_ptr.vmem [resolvable:$true] %s634_s29 }
  0x47   : > { %s3527_s27 = smov 8   ;;  %s3528_s18 = smov 128  }
  0x49   : > { %s609_s13 = scalar_lea.hbm %s3525_s2, %s2381_s21  ;;  %s622_s2 = sand.u32 1, %s2991_s19  }
  0x4a   : > { %s610_s6 = sshll.u32 %s609_s13, 4  ;;  %s623_s8 = scalar_lea.sflag [#allocation8], %s622_s2  ;;  %s611_s6 = int_to_ptr.hbm [resolvable:$true] %s610_s6 }
  0x4b   : > { %s631_s24 = scalar_lea.hbm %s3526_s12, %s2381_s21  ;;  %646 = sbr.rel (%p3143_p3) target bundleno = 2126 (0x84e), region = 92 }
  0x4c   : > { %s632_s0 = sshll.u32 %s631_s24, 4  ;;  %s3256_s12 = sand.u32 (!%p3143_p3), 1, %s2975_s28   ;;  %s633_s0 = int_to_ptr.hbm [resolvable:$true] %s632_s0 }
  0x4d   : > { %2512 = dma.hbm_to_vmem [thread:$0]  (!%p2510_p8), %s611_s6, 256, %s613_s10, %s601_s22, %s3528_s18, %s3528_s18, %s3527_s27  }
  0x4e   : > { %2515 = dma.hbm_to_vmem [thread:$0]  (!%p2510_p8), %s633_s0, 256, %s635_s29, %s623_s8, %s3528_s18, %s3528_s18, %s3527_s27  }
  0x4f   : > { %s3259_s13 = sshll.u32 (!%p3143_p3), %s3256_s12, 4  ;;  %s649_s6 = scalar_lea.sflag (!%p3143_p3), [#allocation5], %s3256_s12 }
  0x50   : > { %s652_s10 = scalar_lea.vmem [#allocation4], %s3259_s13 }
  0x51   : > { %2942 = dma.done.wait (%p3220_p0), %s649_s6, 256  }
  0x52   : > { %2944 = vsyncadd (%p3220_p0), %s649_s6, 4294967040  ;;  %s658_s27 = sand.u32 1, %s3135_s1   ;;  %s662_s0 = scalar_lea.vmem [#allocation7], %s3259_s13 }
  0x53   : > { %s659_s29 = scalar_lea.sflag [#allocation8], %s658_s27 }
  0x54   : > { %2946 = dma.done.wait (%p3220_p0), %s659_s29, 256  }
  0x55   : > { %2948 = vsyncadd (%p3220_p0), %s659_s29, 4294967040 }
  0x56   : > { %2950 = dma.done.wait (%p73_p1), [#allocation8], 1024  }
  0x57   : > { %2952 = vsyncadd (%p73_p1), [#allocation8], 4294966272 }
  0x58   : > { %2954 = dma.done.wait (%p73_p1), [#allocation11], 2048  }
  0x59   : > { %2956 = vsyncadd (%p73_p1), [#allocation11], 4294965248 }
  0x5a   : > { %2958 = dma.done.wait (%p73_p1), [#allocation14], 3072  }
  0x5b   : > { %2960 = vsyncadd (%p73_p1), [#allocation14], 4294964224 }
  0x5c   : > { %2962 = dma.done.wait (%p73_p1), [#allocation17], 2048  }
  0x5d   : > { %2964 = vsyncadd (%p73_p1), [#allocation17], 4294965248  ;;  %v2390_v0 = vld [vmem:[#allocation10 + $0x38] sm:$0xff]  ;;  %v2389_v2 = vld [vmem:[#allocation10 + $0x30] sm:$0xff]  ;;  %vm1045_vm0 = vcmask 261120   ;;  %s3003_s11 = smov 96  }
  0x5e   : > { %v2406_v1 = vld [vmem:[#allocation9 + $0x38] sm:$0xff]  ;;  %832 = vmatpush.bf16.msra.mxu0 %v2390_v0  ;;  %v2405_v3 = vld [vmem:[#allocation9 + $0x30] sm:$0xff]  ;;  %v2388_v4 = vld [vmem:[#allocation10 + $0x28] sm:$0xff]  ;;  %s3004_s22 = smov 32   ;;  %s3005_s20 = smov 64   ;;  %vm1066_vm1 = vcmask 130048  }
  0x5f   : > { %1015 = vmatpush.bf16.msra.mxu2 %v2406_v1  ;;  %v2404_v5 = vld [vmem:[#allocation9 + $0x28] sm:$0xff]  ;;  %v2398_v6 = vld [vmem:[#allocation12 + $0x38] sm:$0xff]  ;;  %v2397_v7 = vld [vmem:[#allocation12 + $0x30] sm:$0xff]  ;;  %s3529_s2 = sld [smem:[#allocation44_spill]]  ;;  %s1889_s6 = scalar_lea.sflag [#allocation6], %s3256_s12 }
  0x60   : > { %919 = vmatpush.bf16.msra.mxu1 %v2398_v6  ;;  %v2387_v8 = vld [vmem:[#allocation10 + $0x20] sm:$0xff]  ;;  %v2396_v10 = vld [vmem:[#allocation12 + $0x28] sm:$0xff]  ;;  %v2386_v11 = vld [vmem:[#allocation10 + $0x18] sm:$0xff]  ;;  %s3532_s1 = sld [smem:[#allocation28_spill]] }
  0x61   : > { %v2403_v9 = vld [vmem:[#allocation9 + $0x20] sm:$0xff]  ;;  %v2402_v12 = vld [vmem:[#allocation9 + $0x18] sm:$0xff]  ;;  %v2385_v14 = vld [vmem:[#allocation10 + $0x10] sm:$0xff]  ;;  %s3533_s16 = sld [smem:[#allocation45_spill]] }
  0x62   : > { %833 = vmatpush.bf16.msra.mxu0 %v2389_v2  ;;  %v2395_v13 = vld [vmem:[#allocation12 + $0x20] sm:$0xff]  ;;  %v2401_v15 = vld [vmem:[#allocation9 + $0x10] sm:$0xff]  ;;  %v2394_v16 = vld [vmem:[#allocation12 + $0x18] sm:$0xff]  ;;  %s3535_s30 = sld [smem:[#allocation47_spill]] }
  0x63   : > { %1016 = vmatpush.bf16.msra.mxu2 %v2405_v3  ;;  %v2384_v17 = vld [vmem:[#allocation10 + $0x8] sm:$0xff]  ;;  %v3291_v19 = vld [vmem:[%s652_s10] sm:$0xff] }
  0x64   : > { %920 = vmatpush.bf16.msra.mxu1 %v2397_v7  ;;  %v2400_v18 = vld [vmem:[#allocation9 + $0x8] sm:$0xff]  ;;  %v759_v21 = vld [vmem:[%s662_s0] sm:$0xff] }
  0x65   : > { %v3295_v20 = vld [vmem:[%s652_s10 + $0x8] sm:$0xff]  ;;  %v2393_v23 = vld [vmem:[#allocation12 + $0x10] sm:$0xff]  ;;  %v761_v24 = vadd.f32 %v759_v21, %v3291_v19  ;;  %v2383_v26 = vld [vmem:[#allocation10] sm:$0xff]  ;;  %s3530_s10 = sld [smem:[#allocation41_spill]] }
  0x66   : > { %834 = vmatpush.bf16.msra.mxu0 %v2388_v4  ;;  %v760_v22 = vld [vmem:[%s662_s0 + $0x8] sm:$0xff]  ;;  %v2399_v27 = vld [vmem:[#allocation9] sm:$0xff]  ;;  %v850_v31 = vpack.c.bf16 %v3295_v20, %v3291_v19  ;;  %v2598_v33 = vld [vmem:[%s3465_s5] ss:$0 sm:$0xff]  ;;  %s3531_s0 = sld [smem:[#allocation43_spill]] }
  0x67   : > { %1017 = vmatpush.bf16.msra.mxu2 %v2404_v5  ;;  %v762_v25 = vadd.f32 %v760_v22, %v3295_v20  ;;  %v2392_v28 = vld [vmem:[#allocation12 + $0x8] sm:$0xff]  ;;  %v2391_v30 = vld [vmem:[#allocation12] sm:$0xff]  ;;  %v2599_v38 = vld [vmem:[%s3463_s3] ss:$0 sm:$0xff] }
  0x68   : > { %921 = vmatpush.bf16.msra.mxu1 %v2396_v10  ;;  %v2600_v45 = vld [vmem:[%s3467_s7] ss:$0 sm:$0xff]  ;;  %v2410_v1 = vld [vmem:[#allocation13 + $0x8] sm:$0xff]  ;;  %v2409_v2 = vld [vmem:[#allocation13] sm:$0xff]  ;;  %s3536_s26 = smov %s3535_s30 }
  0x69   : > { %v763_v29 = vpack.c.bf16 %v762_v25, %v761_v24 }
  0x6a   : > { %835 = vmatpush.bf16.msra.mxu0 %v2387_v8 }
  0x6b   : > { %1018 = vmatpush.bf16.msra.mxu2 %v2403_v9 }
  0x6c   : > { %922 = vmatpush.bf16.msra.mxu1 %v2395_v13 }
  0x6e   : > { %836 = vmatpush.bf16.msra.mxu0 %v2386_v11 }
  0x6f   : > { %1019 = vmatpush.bf16.msra.mxu2 %v2402_v12 }
  0x70   : > { %923 = vmatpush.bf16.msra.mxu1 %v2394_v16 }
  0x72   : > { %837 = vmatpush.bf16.msra.mxu0 %v2385_v14 }
  0x73   : > { %1020 = vmatpush.bf16.msra.mxu2 %v2401_v15 }
  0x74   : > { %924 = vmatpush.bf16.msra.mxu1 %v2393_v23 }
  0x76   : > { %838 = vmatpush.bf16.msra.mxu0 %v2384_v17 }
  0x77   : > { %1021 = vmatpush.bf16.msra.mxu2 %v2400_v18 }
  0x78   : > { %925 = vmatpush.bf16.msra.mxu1 %v2392_v28 }
  0x7a   : > { %839 = vmatpush.bf16.msra.mxu0 %v2383_v26 }
  0x7b   : > { %1022 = vmatpush.bf16.msra.mxu2 %v2399_v27 }
  0x7c   : > { %926 = vmatpush.bf16.msra.mxu1 %v2391_v30 }
  0x7d   : > { %840 = vmatmul.bf16.vlgmr.msra.gmra.mxu0 %v763_v29 }
  0x7e   : > { %1023 = vmatmul.bf16.vlgmr.msra.gmra.mxu2 %v763_v29 }
  0x7f   : > { %927 = vmatmul.bf16.vlgmr.msra.gmra.mxu1 %v850_v31  ;;  %1242 = vmatpush.bf16.msrb.mxu2 %v2410_v1 }
  0x83   : > { %1243 = vmatpush.bf16.msrb.mxu2 %v2409_v2 }
  0xfa   : > { %v841_v32 = vpop.f32.mrf.mxu0 }
  0xfb   : > { %v842_v36 = vadd.f32 %v2598_v33, %v841_v32 }
  0xfc   : > { %v928_v42 = vpop.f32.mrf.mxu1 }
  0xfd   : > { %v929_v49 = vadd.f32 %v2600_v45, %v928_v42 }
 0x101   : > { %v1024_v34 = vpop.f32.mrf.mxu2 }
 0x102   : > { %v843_v35 = vpop.f32.mrf.mxu0  ;;  %v1025_v40 = vadd.f32 %v2599_v38, %v1024_v34 }
 0x103   : > { %v844_v37 = vadd.f32 %v2598_v33, %v843_v35 }
 0x104   : > { %v1029_v46 = vmul.f32 0.17677669, %v1025_v40  ;;  %v930_v52 = vpop.f32.mrf.mxu1 }
 0x105   : > { %v2453_v39 = vpack.c.bf16 %v844_v37, %v842_v36  ;;  %v931_v53 = vadd.f32 %v2600_v45, %v930_v52 }
 0x106   : > { %v1031_v50 = vpack.c.bf16 %v1029_v46, %v1029_v46 }
 0x107   : > { %2454 = vst [vmem:[#allocation2] sm:$0xff] %v2453_v39   ;;  %v2458_v55 = vpack.c.bf16 %v931_v53, %v929_v49 }
 0x108   : > { %v1037_v56 = vunpack.c.l.b16 %v1031_v50 }
 0x109   : > { %v1026_v41 = vpop.f32.mrf.mxu2  ;;  %2459 = vst [vmem:[#allocation3] sm:$0xff] %v2458_v55  }
 0x10a   : > { %v1027_v43 = vadd.f32 %v2599_v38, %v1026_v41 }
 0x10c   : > { %v1030_v44 = vmul.f32 0.17677669, %v1027_v43 }
 0x10e   : > { %v1032_v47 = vpack.c.bf16 %v1030_v44, %v1030_v44  ;;  %v2407_v48 = vld [vmem:[#allocation2] sm:$0xff] }
 0x10f   : > { %1122 = vrot.lane.b32.xlu2 %v2407_v48, %s3003_s11  ;;  %v1050_v51 = vsel %vm1045_vm0, %v2407_v48, 0 }
 0x110   : > { %1059 = vmatpush.bf16.xpose.msra.mxu3 %v1050_v51  ;;  %v1038_v54 = vunpack.c.l.b16 %v1032_v47  ;;  %v3320_v58 = vld [vmem:[#allocation3] sm:$0xff] }
 0x112   : > { %v1039_v57 = vpack.c.b16 %v1038_v54, %v1037_v56 }
 0x117   : > { %1120 = vrot.lane.b32.xlu2 %v1039_v57, %s3003_s11  ;;  %2200 = vmatmul.msk.bf16.vlgmr.msra.gmra.mxu3 %vm1045_vm0, %v1039_v57 }
 0x118   : > { %1108 = vmatpush.bf16.msrb.mxu3 %v3320_v58 }
 0x11f   : > { %1353 = vrot.lane.b32.xlu2 %v1039_v57, %s3004_s22 }
 0x127   : > { %1250 = vrot.lane.b32.xlu2 %v1039_v57, %s3005_s20 }
 0x169   : > { %v1123_v59 = vpop.permute.xlu2 %1122 }
 0x16a   : > { %v1128_v60 = vsel %vm1045_vm0, %v1123_v59, 0 }
 0x16b   : > { %1137 = vmatpush.bf16.xpose.msra.mxu3 %v1128_v60 }
 0x171   : > { %v1121_v24 = vpop.permute.xlu2 %1120 }
 0x179   : > { %v1354_v27 = vpop.permute.xlu2 %1353 }
 0x181   : > { %v1251_v28 = vpop.permute.xlu2 %1250 }
 0x19a   : > { %v1061_v61 = vpop.f32.mrf.mxu3 }
 0x19b   : > { %v1067_v62 = vsel %vm1066_vm1, %v1061_v61, -inf }
 0x19c   : > { %1068 = vmax.xlane.f32.xlu0 %v1067_v62 }
 0x1a2   : > { %v1063_v63 = vpop.f32.mrf.mxu3 }
 0x1a3   : > { %v1070_v0 = vsel %vm1066_vm1, %v1063_v63, -inf }
 0x1a4   : > { %1071 = vmax.xlane.f32.xlu0 %v1070_v0 }
 0x1b8   : > { %1355 = vrot.lane.b32.xlu0 %v2407_v48, %s3004_s22 }
 0x20f   : > { %v1069_v3 = vpop.xlane.xlu0 %1068 }
 0x210   : > { %v1073_v4 = vsub.f32 %v1061_v61, %v1069_v3 }
 0x212   : > { %v1075_v5 = vmul.f32 1.442695, %v1073_v4 }
 0x214   : > { %2607 = vpow2.f32 %v1075_v5 }
 0x217   : > { %v1072_v6 = vpop.xlane.xlu0 %1071 }
 0x218   : > { %v1074_v7 = vsub.f32 %v1063_v63, %v1072_v6 }
 0x21a   : > { %v2608_v8 = vpop.eup %2607  ;;  %v1077_v9 = vmul.f32 1.442695, %v1074_v7 }
 0x21b   : > { %v1079_v10 = vsel %vm1066_vm1, %v2608_v8, 0.0 }
 0x21c   : > { %2609 = vpow2.f32 %v1077_v9  ;;  %1080 = vadd.xlane.f32.xlu1 %v1079_v10 }
 0x222   : > { %v2610_v11 = vpop.eup %2609 }
 0x223   : > { %v1082_v12 = vsel %vm1066_vm1, %v2610_v11, 0.0 }
 0x224   : > { %1083 = vadd.xlane.f32.xlu1 %v1082_v12 }
 0x22a   : > { %v1356_v13 = vpop.permute.xlu0 %1355 }
 0x22b   : > { %v1361_v14 = vsel %vm1045_vm0, %v1356_v13, 0 }
 0x22c   : > { %1370 = vmatpush.bf16.xpose.msra.mxu2 %v1361_v14 }
 0x23d   : > { %1252 = vrot.lane.b32.xlu1 %v2407_v48, %s3005_s20 }
 0x28f   : > { %v1081_v15 = vpop.xlane.xlu1 %1080 }
 0x290   : > { %2611 = vrcp.f32 %v1081_v15 }
 0x296   : > { %v2612_v17 = vpop.eup %2611 }
 0x297   : > { %v1084_v16 = vpop.xlane.xlu1 %1083  ;;  %v1087_v21 = vmul.f32 %v2612_v17, %v2608_v8 }
 0x298   : > { %2613 = vrcp.f32 %v1084_v16 }
 0x29e   : > { %v2614_v18 = vpop.eup %2613 }
 0x29f   : > { %v1088_v22 = vmul.f32 %v2614_v18, %v2610_v11 }
 0x2a1   : > { %v1089_v23 = vpack.c.bf16 %v1088_v22, %v1087_v21 }
 0x2a3   : > { %2205 = vmatmul.msk.bf16.vlgmr.msrb.gmra.mxu3 %vm1066_vm1, %v1089_v23  ;;  %v2412_v23 = vld [vmem:[#allocation13 + $0x18] sm:$0xff] }
 0x2a4   : > { %1213 = vmatpush.bf16.msrb.mxu1 %v2412_v23 }
 0x2af   : > { %v1253_v25 = vpop.permute.xlu1 %1252 }
 0x2b0   : > { %v1258_v26 = vsel %vm1045_vm0, %v1253_v25, 0 }
 0x2b1   : > { %1267 = vmatpush.bf16.xpose.msrb.mxu3 %v1258_v26 }
 0x2b3   : > { %2206 = vmatmul.msk.bf16.vlgmr.msra.gmra.mxu3 %vm1045_vm0, %v1121_v24  ;;  %v2411_v24 = vld [vmem:[#allocation13 + $0x10] sm:$0xff] }
 0x2b4   : > { %1214 = vmatpush.bf16.msrb.mxu1 %v2411_v24 }
 0x2c3   : > { %2226 = vmatmul.msk.bf16.vlgmr.msrb.gmra.mxu3 %vm1045_vm0, %v1251_v28 }
 0x326   : > { %v1110_v29 = vpop.f32.mrf.mxu3 }
 0x32e   : > { %v1112_v30 = vpop.f32.mrf.mxu3 }
 0x32f   : > { %v1115_v31 = vpack.c.bf16 %v1112_v30, %v1110_v29 }
 0x331   : > { %2225 = vmatmul.msk.bf16.vlgmr.msrb.gmra.mxu2 %vm1045_vm0, %v1115_v31 }
 0x336   : > { %v1139_v32 = vpop.f32.mrf.mxu3 }
 0x337   : > { %v1144_v33 = vsel %vm1066_vm1, %v1139_v32, -inf }
 0x338   : > { %1145 = vmax.xlane.f32.xlu2 %v1144_v33 }
 0x33e   : > { %v1141_v34 = vpop.f32.mrf.mxu3 }
 0x33f   : > { %v1147_v35 = vsel %vm1066_vm1, %v1141_v34, -inf }
 0x340   : > { %1148 = vmax.xlane.f32.xlu0 %v1147_v35 }
 0x341   : > { %2237 = vmatmul.msk.bf16.vlgmr.msra.gmra.mxu2 %vm1045_vm0, %v1354_v27 }
 0x346   : > { %v1269_v36 = vpop.f32.mrf.mxu3 }
 0x347   : > { %v1274_v37 = vsel %vm1066_vm1, %v1269_v36, -inf }
 0x348   : > { %1275 = vmax.xlane.f32.xlu0 %v1274_v37 }
 0x34e   : > { %v1271_v59 = vpop.f32.mrf.mxu3 }
 0x34f   : > { %v1277_v60 = vsel %vm1066_vm1, %v1271_v59, -inf }
 0x3ab   : > { %v1146_v42 = vpop.xlane.xlu2 %1145 }
 0x3ac   : > { %v1150_v43 = vsub.f32 %v1139_v32, %v1146_v42 }
 0x3ae   : > { %v1152_v47 = vmul.f32 1.442695, %v1150_v43 }
 0x3b3   : > { %v1149_v38 = vpop.xlane.xlu0 %1148 }
 0x3b4   : > { %v1151_v39 = vsub.f32 %v1141_v34, %v1149_v38  ;;  %v3340_v40 = vpop.f32.mrf.mxu2 }
 0x3b6   : > { %v1154_v41 = vmul.f32 1.442695, %v1151_v39 }
 0x3b8   : > { %2615 = vpow2.f32 %v1154_v41 }
 0x3b9   : > { %2617 = vpow2.f32 %v1152_v47  ;;  %v2414_v47 = vld [vmem:[#allocation13 + $0x28] sm:$0xff] }
 0x3ba   : > { %1343 = vmatpush.bf16.msra.mxu1 %v2414_v47 }
 0x3bb   : > { %v1276_v48 = vpop.xlane.xlu0 %1275 }
 0x3bc   : > { %v3342_v44 = vpop.f32.mrf.mxu2  ;;  %v1280_v49 = vsub.f32 %v1269_v36, %v1276_v48  ;;  %v2413_v48 = vld [vmem:[#allocation13 + $0x20] sm:$0xff] }
 0x3be   : > { %v2616_v45 = vpop.eup %2615  ;;  %v1282_v52 = vmul.f32 1.442695, %v1280_v49  ;;  %1344 = vmatpush.bf16.msra.mxu1 %v2413_v48  ;;  %v2266_v48 = vld [vmem:[#allocation15 + $0x20] sm:$0xf] }
 0x3bf   : > { %v1159_v46 = vsel %vm1066_vm1, %v2616_v45, 0.0  ;;  %v2618_v53 = vpop.eup %2617 }
 0x3c0   : > { %1160 = vadd.xlane.f32.xlu0 %v1159_v46  ;;  %2619 = vpow2.f32 %v1282_v52  ;;  %v1156_v55 = vsel %vm1066_vm1, %v2618_v53, 0.0  ;;  %v2415_v46 = vld [vmem:[#allocation13 + $0x30] sm:$0xff] }
 0x3c4   : > { %v1372_v50 = vpop.f32.mrf.mxu2 }
 0x3c5   : > { %v1377_v51 = vsel %vm1066_vm1, %v1372_v50, -inf }
 0x3c6   : > { %1378 = vmax.xlane.f32.xlu1 %v1377_v51  ;;  %v3348_v57 = vpop.eup %2619 }
 0x3c7   : > { %v1286_v61 = vsel %vm1066_vm1, %v3348_v57, 0.0 }
 0x3cc   : > { %v1374_v54 = vpop.f32.mrf.mxu2 }
 0x3cd   : > { %v1380_v56 = vsel %vm1066_vm1, %v1374_v54, -inf }
 0x3ce   : > { %1157 = vadd.xlane.f32.xlu1 %v1156_v55  ;;  %1381 = vmax.xlane.f32.xlu2 %v1380_v56 }
 0x3d6   : > { %1278 = vmax.xlane.f32.xlu2 %v1277_v60  ;;  %1287 = vadd.xlane.f32.xlu1 %v1286_v61 }
 0x3ee   : > { %1167 = vrot.lane.b32.xlu2 %v3320_v58, %s3003_s11  ;;  %s3534_s11 = sld [smem:[#allocation46_spill]] }
 0x433   : > { %v1161_v4 = vpop.xlane.xlu0 %1160 }
 0x439   : > { %v1379_v62 = vpop.xlane.xlu1 %1378 }
 0x43a   : > { %v1383_v63 = vsub.f32 %v1372_v50, %v1379_v62  ;;  %v2601_v62 = vld [vmem:[%s3469_s9] ss:$0 sm:$0xff] }
 0x43c   : > { %v1385_v0 = vmul.f32 1.442695, %v1383_v63 }
 0x43e   : > { %2621 = vpow2.f32 %v1385_v0 }
 0x441   : > { %v1382_v1 = vpop.xlane.xlu2 %1381  ;;  %v1158_v2 = vpop.xlane.xlu1 %1157 }
 0x442   : > { %2623 = vrcp.f32 %v1158_v2  ;;  %v1384_v9 = vsub.f32 %v1374_v54, %v1382_v1 }
 0x443   : > { %2625 = vrcp.f32 %v1161_v4 }
 0x444   : > { %v2622_v3 = vpop.eup %2621  ;;  %v1387_v13 = vmul.f32 1.442695, %v1384_v9 }
 0x445   : > { %v1389_v5 = vsel %vm1066_vm1, %v2622_v3, 0.0 }
 0x446   : > { %1390 = vadd.xlane.f32.xlu1 %v1389_v5 }
 0x448   : > { %v2624_v8 = vpop.eup %2623 }
 0x449   : > { %v1279_v6 = vpop.xlane.xlu2 %1278  ;;  %v2626_v11 = vpop.eup %2625  ;;  %v1164_v12 = vmul.f32 %v2624_v8, %v2618_v53 }
 0x44a   : > { %v1281_v7 = vsub.f32 %v1271_v59, %v1279_v6  ;;  %v1165_v14 = vmul.f32 %v2626_v11, %v2616_v45  ;;  %v1288_v25 = vpop.xlane.xlu1 %1287  ;;  %v2416_v45 = vld [vmem:[#allocation13 + $0x38] sm:$0xff] }
 0x44b   : > { %v2432_v11 = vld [vmem:[#allocation15 + $0x74] sm:$0xf0] }
 0x44c   : > { %v1284_v10 = vmul.f32 1.442695, %v1281_v7  ;;  %v1166_v16 = vpack.c.bf16 %v1165_v14, %v1164_v12  ;;  %v2431_v12 = vld [vmem:[#allocation15 + $0x74] sm:$0xf]  ;;  %v2308_v14 = vld [vmem:[#allocation15 + $0x78] sm:$0xf0] }
 0x44e   : > { %2627 = vpow2.f32 %v1284_v10  ;;  %v2306_v10 = vld [vmem:[#allocation15 + $0x70] sm:$0xf] }
 0x44f   : > { %2629 = vpow2.f32 %v1387_v13  ;;  %v2307_v13 = vor.u32 %v2432_v11, %v2306_v10 }
 0x451   : > { %v1168_v15 = vpop.permute.xlu2 %1167 }
 0x452   : > { %1180 = vmatpush.bf16.msrb.mxu0 %v1168_v15 }
 0x454   : > { %v2628_v17 = vpop.eup %2627 }
 0x455   : > { %2207 = vmatmul.msk.bf16.vlgmr.msrb.gmra.mxu0 %vm1066_vm1, %v1166_v16  ;;  %v1289_v18 = vsel %vm1066_vm1, %v2628_v17, 0.0  ;;  %v2630_v21 = vpop.eup %2629  ;;  %v2311_v16 = vor.u32 %v2431_v12, %v2308_v14 }
 0x456   : > { %1290 = vadd.xlane.f32.xlu0 %v1289_v18  ;;  %v1392_v22 = vsel %vm1066_vm1, %v2630_v21, 0.0  ;;  %v2429_v18 = vld [vmem:[#allocation15 + $0x64] sm:$0xf] }
 0x457   : > { %1646 = vmatpush.bf16.msrb.mxu2 %v2311_v16  ;;  %v2448_v16 = vld [vmem:[#allocation16 + $0x78] sm:$0xff] }
 0x45e   : > { %1393 = vadd.xlane.f32.xlu0 %v1392_v22  ;;  %v2300_v22 = vld [vmem:[#allocation15 + $0x68] sm:$0xf0] }
 0x45f   : > { %1400 = vrot.lane.b32.xlu1 %v3320_v58, %s3004_s22  ;;  %v2303_v24 = vor.u32 %v2429_v18, %v2300_v22  ;;  %v2447_v18 = vld [vmem:[#allocation16 + $0x70] sm:$0xff]  ;;  %s2449_s22 = sshll.u32 %s3532_s1, 4 }
 0x460   : > { %s1902_s25 = scalar_lea.hbm %s3535_s30, %s2449_s22 }
 0x461   : > { %1647 = vmatpush.bf16.msrb.mxu2 %v2303_v24  ;;  %s1905_s8 = sshll.u32 %s1902_s25, 4  ;;  %s1906_s8 = int_to_ptr.hbm [resolvable:$true] %s1905_s8 }
 0x472   : > { %1297 = vrot.lane.b32.xlu0 %v3320_v58, %s3005_s20  ;;  %s750_s20 = scalar_lea.vmem [#allocation18], %s3259_s13 }
 0x4b9   : > { %v1391_v26 = vpop.xlane.xlu1 %1390 }
 0x4ba   : > { %2631 = vrcp.f32 %v1391_v26  ;;  %v2428_v26 = vld [vmem:[#allocation15 + $0x54] sm:$0xf0] }
 0x4c0   : > { %v2632_v31 = vpop.eup %2631 }
 0x4c1   : > { %v1397_v33 = vmul.f32 %v2632_v31, %v2622_v3 }
 0x4c9   : > { %v1291_v27 = vpop.xlane.xlu0 %1290 }
 0x4d1   : > { %v1401_v28 = vpop.permute.xlu1 %1400  ;;  %v1394_v29 = vpop.xlane.xlu0 %1393 }
 0x4d2   : > { %2633 = vrcp.f32 %v1394_v29  ;;  %v1182_v30 = vpop.f32.mrf.mxu0  ;;  %1413 = vmatpush.bf16.msra.mxu3 %v1401_v28  ;;  %v2292_v29 = vld [vmem:[#allocation15 + $0x58] sm:$0xf0] }
 0x4d3   : > { %2635 = vrcp.f32 %v1291_v27  ;;  %v2427_v27 = vld [vmem:[#allocation15 + $0x54] sm:$0xf] }
 0x4d4   : > { %2637 = vrcp.f32 %v1288_v25  ;;  %v2290_v25 = vld [vmem:[#allocation15 + $0x50] sm:$0xf]  ;;  %v2295_v31 = vor.u32 %v2427_v27, %v2292_v29  ;;  %v2437_v29 = vld [vmem:[#allocation16 + $0x20] sm:$0xff] }
 0x4d5   : > { %v2291_v28 = vor.u32 %v2428_v26, %v2290_v25  ;;  %v2438_v25 = vld [vmem:[#allocation16 + $0x28] sm:$0xff] }
 0x4d6   : > { %1648 = vmatpush.bf16.msrb.mxu2 %v2295_v31  ;;  %v2446_v26 = vld [vmem:[#allocation16 + $0x68] sm:$0xff] }
 0x4d8   : > { %v2634_v32 = vpop.eup %2633 }
 0x4d9   : > { %v1398_v34 = vmul.f32 %v2634_v32, %v2630_v21  ;;  %v2636_v37 = vpop.eup %2635  ;;  %v2282_v32 = vld [vmem:[#allocation15 + $0x40] sm:$0xf] }
 0x4da   : > { %v1184_v35 = vpop.f32.mrf.mxu0  ;;  %v2638_v38 = vpop.eup %2637  ;;  %v1295_v39 = vmul.f32 %v2636_v37, %v2628_v17  ;;  %v2430_v17 = vld [vmem:[#allocation15 + $0x64] sm:$0xf0] }
 0x4db   : > { %v1399_v58 = vpack.c.bf16 %v1398_v34, %v1397_v33  ;;  %v1187_v36 = vpack.c.bf16 %v1184_v35, %v1182_v30  ;;  %v1294_v41 = vmul.f32 %v2638_v38, %v3348_v57  ;;  %v2426_v33 = vld [vmem:[#allocation15 + $0x44] sm:$0xf0]  ;;  %v2425_v34 = vld [vmem:[#allocation15 + $0x44] sm:$0xf]  ;;  %v2274_v38 = vld [vmem:[#allocation15 + $0x30] sm:$0xf] }
 0x4dc   : > { %v2283_v35 = vor.u32 %v2426_v33, %v2282_v32 }
 0x4dd   : > { %2216 = vmatmul.msk.bf16.vlgmr.msrb.gmra.mxu1 %vm1045_vm0, %v1187_v36  ;;  %2238 = vmatmul.msk.bf16.vlgmr.msra.gmra.mxu3 %vm1066_vm1, %v1399_v58  ;;  %v1296_v43 = vpack.c.bf16 %v1295_v39, %v1294_v41  ;;  %v2284_v58 = vld [vmem:[#allocation15 + $0x48] sm:$0xf0]  ;;  %v2424_v39 = vld [vmem:[#allocation15 + $0x34] sm:$0xf0]  ;;  %v2423_v41 = vld [vmem:[#allocation15 + $0x34] sm:$0xf] }
 0x4de   : > { %1632 = vmatpush.bf16.msrb.mxu1 %v2307_v13  ;;  %v2287_v37 = vor.u32 %v2425_v34, %v2284_v58 }
 0x4e0   : > { %1649 = vmatpush.bf16.msrb.mxu2 %v2287_v37 }
 0x4e4   : > { %v1298_v42 = vpop.permute.xlu0 %1297 }
 0x4e5   : > { %1310 = vmatpush.bf16.msra.mxu0 %v1298_v42  ;;  %v2275_v42 = vor.u32 %v2424_v39, %v2274_v38  ;;  %v2602_v38 = vld [vmem:[%s3474_s14] ss:$0 sm:$0xff] }
 0x4e8   : > { %2227 = vmatmul.msk.bf16.vlgmr.msra.gmra.mxu0 %vm1066_vm1, %v1296_v43  ;;  %v2276_v43 = vld [vmem:[#allocation15 + $0x38] sm:$0xf0] }
 0x4e9   : > { %1446 = vmatpush.bf16.msrb.mxu0 %v2416_v45 }
 0x4ed   : > { %1447 = vmatpush.bf16.msrb.mxu0 %v2415_v46  ;;  %v2279_v46 = vor.u32 %v2423_v41, %v2276_v43 }
 0x4ef   : > { %1650 = vmatpush.bf16.msrb.mxu2 %v2279_v46 }
 0x4f1   : > { %1812 = vmatpush.bf16.msra.mxu0 %v2448_v16 }
 0x4f5   : > { %1813 = vmatpush.bf16.msra.mxu0 %v2447_v18 }
 0x4f9   : > { %1814 = vmatpush.bf16.msra.mxu0 %v2446_v26 }
 0x55a   : > { %v1216_v55 = vpop.f32.mrf.mxu1 }
 0x55b   : > { %v1246_v57 = vadd.f32 %v3340_v40, %v1216_v55 }
 0x560   : > { %v1415_v49 = vpop.f32.mrf.mxu3 }
 0x562   : > { %v1218_v56 = vpop.f32.mrf.mxu1 }
 0x563   : > { %v1248_v1 = vadd.f32 %v3342_v44, %v1218_v56  ;;  %v3006_v44 = vmov 128.0  }
 0x564   : > { %2639 = vrcp.f32 %v3006_v44 }
 0x565   : > { %v1312_v50 = vpop.f32.mrf.mxu0 }
 0x568   : > { %v1417_v51 = vpop.f32.mrf.mxu3 }
 0x569   : > { %v1420_v52 = vpack.c.bf16 %v1417_v51, %v1415_v49  ;;  %v2422_v49 = vld [vmem:[#allocation15 + $0x24] sm:$0xf0] }
 0x56a   : > { %v2640_v9 = vpop.eup %2639 }
 0x56b   : > { %2247 = vmatmul.msk.bf16.vlgmr.msrb.gmra.mxu0 %vm1045_vm0, %v1420_v52  ;;  %v1469_v15 = vmul.f32 128.0, %v2640_v9  ;;  %vm1473_vm2 = vweird.f32 %v2640_v9  ;;  %v2267_v52 = vor.u32 %v2422_v49, %v2266_v48 }
 0x56d   : > { %v1314_v53 = vpop.f32.mrf.mxu0  ;;  %v1470_v23 = vsub.f32 1.0, %v1469_v15  ;;  %v2440_v15 = vld [vmem:[#allocation16 + $0x38] sm:$0xff] }
 0x56e   : > { %v1317_v54 = vpack.c.bf16 %v1314_v53, %v1312_v50  ;;  %v2421_v50 = vld [vmem:[#allocation15 + $0x24] sm:$0xf]  ;;  %v2268_v53 = vld [vmem:[#allocation15 + $0x28] sm:$0xf0]  ;;  %1798 = vmatpush.bf16.msrb.mxu3 %v2440_v15 }
 0x56f   : > { %v1471_v30 = vmul.f32 %v2640_v9, %v1470_v23  ;;  %v2271_v55 = vor.u32 %v2421_v50, %v2268_v53  ;;  %v2435_v53 = vld [vmem:[#allocation16 + $0x10] sm:$0xff] }
 0x570   : > { %2236 = vmatmul.msk.bf16.vlgmr.msra.gmra.mxu1 %vm1045_vm0, %v1317_v54 }
 0x571   : > { %v1472_v36 = vadd.f32 %v2640_v9, %v1471_v30  ;;  %1651 = vmatpush.bf16.msrb.mxu2 %v2271_v55  ;;  %v2443_v55 = vld [vmem:[#allocation16 + $0x50] sm:$0xff] }
 0x573   : > { %v3386_v45 = vsel %vm1473_vm2, %v2640_v9, %v1472_v36 }
 0x5e8   : > { %v1449_v59 = vpop.f32.mrf.mxu0 }
 0x5ed   : > { %v1346_v60 = vpop.f32.mrf.mxu1 }
 0x5ee   : > { %v1351_v61 = vadd.f32 %v1346_v60, %v1246_v57  ;;  %v2420_v60 = vld [vmem:[#allocation15 + $0x14] sm:$0xf0] }
 0x5f0   : > { %v1454_v63 = vadd.f32 %v1449_v59, %v1351_v61  ;;  %v1451_v5 = vpop.f32.mrf.mxu0  ;;  %v2258_v59 = vld [vmem:[#allocation15 + $0x10] sm:$0xf]  ;;  %v2419_v61 = vld [vmem:[#allocation15 + $0x14] sm:$0xf] }
 0x5f2   : > { %v1460_v0 = vadd.f32 %v2601_v62, %v1454_v63  ;;  %v2259_v63 = vor.u32 %v2420_v60, %v2258_v59  ;;  %v2441_v59 = vld [vmem:[#allocation16 + $0x40] sm:$0xff]  ;;  %v1546_v60 = vld [vmem:[%s3530_s10] sm:$0x3]  ;;  %s2903_s10 = sshra.s32 %s1906_s8, 4  ;;  %s2904_s10 = int_to_ptr.hbm [resolvable:$true] %s2903_s10 }
 0x5f3   : > { %s2905_s13 = scalar_lea.hbm %s2904_s10, 16  ;;  %p2910_p10 = scmp.lt.s32.totalorder %s2904_s10, %s3536_s26 }
 0x5f4   : > { %v3375_v2 = vadd.f32 %v1460_v0, %v3291_v19  ;;  %v2260_v0 = vld [vmem:[#allocation15 + $0x18] sm:$0xf0]  ;;  %p2906_p1 = scmp.ne.s32.totalorder %s2904_s10, %s2905_s13 }
 0x5f5   : > { %v1348_v3 = vpop.f32.mrf.mxu1 }
 0x5f6   : > { %v1352_v4 = vadd.f32 %v1348_v3, %v1248_v1  ;;  %1464 = vadd.xlane.f32.xlu2 %v3375_v2  ;;  %v1477_v40 = vmul.f32 %v3375_v2, %v3375_v2  ;;  %v2263_v1 = vor.u32 %v2419_v61, %v2260_v0  ;;  %v2250_v3 = vld [vmem:[#allocation15] sm:$0xf]  ;;  %p2907_p3 = pnand %p2906_p1, %p3224_p2 }
 0x5f8   : > { %v1455_v6 = vadd.f32 %v1451_v5, %v1352_v4  ;;  %1479 = vadd.xlane.f32.xlu1 %v1477_v40  ;;  %v2418_v4 = vld [vmem:[#allocation15 + $0x4] sm:$0xf0]  ;;  %v2417_v40 = vld [vmem:[#allocation15 + $0x4] sm:$0xf]  ;;  %1652 = vmatpush.bf16.msrb.mxu2 %v2263_v1  ;;  %p2908_p9 = pneg %p2907_p3 }
 0x5fa   : > { %v1461_v7 = vadd.f32 %v2601_v62, %v1455_v6  ;;  %v2251_v6 = vor.u32 %v2418_v4, %v2250_v3  ;;  %v1549_v3 = vperm.slane %v1546_v60, 1 }
 0x5fc   : > { %v3381_v8 = vadd.f32 %v1461_v7, %v3295_v20  ;;  %v2298_v20 = vld [vmem:[#allocation15 + $0x60] sm:$0xf]  ;;  %v2252_v7 = vld [vmem:[#allocation15 + $0x8] sm:$0xf0] }
 0x5fd   : > { %v2299_v21 = vor.u32 %v2430_v17, %v2298_v20  ;;  %v2255_v44 = vor.u32 %v2417_v40, %v2252_v7  ;;  %v2439_v17 = vld [vmem:[#allocation16 + $0x30] sm:$0xff] }
 0x5fe   : > { %1466 = vadd.xlane.f32.xlu0 %v3381_v8  ;;  %v1478_v19 = vmul.f32 %v3381_v8, %v3381_v8  ;;  %1799 = vmatpush.bf16.msrb.mxu3 %v2439_v17 }
 0x5ff   : > { %1633 = vmatpush.bf16.msrb.mxu1 %v2299_v21  ;;  %1653 = vmatpush.bf16.msrb.mxu2 %v2255_v44 }
 0x600   : > { %1481 = vadd.xlane.f32.xlu2 %v1478_v19 }
 0x602   : > { %1800 = vmatpush.bf16.msrb.mxu3 %v2438_v25 }
 0x603   : > { %1634 = vmatpush.bf16.msrb.mxu1 %v2291_v28 }
 0x606   : > { %1801 = vmatpush.bf16.msrb.mxu3 %v2437_v29 }
 0x607   : > { %1635 = vmatpush.bf16.msrb.mxu1 %v2283_v35 }
 0x60b   : > { %1636 = vmatpush.bf16.msrb.mxu1 %v2275_v42 }
 0x60f   : > { %1637 = vmatpush.bf16.msrb.mxu1 %v2267_v52  ;;  %v2445_v52 = vld [vmem:[#allocation16 + $0x60] sm:$0xff] }
 0x610   : > { %1815 = vmatpush.bf16.msra.mxu0 %v2445_v52 }
 0x613   : > { %1638 = vmatpush.bf16.msrb.mxu1 %v2259_v63 }
 0x617   : > { %1639 = vmatpush.bf16.msrb.mxu1 %v2251_v6 }
 0x669   : > { %v1465_v47 = vpop.xlane.xlu2 %1464 }
 0x66a   : > { %v3389_v51 = vmul.f32 %v3386_v45, %v1465_v47  ;;  %v2603_v47 = vld [vmem:[%s3529_s2] ss:$0 sm:$0xff]  ;;  %s1903_s2 = sshll.u32 %s750_s20, 4  ;;  %s1904_s2 = int_to_ptr.vmem [resolvable:$true] %s1903_s2 }
 0x66b   : > { %v1480_v54 = vpop.xlane.xlu1 %1479 }
 0x66c   : > { %v1485_v56 = vmul.f32 %v3389_v51, %v3389_v51  ;;  %v1483_v57 = vmul.f32 %v1480_v54, %v3386_v45  ;;  %v1491_v58 = vsub.f32 %v3375_v2, %v3389_v51  ;;  %v2436_v51 = vld [vmem:[#allocation16 + $0x18] sm:$0xff]  ;;  %v2434_v54 = vld [vmem:[#allocation16 + $0x8] sm:$0xff] }
 0x66d   : > { %1802 = vmatpush.bf16.msrb.mxu3 %v2436_v51 }
 0x66e   : > { %v1487_v62 = vsub.f32 %v1483_v57, %v1485_v56  ;;  %v2433_v56 = vld [vmem:[#allocation16] sm:$0xff]  ;;  %v2442_v57 = vld [vmem:[#allocation16 + $0x48] sm:$0xff] }
 0x670   : > { %v1489_v5 = vmax.f32 %v1487_v62, 0.0  ;;  %v1548_v62 = vperm.slane %v1546_v60, 0 }
 0x671   : > { %v1467_v19 = vpop.xlane.xlu0 %1466  ;;  %1803 = vmatpush.bf16.msrb.mxu3 %v2435_v53  ;;  %v2606_v53 = vld [vmem:[%s3534_s11] ss:$0 sm:$0xff] }
 0x672   : > { %v1493_v9 = vadd.f32 1e-05, %v1489_v5  ;;  %v1476_v10 = vmul.f32 %v3386_v45, %v1467_v19 }
 0x673   : > { %v1482_v11 = vpop.xlane.xlu2 %1481 }
 0x674   : > { %2641 = vrsqrt.f32 %v1493_v9  ;;  %v1486_v12 = vmul.f32 %v1476_v10, %v1476_v10  ;;  %v1484_v13 = vmul.f32 %v1482_v11, %v3386_v45  ;;  %vm1501_vm4 = vweird.f32 %v1493_v9 }
 0x675   : > { %v1492_v41 = vsub.f32 %v3381_v8, %v1476_v10  ;;  %v2444_v8 = vld [vmem:[#allocation16 + $0x58] sm:$0xff]  ;;  %1804 = vmatpush.bf16.msrb.mxu3 %v2434_v54 }
 0x676   : > { %v1488_v14 = vsub.f32 %v1484_v13, %v1486_v12  ;;  %1816 = vmatpush.bf16.msra.mxu0 %v2444_v8  ;;  %v2604_v12 = vld [vmem:[%s3531_s0] ss:$0 sm:$0xff]  ;;  %s2909_s0 = scalar_lea.hbm %s3536_s26, 32 }
 0x677   : > { %p2911_p11 = scmp.lt.s32.totalorder %s2909_s0, %s2905_s13 }
 0x678   : > { %v1490_v20 = vmax.f32 %v1488_v14, 0.0 }
 0x679   : > { %1805 = vmatpush.bf16.msrb.mxu3 %v2433_v56  ;;  %p2912_p12 = por %p2911_p11, %p2910_p10 }
 0x67a   : > { %v2642_v21 = vpop.eup %2641  ;;  %v1494_v23 = vadd.f32 1e-05, %v1490_v20  ;;  %1817 = vmatpush.bf16.msra.mxu0 %v2443_v55 }
 0x67b   : > { %v1496_v22 = vmul.f32 %v2642_v21, %v1493_v9  ;;  %vm1502_vm3 = vweird.f32 %v2642_v21  ;;  %p2913_p13 = pnand %p2912_p12, %p2908_p9 }
 0x67c   : > { %2643 = vrsqrt.f32 %v1494_v23  ;;  %vm1503_vm5 = vmor %vm1501_vm4, %vm1502_vm3  ;;  %vm1511_vm7 = vweird.f32 %v1494_v23 }
 0x67d   : > { %v1497_v24 = vmul.f32 %v2642_v21, %v1496_v22 }
 0x67e   : > { %1818 = vmatpush.bf16.msra.mxu0 %v2442_v57 }
 0x67f   : > { %v1498_v27 = vmul.f32 0.5, %v1497_v24 }
 0x681   : > { %v1499_v28 = vsub.f32 1.5, %v1498_v27 }
 0x682   : > { %v2644_v30 = vpop.eup %2643  ;;  %1819 = vmatpush.bf16.msra.mxu0 %v2441_v59 }
 0x683   : > { %v1500_v31 = vmul.f32 %v2642_v21, %v1499_v28  ;;  %v1506_v32 = vmul.f32 %v2644_v30, %v1494_v23  ;;  %vm1512_vm6 = vweird.f32 %v2644_v30 }
 0x684   : > { %vm1513_vm8 = vmor %vm1511_vm7, %vm1512_vm6 }
 0x685   : > { %v1507_v33 = vmul.f32 %v2644_v30, %v1506_v32  ;;  %v1504_v34 = vsel %vm1503_vm5, %v2642_v21, %v1500_v31 }
 0x686   : > { %v1515_v37 = vmul.f32 %v1504_v34, %v1491_v58 }
 0x687   : > { %v1508_v35 = vmul.f32 0.5, %v1507_v33 }
 0x688   : > { %v1521_v46 = vmul.f32 %v2602_v38, %v1515_v37 }
 0x689   : > { %v1509_v36 = vsub.f32 1.5, %v1508_v35 }
 0x68a   : > { %v1527_v48 = vadd.f32 %v2603_v47, %v1521_v46 }
 0x68b   : > { %v1510_v39 = vmul.f32 %v2644_v30, %v1509_v36 }
 0x68d   : > { %v1514_v42 = vsel %vm1513_vm8, %v2644_v30, %v1510_v39 }
 0x68e   : > { %v1516_v43 = vmul.f32 %v1514_v42, %v1492_v41 }
 0x690   : > { %v1522_v2 = vmul.f32 %v2602_v38, %v1516_v43 }
 0x692   : > { %v1528_v49 = vadd.f32 %v2603_v47, %v1522_v2 }
 0x694   : > { %v1529_v50 = vpack.c.bf16 %v1528_v49, %v1527_v48 }
 0x696   : > { %1640 = vmatmul.bf16.vlgmr.msrb.gmra.mxu1 %v1529_v50  ;;  %1654 = vmatmul.bf16.vlgmr.msrb.gmra.mxu2 %v1529_v50 }
 0x713   : > { %v1641_v61 = vpop.f32.mrf.mxu1 }
 0x714   : > { %v1642_v0 = vadd.f32 %v1641_v61, %v1548_v62 }
 0x716   : > { %v1660_v40 = vmax.f32 %v1642_v0, 0.0 }
 0x719   : > { %v1655_v63 = vpop.f32.mrf.mxu2 }
 0x71a   : > { %v1656_v6 = vadd.f32 %v1655_v63, %v1549_v3 }
 0x71b   : > { %v1643_v1 = vpop.f32.mrf.mxu1 }
 0x71c   : > { %v1644_v4 = vadd.f32 %v1643_v1, %v1548_v62  ;;  %v1661_v9 = vmax.f32 %v1656_v6, 0.0 }
 0x71e   : > { %v1662_v5 = vmax.f32 %v1644_v4, 0.0 }
 0x720   : > { %v1664_v7 = vpack.c.bf16 %v1662_v5, %v1660_v40 }
 0x721   : > { %v1657_v19 = vpop.f32.mrf.mxu2 }
 0x722   : > { %v1658_v44 = vadd.f32 %v1657_v19, %v1549_v3  ;;  %1806 = vmatmul.bf16.vlgmr.msrb.gmra.mxu3 %v1664_v7 }
 0x724   : > { %v1663_v10 = vmax.f32 %v1658_v44, 0.0 }
 0x726   : > { %v1665_v11 = vpack.c.bf16 %v1663_v10, %v1661_v9 }
 0x728   : > { %1820 = vmatmul.bf16.vlgmr.msra.gmra.mxu0 %v1665_v11 }
 0x7a5   : > { %v1807_v13 = vpop.f32.mrf.mxu3  ;;  %v1821_v14 = vpop.f32.mrf.mxu0 }
 0x7a6   : > { %v1808_v15 = vadd.f32 %v2604_v12, %v1807_v13 }
 0x7a8   : > { %v1822_v16 = vadd.f32 %v1821_v14, %v1808_v15 }
 0x7aa   : > { %v1826_v20 = vadd.f32 %v1822_v16, %v1527_v48 }
 0x7ac   : > { %1828 = vadd.xlane.f32.xlu2 %v1826_v20  ;;  %v1834_v17 = vmul.f32 %v1826_v20, %v1826_v20 }
 0x7ad   : > { %v1809_v18 = vpop.f32.mrf.mxu3  ;;  %v1823_v22 = vpop.f32.mrf.mxu0 }
 0x7ae   : > { %v1810_v21 = vadd.f32 %v2604_v12, %v1809_v18  ;;  %1836 = vadd.xlane.f32.xlu0 %v1834_v17 }
 0x7b0   : > { %v1824_v23 = vadd.f32 %v1823_v22, %v1810_v21 }
 0x7b2   : > { %v1827_v24 = vadd.f32 %v1824_v23, %v1528_v49 }
 0x7b4   : > { %1830 = vadd.xlane.f32.xlu2 %v1827_v24  ;;  %v1835_v25 = vmul.f32 %v1827_v24, %v1827_v24 }
 0x7b6   : > { %1838 = vadd.xlane.f32.xlu1 %v1835_v25 }
 0x81f   : > { %v1829_v26 = vpop.xlane.xlu2 %1828 }
 0x820   : > { %v1832_v27 = vmul.f32 %v1829_v26, %v3386_v45 }
 0x821   : > { %v1837_v28 = vpop.xlane.xlu0 %1836 }
 0x822   : > { %v1842_v29 = vmul.f32 %v1832_v27, %v1832_v27  ;;  %v1840_v30 = vmul.f32 %v1837_v28, %v3386_v45  ;;  %v1848_v50 = vsub.f32 %v1826_v20, %v1832_v27 }
 0x824   : > { %v1844_v31 = vsub.f32 %v1840_v30, %v1842_v29 }
 0x826   : > { %v1846_v32 = vmax.f32 %v1844_v31, 0.0 }
 0x827   : > { %v1831_v33 = vpop.xlane.xlu2 %1830 }
 0x828   : > { %v1850_v34 = vadd.f32 1e-05, %v1846_v32  ;;  %v1833_v35 = vmul.f32 %v1831_v33, %v3386_v45 }
 0x829   : > { %v1839_v58 = vpop.xlane.xlu1 %1838 }
 0x82a   : > { %2645 = vrsqrt.f32 %v1850_v34  ;;  %v1843_v36 = vmul.f32 %v1833_v35, %v1833_v35  ;;  %v1841_v37 = vmul.f32 %v1839_v58, %v3386_v45  ;;  %vm1858_vm10 = vweird.f32 %v1850_v34  ;;  %v2605_v45 = vld [vmem:[%s3533_s16] ss:$0 sm:$0xff] }
 0x82b   : > { %v1849_v61 = vsub.f32 %v1827_v24, %v1833_v35 }
 0x82c   : > { %v1845_v38 = vsub.f32 %v1841_v37, %v1843_v36 }
 0x82e   : > { %v1847_v39 = vmax.f32 %v1845_v38, 0.0 }
 0x830   : > { %v2646_v41 = vpop.eup %2645  ;;  %v1851_v43 = vadd.f32 1e-05, %v1847_v39 }
 0x831   : > { %v1853_v42 = vmul.f32 %v2646_v41, %v1850_v34  ;;  %vm1859_vm9 = vweird.f32 %v2646_v41 }
 0x832   : > { %2647 = vrsqrt.f32 %v1851_v43  ;;  %vm1860_vm11 = vmor %vm1858_vm10, %vm1859_vm9  ;;  %vm1868_vm13 = vweird.f32 %v1851_v43 }
 0x833   : > { %v1854_v46 = vmul.f32 %v2646_v41, %v1853_v42 }
 0x835   : > { %v1855_v47 = vmul.f32 0.5, %v1854_v46 }
 0x837   : > { %v1856_v2 = vsub.f32 1.5, %v1855_v47 }
 0x838   : > { %v2648_v48 = vpop.eup %2647 }
 0x839   : > { %v1857_v49 = vmul.f32 %v2646_v41, %v1856_v2  ;;  %v1863_v51 = vmul.f32 %v2648_v48, %v1851_v43  ;;  %vm1869_vm12 = vweird.f32 %v2648_v48 }
 0x83a   : > { %vm1870_vm14 = vmor %vm1868_vm13, %vm1869_vm12 }
 0x83b   : > { %v1861_v52 = vsel %vm1860_vm11, %v2646_v41, %v1857_v49  ;;  %v1864_v54 = vmul.f32 %v2648_v48, %v1863_v51 }
 0x83c   : > { %v1872_v8 = vmul.f32 %v1861_v52, %v1848_v50 }
 0x83d   : > { %v1865_v56 = vmul.f32 0.5, %v1864_v54 }
 0x83e   : > { %v1878_v55 = vmul.f32 %v2605_v45, %v1872_v8 }
 0x83f   : > { %v1866_v59 = vsub.f32 1.5, %v1865_v56 }
 0x840   : > { %v1884_v57 = vadd.f32 %v2606_v53, %v1878_v55 }
 0x841   : > { %v1867_v60 = vmul.f32 %v2648_v48, %v1866_v59 }
 0x842   : > { %1886 = vst [vmem:[%s750_s20] sm:$0xff] %v1884_v57 }
 0x843   : > { %v1871_v62 = vsel %vm1870_vm14, %v2648_v48, %v1867_v60 }
 0x844   : > { %v1873_v63 = vmul.f32 %v1871_v62, %v1849_v61 }
 0x846   : > { %v1879_v0 = vmul.f32 %v2605_v45, %v1873_v63 }
 0x848   : > { %v1885_v1 = vadd.f32 %v2606_v53, %v1879_v0 }
 0x84a   : > { %1887 = vst [vmem:[%s750_s20 + $0x8] sm:$0xff] %v1885_v1 }
 0x84b   : > { %2916 = shalt.err (!%p2913_p13)
}
 0x84c   : > { %s3007_s12 = smov 128   ;;  %s3008_s24 = smov 8  }
 0x84d   : > { %2488 = dma.vmem_to_hbm [thread:$0]  (%p3224_p2), %s1904_s2, 256, %s1906_s8, %s1889_s6, %s3007_s12, %s3007_s12, %s3008_s24  }
 0x84e PF: > { %s3538_s16 = sld [smem:[#allocation26_spill]]  ;;  %p2517_p0 = pnand %p2083_p6, %p3231_p5 }
 0x850   : > { %p2518_p4 = pneg %p2517_p0 }
 0x854   : > { %s1920_s18 = sand.u32 1, %s3538_s16  }
 0x855   : > { %s1921_s11 = scalar_lea.sflag [#allocation6], %s1920_s18 }
 0x856   : > { %2966 = dma.done.wait (%p2518_p4), %s1921_s11, 256  }
 0x857   : > { %2968 = vsyncadd (%p2518_p4), %s1921_s11, 4294967040  ;;  %s40_s19 = sadd.s32 1, %s2991_s19   ;;  %s3540_s22 = sld [smem:[#allocation27_spill]] }
 0x858   : > { %p37_p7 = scmp.ge.s32.totalorder %s40_s19, 4   ;;  %s3541_s29 = sld [smem:[#allocation32_spill]] }
 0x859   : > { %s3542_s30 = sld [smem:[#allocation29_spill]]  ;;  %s3544_s27 = smov %s2975_s28 }
 0x85a   : > { %s3543_s0 = sld [smem:[#allocation30_spill]]  ;;  %39 = sbr.rel (!%p37_p7) target bundleno = 26 (0x1a), region = 180 }
 0x85d   : > { %s3545_s28 = smov %s3540_s22 }
 0x85f   :  { %1927 = vsyncpa [#allocation5], 1 }
 0x860   :  { %1929 = vsyncpa [#allocation5 + $0x1], 1 }
 0x861   :  { %1930 = vsyncpa [#allocation8], 1 }
 0x862   :  { %1932 = vsyncpa [#allocation8 + $0x1], 1 }
 0x863   :  { %1933 = vsyncpa [#allocation11], 1 }
 0x864   :  { %1934 = vsyncpa [#allocation14], 1 }
 0x865   :  { %1935 = vsyncpa [#allocation17], 1 }
 0x866   :  { %1936 = vsyncpa [#allocation6], 1 }
 0x867   :  { %1938 = vsyncpa [#allocation6 + $0x1], 1 }

</bundles_post_ra>
